<compile_context>
chip_gen: v6e
topology: v6e:2x2x1
jax: 0.10.0
libtpu: 0.0.40
codegen_flags: <defaults>
</compile_context>

<pallas_src>
import random
from functools import partial

import jax
import jax.numpy as jnp
from jax import lax
from jax.experimental import pallas as pl
from jax.experimental.pallas import tpu as pltpu

LANE = 128
SUBLANE = 8
TCHUNK = 8          # encoder timesteps per grid step (amortizes per-step overhead)


def _round_up(x, m):
    return ((x + m - 1) // m) * m


def _pick_tile(dim, preferred, quantum):
    """Largest multiple of `quantum` that divides `dim` and is <= preferred."""
    best = quantum
    t = quantum
    cap = min(preferred, dim)
    while t <= cap:
        if dim % t == 0:
            best = t
        t += quantum
    return best


def _vmem_limit(*arrays):
    """Scoped-VMEM request: 2x (double-buffer) the listed operands + headroom,
    floored at the 32 MiB default and capped at v7x's 64 MiB physical VMEM."""
    total = sum(int(a.size) * a.dtype.itemsize for a in arrays)
    return int(min(max(2 * total + (4 << 20), 32 << 20), 64 << 20))


# ---------------------------------------------------------------------------
# Tiled matmul+bias kernel (hoisted, non-recurrent x @ W_ih + b projection)
# ---------------------------------------------------------------------------
def matmul_bias_kernel(x_ref, w_ref, b_ref, o_ref):
    o_ref[...] = (jnp.dot(x_ref[...], w_ref[...],
                          preferred_element_type=jnp.float32) + b_ref[...])


def matmul_bias(x, w, b):
    """[M, K](bf16) @ [K, N](bf16) + [1, N](f32) -> [M, N](f32), tiled/pipelined."""
    M, K = x.shape
    N = w.shape[1]
    tm = _pick_tile(M, 256, 64)      # M = Sp*Bp is a multiple of 64
    tn = _pick_tile(N, 512, LANE)    # N = 4*Hp is a multiple of 128
    return pl.pallas_call(
        matmul_bias_kernel,
        grid=(M // tm, N // tn),
        in_specs=[pl.BlockSpec((tm, K), lambda i, j: (i, 0)),
                  pl.BlockSpec((K, tn), lambda i, j: (0, j)),
                  pl.BlockSpec((1, tn), lambda i, j: (0, j))],
        out_specs=pl.BlockSpec((tm, tn), lambda i, j: (i, j)),
        out_shape=jax.ShapeDtypeStruct((M, N), jnp.float32),
        compiler_params=pltpu.CompilerParams(
            dimension_semantics=("parallel", "parallel")),
    )(x, w, b)


# ---------------------------------------------------------------------------
# Encoder LSTM layer: one pallas_call per layer, time chunked on the grid
# ---------------------------------------------------------------------------
def enc_lstm_layer_kernel(xg_ref, whh_ref, len_ref,
                          seq_ref, hfin_ref, cfin_ref,
                          h_scr, c_scr, *, tchunk, hp):
    tc = pl.program_id(0)

    @pl.when(tc == 0)
    def _():
        h_scr[...] = jnp.zeros_like(h_scr)
        c_scr[...] = jnp.zeros_like(c_scr)

    h = h_scr[...]
    c = c_scr[...]
    lens = len_ref[...]                                   # [Bp, 1] int32

    for s in range(tchunk):                               # fully unrolled chunk
        t = tc * tchunk + s
        gates = xg_ref[s] + jnp.dot(h.astype(jnp.bfloat16), whh_ref[...],
                                    preferred_element_type=jnp.float32)
        i = jax.nn.sigmoid(gates[:, 0 * hp:1 * hp])
        f = jax.nn.sigmoid(gates[:, 1 * hp:2 * hp])
        g = jnp.tanh(gates[:, 2 * hp:3 * hp])
        o = jax.nn.sigmoid(gates[:, 3 * hp:4 * hp])
        c_new = f * c + i * g
        h_new = o * jnp.tanh(c_new)
        valid = lens > t                                  # packed-sequence freeze
        h = jnp.where(valid, h_new, h)
        c = jnp.where(valid, c_new, c)
        seq_ref[s] = h.astype(seq_ref.dtype)              # bf16 inter-layer stream

    h_scr[...] = h
    c_scr[...] = c

    @pl.when(tc == pl.num_programs(0) - 1)                # single final-state write
    def _():
        hfin_ref[...] = h
        cfin_ref[...] = c


def lstm_layer_forward(xg, whh, lens):
    Sp, Bp, G = xg.shape
    Hp = G // 4
    kernel = partial(enc_lstm_layer_kernel, tchunk=TCHUNK, hp=Hp)
    return pl.pallas_call(
        kernel,
        grid=(Sp // TCHUNK,),
        in_specs=[
            pl.BlockSpec((TCHUNK, Bp, G), lambda c: (c, 0, 0)),   # hoisted x@W_ih + b
            pl.BlockSpec((Hp, G), lambda c: (0, 0)),              # W_hh (bf16, resident)
            pl.BlockSpec((Bp, 1), lambda c: (0, 0)),              # source lengths
        ],
        out_specs=(
            pl.BlockSpec((TCHUNK, Bp, Hp), lambda c: (c, 0, 0)),  # hidden stream (bf16)
            pl.BlockSpec((Bp, Hp), lambda c: (0, 0)),             # final hidden
            pl.BlockSpec((Bp, Hp), lambda c: (0, 0)),             # final cell
        ),
        out_shape=(jax.ShapeDtypeStruct((Sp, Bp, Hp), jnp.bfloat16),
                   jax.ShapeDtypeStruct((Bp, Hp), jnp.float32),
                   jax.ShapeDtypeStruct((Bp, Hp), jnp.float32)),
        scratch_shapes=[pltpu.VMEM((Bp, Hp), jnp.float32),
                        pltpu.VMEM((Bp, Hp), jnp.float32)],
        compiler_params=pltpu.CompilerParams(
            dimension_semantics=("arbitrary",),                   # time recurrence
            vmem_limit_bytes=_vmem_limit(xg, whh)),
    )(xg, whh, lens)


# ---------------------------------------------------------------------------
# Fused decoder: ONE pallas_call for the whole decode loop (grid axis = time)
# ---------------------------------------------------------------------------
def dec_seq_kernel(tf_ref,
                   x0_ref, tgt_ref, h0_ref, c0_ref,
                   wih_ref, whh_ref, b_ref, fcw_ref, fcb_ref, emb_ref,
                   logits_ref,
                   h_scr, c_scr, x_scr, *, n_layer, hp, out_dim):
    t = pl.program_id(0)

    @pl.when(t == 0)
    def _():
        h_scr[...] = h0_ref[...]                 # encoder final hidden / cell
        c_scr[...] = c0_ref[...]
        x_scr[...] = x0_ref[...]                 # embed(target[0])

    x = x_scr[...]
    for l in range(n_layer):                     # static layer unroll
        h = h_scr[l]
        c = c_scr[l]
        gates = (jnp.dot(x.astype(jnp.bfloat16), wih_ref[l],
                         preferred_element_type=jnp.float32)
                 + jnp.dot(h.astype(jnp.bfloat16), whh_ref[l],
                           preferred_element_type=jnp.float32)
                 + b_ref[l])
        i = jax.nn.sigmoid(gates[:, 0 * hp:1 * hp])
        f = jax.nn.sigmoid(gates[:, 1 * hp:2 * hp])
        g = jnp.tanh(gates[:, 2 * hp:3 * hp])
        o = jax.nn.sigmoid(gates[:, 3 * hp:4 * hp])
        c_new = f * c + i * g
        h_new = o * jnp.tanh(c_new)
        h_scr[l] = h_new
        c_scr[l] = c_new
        x = h_new                                # dropout between layers: identity (eval)

    logits = (jnp.dot(x.astype(jnp.bfloat16), fcw_ref[...],
                      preferred_element_type=jnp.float32) + fcb_ref[...])
    logits_ref[0] = logits                       # lane-dense [Bp, Op] store

    # Greedy top-1 (first max index, padded columns masked) -> one-hot -> embedding.
    col_i = lax.broadcasted_iota(jnp.int32, logits.shape, 1)
    masked = jnp.where(col_i < out_dim, logits, jnp.float32(-1e30))
    m = jnp.max(masked, axis=1, keepdims=True)
    col_f = col_i.astype(jnp.float32)
    idx_f = jnp.min(jnp.where(masked == m, col_f, jnp.float32(1e9)),
                    axis=1, keepdims=True)
    onehot = (col_f == idx_f).astype(jnp.float32)
    top1_emb = jnp.dot(onehot, emb_ref[...], preferred_element_type=jnp.float32)

    # Next-step input: teacher-forced embedding or greedy embedding (0/1 blend).
    tf = tf_ref[t].astype(jnp.float32)
    x_scr[...] = tf * tgt_ref[0] + (1.0 - tf) * top1_emb


def decoder_forward(params, tf_flags, x0, tgt_next, hidden, cell, output_dim):
    n_layer, Bp, Hp = hidden.shape
    G = 4 * Hp
    Op = params['fc_w'].shape[1]
    Tm1 = tgt_next.shape[0]
    kernel = partial(dec_seq_kernel, n_layer=n_layer, hp=Hp, out_dim=output_dim)
    grid_spec = pltpu.PrefetchScalarGridSpec(
        num_scalar_prefetch=1,                   # teacher-forcing flags -> SMEM
        grid=(Tm1,),
        in_specs=[
            pl.BlockSpec((Bp, Hp), lambda t, tf: (0, 0)),              # embed(target[0])
            pl.BlockSpec((1, Bp, Hp), lambda t, tf: (t, 0, 0)),        # embed(target[t+1])
            pl.BlockSpec((n_layer, Bp, Hp), lambda t, tf: (0, 0, 0)),  # encoder h
            pl.BlockSpec((n_layer, Bp, Hp), lambda t, tf: (0, 0, 0)),  # encoder c
            pl.BlockSpec((n_layer, Hp, G), lambda t, tf: (0, 0, 0)),   # W_ih (resident)
            pl.BlockSpec((n_layer, Hp, G), lambda t, tf: (0, 0, 0)),   # W_hh (resident)
            pl.BlockSpec((n_layer, 1, G), lambda t, tf: (0, 0, 0)),    # bias
            pl.BlockSpec((Hp, Op), lambda t, tf: (0, 0)),              # fc_w (resident)
            pl.BlockSpec((1, Op), lambda t, tf: (0, 0)),               # fc_b
            pl.BlockSpec((Op, Hp), lambda t, tf: (0, 0)),              # dec embedding
        ],
        out_specs=pl.BlockSpec((1, Bp, Op), lambda t, tf: (t, 0, 0)),  # per-step logits
        scratch_shapes=[pltpu.VMEM((n_layer, Bp, Hp), jnp.float32),
                        pltpu.VMEM((n_layer, Bp, Hp), jnp.float32),
                        pltpu.VMEM((Bp, Hp), jnp.float32)],
    )
    return pl.pallas_call(
        kernel,
        grid_spec=grid_spec,
        out_shape=jax.ShapeDtypeStruct((Tm1, Bp, Op), jnp.float32),
        compiler_params=pltpu.CompilerParams(
            dimension_semantics=("arbitrary",),                        # time recurrence
            vmem_limit_bytes=_vmem_limit(
                params['dec_wih'], params['dec_whh'], params['dec_b'],
                params['fc_w'], params['fc_b'], params['dec_embed'],
                hidden, cell)),
    )(tf_flags, x0, tgt_next, hidden, cell,
      params['dec_wih'], params['dec_whh'], params['dec_b'],
      params['fc_w'], params['fc_b'], params['dec_embed'])


# ---------------------------------------------------------------------------
# Parameter init (deterministic, synthetic) + TPU-friendly padding
# ---------------------------------------------------------------------------
def _pad_gates(w, hidden_dim, Hp):
    """Pad the 4H gate axis per-gate (keeps PyTorch i,f,g,o layout) with zeros."""
    lead = w.shape[:-1]
    w4 = w.reshape(lead + (4, hidden_dim))
    w4 = jnp.pad(w4, [(0, 0)] * len(lead) + [(0, 0), (0, Hp - hidden_dim)])
    return w4.reshape(lead + (4 * Hp,))


def _pad_rows(w, rows_p):
    return jnp.pad(w, ((0, rows_p - w.shape[0]), (0, 0)))


def pad_params(p, embed_dim, hidden_dim, output_dim, n_layer):
    # NOTE: the zero padding of weight rows/cols + zero-initialized h/c is what keeps
    # padded lanes exactly zero through the whole network (checked in the demo).
    Hp = _round_up(hidden_dim, LANE)
    Op = _round_up(output_dim, LANE)
    assert embed_dim <= Hp, "decoder layer-0 fusion assumes embed_dim <= padded hidden"

    def pad_layer(layer, in_rows_p):
        return dict(
            wih=_pad_rows(_pad_gates(layer['wih'], hidden_dim, Hp),
                          in_rows_p).astype(jnp.bfloat16),
            whh=_pad_rows(_pad_gates(layer['whh'], hidden_dim, Hp),
                          Hp).astype(jnp.bfloat16),
            b=_pad_gates(layer['b'], hidden_dim, Hp),                  # f32
        )

    enc_layers = [pad_layer(p['enc_lstm'][l], embed_dim if l == 0 else Hp)
                  for l in range(n_layer)]
    dec_layers = [pad_layer(p['dec_lstm'][l], Hp) for l in range(n_layer)]

    return dict(
        enc_embed=p['enc_embed'],                                           # [V_in, E]
        dec_embed=jnp.pad(p['dec_embed'],
                          ((0, Op - output_dim), (0, Hp - embed_dim))),     # [Op, Hp]
        enc_layers=enc_layers,
        dec_wih=jnp.stack([d['wih'] for d in dec_layers], 0),               # [L, Hp, 4Hp]
        dec_whh=jnp.stack([d['whh'] for d in dec_layers], 0),               # [L, Hp, 4Hp]
        dec_b=jnp.stack([d['b'] for d in dec_layers], 0),                   # [L, 1, 4Hp]
        fc_w=jnp.pad(p['fc_w'], ((0, Hp - hidden_dim),
                                 (0, Op - output_dim))).astype(jnp.bfloat16),
        fc_b=jnp.pad(p['fc_b'], ((0, 0), (0, Op - output_dim))),
    )


def init_params(key, input_dim, output_dim, embed_dim, hidden_dim, n_layer):
    keys = iter(jax.random.split(key, 8 * n_layer + 8))
    scale = 1.0 / float(hidden_dim) ** 0.5

    def uni(shape):
        return jax.random.uniform(next(keys), shape, jnp.float32, -scale, scale)

    def lstm_stack(in_dim):
        layers = []
        for l in range(n_layer):
            d = in_dim if l == 0 else hidden_dim
            layers.append(dict(
                wih=uni((d, 4 * hidden_dim)),                               # W_ih^T
                whh=uni((hidden_dim, 4 * hidden_dim)),                      # W_hh^T
                b=uni((1, 4 * hidden_dim)) + uni((1, 4 * hidden_dim)),      # b_ih + b_hh
            ))
        return layers

    logical = dict(
        enc_embed=jax.random.normal(next(keys), (input_dim, embed_dim), jnp.float32),
        dec_embed=jax.random.normal(next(keys), (output_dim, embed_dim), jnp.float32),
        enc_lstm=lstm_stack(embed_dim),
        dec_lstm=lstm_stack(embed_dim),
        fc_w=uni((hidden_dim, output_dim)),
        fc_b=uni((1, output_dim)),
    )
    return pad_params(logical, embed_dim, hidden_dim, output_dim, n_layer)


# ---------------------------------------------------------------------------
# Model forward
# ---------------------------------------------------------------------------
def encoder_forward(params, source_p, lens_p, n_layer):
    Sp, Bp = source_p.shape
    emb = jnp.take(params['enc_embed'], source_p, axis=0).astype(jnp.bfloat16)  # [Sp,Bp,E]
    # embedding / inter-layer dropout: identity in eval mode
    layer_in = emb
    lens2 = lens_p.astype(jnp.int32)[:, None]                    # [Bp, 1]
    h_fin, c_fin = [], []
    for l in range(n_layer):
        lyr = params['enc_layers'][l]
        Din = layer_in.shape[-1]
        # Hoisted non-recurrent projection: one tiled MXU matmul over the whole sequence.
        xg = matmul_bias(layer_in.reshape(Sp * Bp, Din), lyr['wih'], lyr['b'])
        xg = xg.reshape(Sp, Bp, -1)
        seq, h_l, c_l = lstm_layer_forward(xg, lyr['whh'], lens2)
        layer_in = seq
        h_fin.append(h_l)
        c_fin.append(c_l)
    return jnp.stack(h_fin, 0), jnp.stack(c_fin, 0)              # [L, Bp, Hp] each


@partial(jax.jit, static_argnames=("n_layer", "output_dim", "teacher_forcing"))
def seq2seq_forward(params, source, source_length, target,
                    n_layer, output_dim, teacher_forcing=0.5):
    T, B = target.shape
    S = source.shape[0]
    Bp = _round_up(B, SUBLANE)
    Sp = _round_up(S, TCHUNK)
    source_p = jnp.pad(source, ((0, Sp - S), (0, Bp - B)))
    target_p = jnp.pad(target, ((0, 0), (0, Bp - B)))
    lens_p = jnp.pad(source_length, ((0, Bp - B),))   # padded rows: length 0 (frozen)

    hidden, cell = encoder_forward(params, source_p, lens_p, n_layer)

    if T <= 1:
        return jnp.zeros((T, B, output_dim), jnp.float32)

    # Deterministic stand-in for the per-step Python `random.random() < teacher_forcing`
    # (flags are baked in at trace time; one flag per decode step time=1..T-1).
    coin = random.Random(0)
    tf_flags = jnp.array([1 if coin.random() < teacher_forcing else 0
                          for _ in range(T - 1)], dtype=jnp.int32)

    # TODO(synk): inference mode (target=None) with early exit on eos_idx needs a
    # data-dependent Python break and is not implemented.

    tgt_emb = jnp.take(params['dec_embed'], target_p, axis=0)    # [T, Bp, Hp] f32
    logits_pad = decoder_forward(params, tf_flags, tgt_emb[0], tgt_emb[1:],
                                 hidden, cell, output_dim)       # [T-1, Bp, Op]

    outputs = jnp.concatenate(
        [jnp.zeros((1, Bp, output_dim), jnp.float32),
         logits_pad[:, :, :output_dim]], axis=0)
    return outputs[:, :B, :]


# ---------------------------------------------------------------------------
# Demo
# ---------------------------------------------------------------------------
if __name__ == "__main__":
    INPUT_DIM = 13     # encoder vocab
    OUTPUT_DIM = 11    # decoder vocab
    EMBED_DIM = 16
    HIDDEN_DIM = 32
    N_LAYER = 2
    SRC_LEN = 8
    TGT_LEN = 6
    BATCH = 2

    key = jax.random.PRNGKey(0)
    k_param, k_src, k_tgt = jax.random.split(key, 3)

    params = init_params(k_param, INPUT_DIM, OUTPUT_DIM, EMBED_DIM,
                         HIDDEN_DIM, N_LAYER)

    source = jax.random.randint(k_src, (SRC_LEN, BATCH), 0, INPUT_DIM, jnp.int32)
    target = jax.random.randint(k_tgt, (TGT_LEN, BATCH), 0, OUTPUT_DIM, jnp.int32)
    source_length = jnp.array([SRC_LEN, SRC_LEN - 3], jnp.int32)  # sorted desc

    outputs = seq2seq_forward(params, source, source_length, target,
                              n_layer=N_LAYER, output_dim=OUTPUT_DIM,
                              teacher_forcing=1.0)
    jax.block_until_ready(outputs)
    assert outputs.shape == (TGT_LEN, BATCH, OUTPUT_DIM)
    assert bool(jnp.all(jnp.isfinite(outputs)))

    # Load-bearing padding invariant: padded hidden lanes must stay exactly zero.
    Bp = _round_up(BATCH, SUBLANE)
    Sp = _round_up(SRC_LEN, TCHUNK)
    src_p = jnp.pad(source, ((0, Sp - SRC_LEN), (0, Bp - BATCH)))
    len_p = jnp.pad(source_length, ((0, Bp - BATCH),))
    h_chk, c_chk = encoder_forward(params, src_p, len_p, N_LAYER)
    assert float(jnp.max(jnp.abs(h_chk[..., HIDDEN_DIM:]))) < 1e-6
    assert float(jnp.max(jnp.abs(c_chk[..., HIDDEN_DIM:]))) < 1e-6

    print("KERNEL_OK")
</pallas_src>

<mosaic_0001>
module attributes {stable_mosaic.version = 11 : i64} {
  func.func @matmul_bias_kernel(%arg0: i32, %arg1: i32, %arg2: memref<64x16xbf16, #tpu.memory_space<vmem>>, %arg3: memref<16x512xbf16, #tpu.memory_space<vmem>>, %arg4: memref<1x512xf32, #tpu.memory_space<vmem>>, %arg5: memref<64x512xf32, #tpu.memory_space<vmem>>) attributes {dimension_semantics = [#tpu.dimension_semantics<parallel>, #tpu.dimension_semantics<parallel>], iteration_bounds = array<i64: 1, 1>, scalar_prefetch = 0 : i64, scratch_operands = 0 : i64, tpu.core_type = #tpu.core_type<tc>, window_params = [{transform_indices = @transform_0, window_bounds = array<i64: 64, 16>}, {transform_indices = @transform_1, window_bounds = array<i64: 16, 512>}, {transform_indices = @transform_2, window_bounds = array<i64: 1, 512>}, {transform_indices = @transform_3, window_bounds = array<i64: 64, 512>}]} {
    %c0 = arith.constant 0 : index
    %c0_0 = arith.constant 0 : index
    %0 = vector.load %arg2[%c0, %c0_0] : memref<64x16xbf16, #tpu.memory_space<vmem>>, vector<64x16xbf16>
    %c0_1 = arith.constant 0 : index
    %c0_2 = arith.constant 0 : index
    %1 = vector.load %arg3[%c0_1, %c0_2] : memref<16x512xbf16, #tpu.memory_space<vmem>>, vector<16x512xbf16>
    %cst = arith.constant dense<0.000000e+00> : vector<64x512xf32>
    %2 = tpu.matmul %0, %1, %cst {dimension_numbers = #tpu.dot_dimension_numbers<[1], [0], [0], [1], [0, 0, 1, 1], [], []>} : vector<64x16xbf16>, vector<16x512xbf16>, vector<64x512xf32> -> vector<64x512xf32>
    %c0_3 = arith.constant 0 : index
    %c0_4 = arith.constant 0 : index
    %3 = vector.load %arg4[%c0_3, %c0_4] : memref<1x512xf32, #tpu.memory_space<vmem>>, vector<1x512xf32>
    %4 = vector.broadcast %3 : vector<1x512xf32> to vector<64x512xf32>
    %5 = arith.addf %2, %4 : vector<64x512xf32>
    %c0_5 = arith.constant 0 : index
    %c0_6 = arith.constant 0 : index
    %6 = vector.load %arg5[%c0_5, %c0_6] : memref<64x512xf32, #tpu.memory_space<vmem>>, vector<64x512xf32>
    tpu.vector_store %arg5[%c0_5, %c0_6], %5 {strides = array<i32>} : memref<64x512xf32, #tpu.memory_space<vmem>>, vector<64x512xf32>,
    return
  }
  func.func @transform_0(%arg0: i32, %arg1: i32) -> (i32, i32) {
    %c0_i32 = arith.constant 0 : i32
    %c0_i32_0 = arith.constant 0 : i32
    return %arg0, %c0_i32 : i32, i32
  }
  func.func @transform_1(%arg0: i32, %arg1: i32) -> (i32, i32) {
    %c0_i32 = arith.constant 0 : i32
    %c0_i32_0 = arith.constant 0 : i32
    return %c0_i32, %arg1 : i32, i32
  }
  func.func @transform_2(%arg0: i32, %arg1: i32) -> (i32, i32) {
    %c0_i32 = arith.constant 0 : i32
    %c0_i32_0 = arith.constant 0 : i32
    return %c0_i32, %arg1 : i32, i32
  }
  func.func @transform_3(%arg0: i32, %arg1: i32) -> (i32, i32) {
    %c0_i32 = arith.constant 0 : i32
    return %arg0, %arg1 : i32, i32
  }
}

module attributes {stable_mosaic.version = 11 : i64} {
  func.func @matmul_bias_kernel(%arg0: i32, %arg1: i32, %arg2: memref<64x128xbf16, #tpu.memory_space<vmem>>, %arg3: memref<128x512xbf16, #tpu.memory_space<vmem>>, %arg4: memref<1x512xf32, #tpu.memory_space<vmem>>, %arg5: memref<64x512xf32, #tpu.memory_space<vmem>>) attributes {dimension_semantics = [#tpu.dimension_semantics<parallel>, #tpu.dimension_semantics<parallel>], iteration_bounds = array<i64: 1, 1>, scalar_prefetch = 0 : i64, scratch_operands = 0 : i64, tpu.core_type = #tpu.core_type<tc>, window_params = [{transform_indices = @transform_0, window_bounds = array<i64: 64, 128>}, {transform_indices = @transform_1, window_bounds = array<i64: 128, 512>}, {transform_indices = @transform_2, window_bounds = array<i64: 1, 512>}, {transform_indices = @transform_3, window_bounds = array<i64: 64, 512>}]} {
    %c0 = arith.constant 0 : index
    %c0_0 = arith.constant 0 : index
    %0 = vector.load %arg2[%c0, %c0_0] : memref<64x128xbf16, #tpu.memory_space<vmem>>, vector<64x128xbf16>
    %c0_1 = arith.constant 0 : index
    %c0_2 = arith.constant 0 : index
    %1 = vector.load %arg3[%c0_1, %c0_2] : memref<128x512xbf16, #tpu.memory_space<vmem>>, vector<128x512xbf16>
    %cst = arith.constant dense<0.000000e+00> : vector<64x512xf32>
    %2 = tpu.matmul %0, %1, %cst {dimension_numbers = #tpu.dot_dimension_numbers<[1], [0], [0], [1], [0, 0, 1, 1], [], []>} : vector<64x128xbf16>, vector<128x512xbf16>, vector<64x512xf32> -> vector<64x512xf32>
    %c0_3 = arith.constant 0 : index
    %c0_4 = arith.constant 0 : index
    %3 = vector.load %arg4[%c0_3, %c0_4] : memref<1x512xf32, #tpu.memory_space<vmem>>, vector<1x512xf32>
    %4 = vector.broadcast %3 : vector<1x512xf32> to vector<64x512xf32>
    %5 = arith.addf %2, %4 : vector<64x512xf32>
    %c0_5 = arith.constant 0 : index
    %c0_6 = arith.constant 0 : index
    %6 = vector.load %arg5[%c0_5, %c0_6] : memref<64x512xf32, #tpu.memory_space<vmem>>, vector<64x512xf32>
    tpu.vector_store %arg5[%c0_5, %c0_6], %5 {strides = array<i32>} : memref<64x512xf32, #tpu.memory_space<vmem>>, vector<64x512xf32>,
    return
  }
  func.func @transform_0(%arg0: i32, %arg1: i32) -> (i32, i32) {
    %c0_i32 = arith.constant 0 : i32
    %c0_i32_0 = arith.constant 0 : i32
    return %arg0, %c0_i32 : i32, i32
  }
  func.func @transform_1(%arg0: i32, %arg1: i32) -> (i32, i32) {
    %c0_i32 = arith.constant 0 : i32
    %c0_i32_0 = arith.constant 0 : i32
    return %c0_i32, %arg1 : i32, i32
  }
  func.func @transform_2(%arg0: i32, %arg1: i32) -> (i32, i32) {
    %c0_i32 = arith.constant 0 : i32
    %c0_i32_0 = arith.constant 0 : i32
    return %c0_i32, %arg1 : i32, i32
  }
  func.func @transform_3(%arg0: i32, %arg1: i32) -> (i32, i32) {
    %c0_i32 = arith.constant 0 : i32
    return %arg0, %arg1 : i32, i32
  }
}

module attributes {stable_mosaic.version = 11 : i64} {
  func.func @enc_lstm_layer_kernel(%arg0: i32, %arg1: memref<8x8x512xf32, #tpu.memory_space<vmem>>, %arg2: memref<128x512xbf16, #tpu.memory_space<vmem>>, %arg3: memref<8x1xi32, #tpu.memory_space<vmem>>, %arg4: memref<8x8x128xbf16, #tpu.memory_space<vmem>>, %arg5: memref<8x128xf32, #tpu.memory_space<vmem>>, %arg6: memref<8x128xf32, #tpu.memory_space<vmem>>, %arg7: memref<8x128xf32, #tpu.memory_space<vmem>>, %arg8: memref<8x128xf32, #tpu.memory_space<vmem>>) attributes {dimension_semantics = [#tpu.dimension_semantics<arbitrary>], iteration_bounds = array<i64: 1>, scalar_prefetch = 0 : i64, scratch_operands = 2 : i64, tpu.core_type = #tpu.core_type<tc>, window_params = [{transform_indices = @transform_0, window_bounds = array<i64: 8, 8, 512>}, {pipeline_mode = #tpu.pipeline_mode<synchronous>, transform_indices = @transform_1, window_bounds = array<i64: 128, 512>}, {pipeline_mode = #tpu.pipeline_mode<synchronous>, transform_indices = @transform_2, window_bounds = array<i64: 8, 1>}, {transform_indices = @transform_3, window_bounds = array<i64: 8, 8, 128>}, {pipeline_mode = #tpu.pipeline_mode<synchronous>, transform_indices = @transform_4, window_bounds = array<i64: 8, 128>}, {pipeline_mode = #tpu.pipeline_mode<synchronous>, transform_indices = @transform_5, window_bounds = array<i64: 8, 128>}]} {
    %c0_i32 = arith.constant 0 : i32
    %0 = arith.cmpi eq, %arg0, %c0_i32 : i32
    %1 = arith.extui %0 : i1 to i32
    %c0_i32_0 = arith.constant 0 : i32
    %2 = arith.cmpi ne, %1, %c0_i32_0 : i32
    scf.if %2 {
      %cst_108 = arith.constant 0.000000e+00 : f32
      %371 = vector.broadcast %cst_108 : f32 to vector<8x128xf32>
      %c0_109 = arith.constant 0 : index
      %c0_110 = arith.constant 0 : index
      %372 = vector.load %arg7[%c0_109, %c0_110] : memref<8x128xf32, #tpu.memory_space<vmem>>, vector<8x128xf32>
      tpu.vector_store %arg7[%c0_109, %c0_110], %371 {strides = array<i32>} : memref<8x128xf32, #tpu.memory_space<vmem>>, vector<8x128xf32>,
      %cst_111 = arith.constant 0.000000e+00 : f32
      %373 = vector.broadcast %cst_111 : f32 to vector<8x128xf32>
      %c0_112 = arith.constant 0 : index
      %c0_113 = arith.constant 0 : index
      %374 = vector.load %arg8[%c0_112, %c0_113] : memref<8x128xf32, #tpu.memory_space<vmem>>, vector<8x128xf32>
      tpu.vector_store %arg8[%c0_112, %c0_113], %373 {strides = array<i32>} : memref<8x128xf32, #tpu.memory_space<vmem>>, vector<8x128xf32>,
    } else {
    }
    %c0 = arith.constant 0 : index
    %c0_1 = arith.constant 0 : index
    %3 = vector.load %arg7[%c0, %c0_1] : memref<8x128xf32, #tpu.memory_space<vmem>>, vector<8x128xf32>
    %c0_2 = arith.constant 0 : index
    %c0_3 = arith.constant 0 : index
    %4 = vector.load %arg8[%c0_2, %c0_3] : memref<8x128xf32, #tpu.memory_space<vmem>>, vector<8x128xf32>
    %c0_4 = arith.constant 0 : index
    %c0_5 = arith.constant 0 : index
    %5 = vector.load %arg3[%c0_4, %c0_5] : memref<8x1xi32, #tpu.memory_space<vmem>>, vector<8x1xi32>
    %c8_i32 = arith.constant 8 : i32
    %6 = arith.muli %arg0, %c8_i32 : i32
    %c0_i32_6 = arith.constant 0 : i32
    %7 = arith.addi %6, %c0_i32_6 : i32
    %c0_7 = arith.constant 0 : index
    %c0_8 = arith.constant 0 : index
    %c0_9 = arith.constant 0 : index
    %8 = vector.load %arg1[%c0_7, %c0_8, %c0_9] : memref<8x8x512xf32, #tpu.memory_space<vmem>>, vector<1x8x512xf32>
    %9 = vector.shape_cast %8 : vector<1x8x512xf32> to vector<8x512xf32>
    %10 = arith.truncf %3 : vector<8x128xf32> to vector<8x128xbf16>
    %c0_10 = arith.constant 0 : index
    %c0_11 = arith.constant 0 : index
    %11 = vector.load %arg2[%c0_10, %c0_11] : memref<128x512xbf16, #tpu.memory_space<vmem>>, vector<128x512xbf16>
    %cst = arith.constant dense<0.000000e+00> : vector<8x512xf32>
    %12 = tpu.matmul %10, %11, %cst {dimension_numbers = #tpu.dot_dimension_numbers<[1], [0], [0], [1], [0, 0, 1, 1], [], []>} : vector<8x128xbf16>, vector<128x512xbf16>, vector<8x512xf32> -> vector<8x512xf32>
    %13 = arith.addf %9, %12 : vector<8x512xf32>
    %14 = vector.extract_strided_slice %13 {offsets = [0, 0], sizes = [8, 128], strides = [1, 1]} : vector<8x512xf32> to vector<8x128xf32>
    %15 = arith.negf %14 : vector<8x128xf32>
    %16 = math.exp %15 : vector<8x128xf32>
    %cst_12 = arith.constant 1.000000e+00 : f32
    %17 = vector.broadcast %cst_12 : f32 to vector<8x128xf32>
    %18 = arith.addf %17, %16 : vector<8x128xf32>
    %19 = arith.divf %17, %18 : vector<8x128xf32>
    %20 = vector.extract_strided_slice %13 {offsets = [0, 128], sizes = [8, 128], strides = [1, 1]} : vector<8x512xf32> to vector<8x128xf32>
    %21 = arith.negf %20 : vector<8x128xf32>
    %22 = math.exp %21 : vector<8x128xf32>
    %cst_13 = arith.constant 1.000000e+00 : f32
    %23 = vector.broadcast %cst_13 : f32 to vector<8x128xf32>
    %24 = arith.addf %23, %22 : vector<8x128xf32>
    %25 = arith.divf %23, %24 : vector<8x128xf32>
    %26 = vector.extract_strided_slice %13 {offsets = [0, 256], sizes = [8, 128], strides = [1, 1]} : vector<8x512xf32> to vector<8x128xf32>
    %27 = math.tanh %26 : vector<8x128xf32>
    %28 = vector.extract_strided_slice %13 {offsets = [0, 384], sizes = [8, 128], strides = [1, 1]} : vector<8x512xf32> to vector<8x128xf32>
    %29 = arith.negf %28 : vector<8x128xf32>
    %30 = math.exp %29 : vector<8x128xf32>
    %cst_14 = arith.constant 1.000000e+00 : f32
    %31 = vector.broadcast %cst_14 : f32 to vector<8x128xf32>
    %32 = arith.addf %31, %30 : vector<8x128xf32>
    %33 = arith.divf %31, %32 : vector<8x128xf32>
    %34 = arith.mulf %25, %4 : vector<8x128xf32>
    %35 = arith.mulf %19, %27 : vector<8x128xf32>
    %36 = arith.addf %34, %35 : vector<8x128xf32>
    %37 = math.tanh %36 : vector<8x128xf32>
    %38 = arith.mulf %33, %37 : vector<8x128xf32>
    %39 = vector.broadcast %7 : i32 to vector<8x1xi32>
    %40 = arith.cmpi sgt, %5, %39 : vector<8x1xi32>
    %41 = vector.shape_cast %40 : vector<8x1xi1> to vector<8x1xi1>
    %42 = vector.broadcast %41 : vector<8x1xi1> to vector<8x128xi1>
    %43 = arith.select %42, %38, %3 : vector<8x128xi1>, vector<8x128xf32>
    %44 = vector.shape_cast %40 : vector<8x1xi1> to vector<8x1xi1>
    %45 = vector.broadcast %44 : vector<8x1xi1> to vector<8x128xi1>
    %46 = arith.select %45, %36, %4 : vector<8x128xi1>, vector<8x128xf32>
    %47 = arith.truncf %43 : vector<8x128xf32> to vector<8x128xbf16>
    %c0_15 = arith.constant 0 : index
    %c0_16 = arith.constant 0 : index
    %c0_17 = arith.constant 0 : index
    %48 = vector.load %arg4[%c0_15, %c0_16, %c0_17] : memref<8x8x128xbf16, #tpu.memory_space<vmem>>, vector<1x8x128xbf16>
    %49 = vector.shape_cast %48 : vector<1x8x128xbf16> to vector<8x128xbf16>
    %50 = vector.shape_cast %47 : vector<8x128xbf16> to vector<1x8x128xbf16>
    tpu.vector_store %arg4[%c0_15, %c0_16, %c0_17], %50 {strides = array<i32>} : memref<8x8x128xbf16, #tpu.memory_space<vmem>>, vector<1x8x128xbf16>,
    %c8_i32_18 = arith.constant 8 : i32
    %51 = arith.muli %arg0, %c8_i32_18 : i32
    %c1_i32 = arith.constant 1 : i32
    %52 = arith.addi %51, %c1_i32 : i32
    %c1 = arith.constant 1 : index
    %c0_19 = arith.constant 0 : index
    %c0_20 = arith.constant 0 : index
    %53 = vector.load %arg1[%c1, %c0_19, %c0_20] : memref<8x8x512xf32, #tpu.memory_space<vmem>>, vector<1x8x512xf32>
    %54 = vector.shape_cast %53 : vector<1x8x512xf32> to vector<8x512xf32>
    %55 = arith.truncf %43 : vector<8x128xf32> to vector<8x128xbf16>
    %c0_21 = arith.constant 0 : index
    %c0_22 = arith.constant 0 : index
    %56 = vector.load %arg2[%c0_21, %c0_22] : memref<128x512xbf16, #tpu.memory_space<vmem>>, vector<128x512xbf16>
    %cst_23 = arith.constant dense<0.000000e+00> : vector<8x512xf32>
    %57 = tpu.matmul %55, %56, %cst_23 {dimension_numbers = #tpu.dot_dimension_numbers<[1], [0], [0], [1], [0, 0, 1, 1], [], []>} : vector<8x128xbf16>, vector<128x512xbf16>, vector<8x512xf32> -> vector<8x512xf32>
    %58 = arith.addf %54, %57 : vector<8x512xf32>
    %59 = vector.extract_strided_slice %58 {offsets = [0, 0], sizes = [8, 128], strides = [1, 1]} : vector<8x512xf32> to vector<8x128xf32>
    %60 = arith.negf %59 : vector<8x128xf32>
    %61 = math.exp %60 : vector<8x128xf32>
    %cst_24 = arith.constant 1.000000e+00 : f32
    %62 = vector.broadcast %cst_24 : f32 to vector<8x128xf32>
    %63 = arith.addf %62, %61 : vector<8x128xf32>
    %64 = arith.divf %62, %63 : vector<8x128xf32>
    %65 = vector.extract_strided_slice %58 {offsets = [0, 128], sizes = [8, 128], strides = [1, 1]} : vector<8x512xf32> to vector<8x128xf32>
    %66 = arith.negf %65 : vector<8x128xf32>
    %67 = math.exp %66 : vector<8x128xf32>
    %cst_25 = arith.constant 1.000000e+00 : f32
    %68 = vector.broadcast %cst_25 : f32 to vector<8x128xf32>
    %69 = arith.addf %68, %67 : vector<8x128xf32>
    %70 = arith.divf %68, %69 : vector<8x128xf32>
    %71 = vector.extract_strided_slice %58 {offsets = [0, 256], sizes = [8, 128], strides = [1, 1]} : vector<8x512xf32> to vector<8x128xf32>
    %72 = math.tanh %71 : vector<8x128xf32>
    %73 = vector.extract_strided_slice %58 {offsets = [0, 384], sizes = [8, 128], strides = [1, 1]} : vector<8x512xf32> to vector<8x128xf32>
    %74 = arith.negf %73 : vector<8x128xf32>
    %75 = math.exp %74 : vector<8x128xf32>
    %cst_26 = arith.constant 1.000000e+00 : f32
    %76 = vector.broadcast %cst_26 : f32 to vector<8x128xf32>
    %77 = arith.addf %76, %75 : vector<8x128xf32>
    %78 = arith.divf %76, %77 : vector<8x128xf32>
    %79 = arith.mulf %70, %46 : vector<8x128xf32>
    %80 = arith.mulf %64, %72 : vector<8x128xf32>
    %81 = arith.addf %79, %80 : vector<8x128xf32>
    %82 = math.tanh %81 : vector<8x128xf32>
    %83 = arith.mulf %78, %82 : vector<8x128xf32>
    %84 = vector.broadcast %52 : i32 to vector<8x1xi32>
    %85 = arith.cmpi sgt, %5, %84 : vector<8x1xi32>
    %86 = vector.shape_cast %85 : vector<8x1xi1> to vector<8x1xi1>
    %87 = vector.broadcast %86 : vector<8x1xi1> to vector<8x128xi1>
    %88 = arith.select %87, %83, %43 : vector<8x128xi1>, vector<8x128xf32>
    %89 = vector.shape_cast %85 : vector<8x1xi1> to vector<8x1xi1>
    %90 = vector.broadcast %89 : vector<8x1xi1> to vector<8x128xi1>
    %91 = arith.select %90, %81, %46 : vector<8x128xi1>, vector<8x128xf32>
    %92 = arith.truncf %88 : vector<8x128xf32> to vector<8x128xbf16>
    %c1_27 = arith.constant 1 : index
    %c0_28 = arith.constant 0 : index
    %c0_29 = arith.constant 0 : index
    %93 = vector.load %arg4[%c1_27, %c0_28, %c0_29] : memref<8x8x128xbf16, #tpu.memory_space<vmem>>, vector<1x8x128xbf16>
    %94 = vector.shape_cast %93 : vector<1x8x128xbf16> to vector<8x128xbf16>
    %95 = vector.shape_cast %92 : vector<8x128xbf16> to vector<1x8x128xbf16>
    tpu.vector_store %arg4[%c1_27, %c0_28, %c0_29], %95 {strides = array<i32>} : memref<8x8x128xbf16, #tpu.memory_space<vmem>>, vector<1x8x128xbf16>,
    %c8_i32_30 = arith.constant 8 : i32
    %96 = arith.muli %arg0, %c8_i32_30 : i32
    %c2_i32 = arith.constant 2 : i32
    %97 = arith.addi %96, %c2_i32 : i32
    %c2 = arith.constant 2 : index
    %c0_31 = arith.constant 0 : index
    %c0_32 = arith.constant 0 : index
    %98 = vector.load %arg1[%c2, %c0_31, %c0_32] : memref<8x8x512xf32, #tpu.memory_space<vmem>>, vector<1x8x512xf32>
    %99 = vector.shape_cast %98 : vector<1x8x512xf32> to vector<8x512xf32>
    %100 = arith.truncf %88 : vector<8x128xf32> to vector<8x128xbf16>
    %c0_33 = arith.constant 0 : index
    %c0_34 = arith.constant 0 : index
    %101 = vector.load %arg2[%c0_33, %c0_34] : memref<128x512xbf16, #tpu.memory_space<vmem>>, vector<128x512xbf16>
    %cst_35 = arith.constant dense<0.000000e+00> : vector<8x512xf32>
    %102 = tpu.matmul %100, %101, %cst_35 {dimension_numbers = #tpu.dot_dimension_numbers<[1], [0], [0], [1], [0, 0, 1, 1], [], []>} : vector<8x128xbf16>, vector<128x512xbf16>, vector<8x512xf32> -> vector<8x512xf32>
    %103 = arith.addf %99, %102 : vector<8x512xf32>
    %104 = vector.extract_strided_slice %103 {offsets = [0, 0], sizes = [8, 128], strides = [1, 1]} : vector<8x512xf32> to vector<8x128xf32>
    %105 = arith.negf %104 : vector<8x128xf32>
    %106 = math.exp %105 : vector<8x128xf32>
    %cst_36 = arith.constant 1.000000e+00 : f32
    %107 = vector.broadcast %cst_36 : f32 to vector<8x128xf32>
    %108 = arith.addf %107, %106 : vector<8x128xf32>
    %109 = arith.divf %107, %108 : vector<8x128xf32>
    %110 = vector.extract_strided_slice %103 {offsets = [0, 128], sizes = [8, 128], strides = [1, 1]} : vector<8x512xf32> to vector<8x128xf32>
    %111 = arith.negf %110 : vector<8x128xf32>
    %112 = math.exp %111 : vector<8x128xf32>
    %cst_37 = arith.constant 1.000000e+00 : f32
    %113 = vector.broadcast %cst_37 : f32 to vector<8x128xf32>
    %114 = arith.addf %113, %112 : vector<8x128xf32>
    %115 = arith.divf %113, %114 : vector<8x128xf32>
    %116 = vector.extract_strided_slice %103 {offsets = [0, 256], sizes = [8, 128], strides = [1, 1]} : vector<8x512xf32> to vector<8x128xf32>
    %117 = math.tanh %116 : vector<8x128xf32>
    %118 = vector.extract_strided_slice %103 {offsets = [0, 384], sizes = [8, 128], strides = [1, 1]} : vector<8x512xf32> to vector<8x128xf32>
    %119 = arith.negf %118 : vector<8x128xf32>
    %120 = math.exp %119 : vector<8x128xf32>
    %cst_38 = arith.constant 1.000000e+00 : f32
    %121 = vector.broadcast %cst_38 : f32 to vector<8x128xf32>
    %122 = arith.addf %121, %120 : vector<8x128xf32>
    %123 = arith.divf %121, %122 : vector<8x128xf32>
    %124 = arith.mulf %115, %91 : vector<8x128xf32>
    %125 = arith.mulf %109, %117 : vector<8x128xf32>
    %126 = arith.addf %124, %125 : vector<8x128xf32>
    %127 = math.tanh %126 : vector<8x128xf32>
    %128 = arith.mulf %123, %127 : vector<8x128xf32>
    %129 = vector.broadcast %97 : i32 to vector<8x1xi32>
    %130 = arith.cmpi sgt, %5, %129 : vector<8x1xi32>
    %131 = vector.shape_cast %130 : vector<8x1xi1> to vector<8x1xi1>
    %132 = vector.broadcast %131 : vector<8x1xi1> to vector<8x128xi1>
    %133 = arith.select %132, %128, %88 : vector<8x128xi1>, vector<8x128xf32>
    %134 = vector.shape_cast %130 : vector<8x1xi1> to vector<8x1xi1>
    %135 = vector.broadcast %134 : vector<8x1xi1> to vector<8x128xi1>
    %136 = arith.select %135, %126, %91 : vector<8x128xi1>, vector<8x128xf32>
    %137 = arith.truncf %133 : vector<8x128xf32> to vector<8x128xbf16>
    %c2_39 = arith.constant 2 : index
    %c0_40 = arith.constant 0 : index
    %c0_41 = arith.constant 0 : index
    %138 = vector.load %arg4[%c2_39, %c0_40, %c0_41] : memref<8x8x128xbf16, #tpu.memory_space<vmem>>, vector<1x8x128xbf16>
    %139 = vector.shape_cast %138 : vector<1x8x128xbf16> to vector<8x128xbf16>
    %140 = vector.shape_cast %137 : vector<8x128xbf16> to vector<1x8x128xbf16>
    tpu.vector_store %arg4[%c2_39, %c0_40, %c0_41], %140 {strides = array<i32>} : memref<8x8x128xbf16, #tpu.memory_space<vmem>>, vector<1x8x128xbf16>,
    %c8_i32_42 = arith.constant 8 : i32
    %141 = arith.muli %arg0, %c8_i32_42 : i32
    %c3_i32 = arith.constant 3 : i32
    %142 = arith.addi %141, %c3_i32 : i32
    %c3 = arith.constant 3 : index
    %c0_43 = arith.constant 0 : index
    %c0_44 = arith.constant 0 : index
    %143 = vector.load %arg1[%c3, %c0_43, %c0_44] : memref<8x8x512xf32, #tpu.memory_space<vmem>>, vector<1x8x512xf32>
    %144 = vector.shape_cast %143 : vector<1x8x512xf32> to vector<8x512xf32>
    %145 = arith.truncf %133 : vector<8x128xf32> to vector<8x128xbf16>
    %c0_45 = arith.constant 0 : index
    %c0_46 = arith.constant 0 : index
    %146 = vector.load %arg2[%c0_45, %c0_46] : memref<128x512xbf16, #tpu.memory_space<vmem>>, vector<128x512xbf16>
    %cst_47 = arith.constant dense<0.000000e+00> : vector<8x512xf32>
    %147 = tpu.matmul %145, %146, %cst_47 {dimension_numbers = #tpu.dot_dimension_numbers<[1], [0], [0], [1], [0, 0, 1, 1], [], []>} : vector<8x128xbf16>, vector<128x512xbf16>, vector<8x512xf32> -> vector<8x512xf32>
    %148 = arith.addf %144, %147 : vector<8x512xf32>
    %149 = vector.extract_strided_slice %148 {offsets = [0, 0], sizes = [8, 128], strides = [1, 1]} : vector<8x512xf32> to vector<8x128xf32>
    %150 = arith.negf %149 : vector<8x128xf32>
    %151 = math.exp %150 : vector<8x128xf32>
    %cst_48 = arith.constant 1.000000e+00 : f32
    %152 = vector.broadcast %cst_48 : f32 to vector<8x128xf32>
    %153 = arith.addf %152, %151 : vector<8x128xf32>
    %154 = arith.divf %152, %153 : vector<8x128xf32>
    %155 = vector.extract_strided_slice %148 {offsets = [0, 128], sizes = [8, 128], strides = [1, 1]} : vector<8x512xf32> to vector<8x128xf32>
    %156 = arith.negf %155 : vector<8x128xf32>
    %157 = math.exp %156 : vector<8x128xf32>
    %cst_49 = arith.constant 1.000000e+00 : f32
    %158 = vector.broadcast %cst_49 : f32 to vector<8x128xf32>
    %159 = arith.addf %158, %157 : vector<8x128xf32>
    %160 = arith.divf %158, %159 : vector<8x128xf32>
    %161 = vector.extract_strided_slice %148 {offsets = [0, 256], sizes = [8, 128], strides = [1, 1]} : vector<8x512xf32> to vector<8x128xf32>
    %162 = math.tanh %161 : vector<8x128xf32>
    %163 = vector.extract_strided_slice %148 {offsets = [0, 384], sizes = [8, 128], strides = [1, 1]} : vector<8x512xf32> to vector<8x128xf32>
    %164 = arith.negf %163 : vector<8x128xf32>
    %165 = math.exp %164 : vector<8x128xf32>
    %cst_50 = arith.constant 1.000000e+00 : f32
    %166 = vector.broadcast %cst_50 : f32 to vector<8x128xf32>
    %167 = arith.addf %166, %165 : vector<8x128xf32>
    %168 = arith.divf %166, %167 : vector<8x128xf32>
    %169 = arith.mulf %160, %136 : vector<8x128xf32>
    %170 = arith.mulf %154, %162 : vector<8x128xf32>
    %171 = arith.addf %169, %170 : vector<8x128xf32>
    %172 = math.tanh %171 : vector<8x128xf32>
    %173 = arith.mulf %168, %172 : vector<8x128xf32>
    %174 = vector.broadcast %142 : i32 to vector<8x1xi32>
    %175 = arith.cmpi sgt, %5, %174 : vector<8x1xi32>
    %176 = vector.shape_cast %175 : vector<8x1xi1> to vector<8x1xi1>
    %177 = vector.broadcast %176 : vector<8x1xi1> to vector<8x128xi1>
    %178 = arith.select %177, %173, %133 : vector<8x128xi1>, vector<8x128xf32>
    %179 = vector.shape_cast %175 : vector<8x1xi1> to vector<8x1xi1>
    %180 = vector.broadcast %179 : vector<8x1xi1> to vector<8x128xi1>
    %181 = arith.select %180, %171, %136 : vector<8x128xi1>, vector<8x128xf32>
    %182 = arith.truncf %178 : vector<8x128xf32> to vector<8x128xbf16>
    %c3_51 = arith.constant 3 : index
    %c0_52 = arith.constant 0 : index
    %c0_53 = arith.constant 0 : index
    %183 = vector.load %arg4[%c3_51, %c0_52, %c0_53] : memref<8x8x128xbf16, #tpu.memory_space<vmem>>, vector<1x8x128xbf16>
    %184 = vector.shape_cast %183 : vector<1x8x128xbf16> to vector<8x128xbf16>
    %185 = vector.shape_cast %182 : vector<8x128xbf16> to vector<1x8x128xbf16>
    tpu.vector_store %arg4[%c3_51, %c0_52, %c0_53], %185 {strides = array<i32>} : memref<8x8x128xbf16, #tpu.memory_space<vmem>>, vector<1x8x128xbf16>,
    %c8_i32_54 = arith.constant 8 : i32
    %186 = arith.muli %arg0, %c8_i32_54 : i32
    %c4_i32 = arith.constant 4 : i32
    %187 = arith.addi %186, %c4_i32 : i32
    %c4 = arith.constant 4 : index
    %c0_55 = arith.constant 0 : index
    %c0_56 = arith.constant 0 : index
    %188 = vector.load %arg1[%c4, %c0_55, %c0_56] : memref<8x8x512xf32, #tpu.memory_space<vmem>>, vector<1x8x512xf32>
    %189 = vector.shape_cast %188 : vector<1x8x512xf32> to vector<8x512xf32>
    %190 = arith.truncf %178 : vector<8x128xf32> to vector<8x128xbf16>
    %c0_57 = arith.constant 0 : index
    %c0_58 = arith.constant 0 : index
    %191 = vector.load %arg2[%c0_57, %c0_58] : memref<128x512xbf16, #tpu.memory_space<vmem>>, vector<128x512xbf16>
    %cst_59 = arith.constant dense<0.000000e+00> : vector<8x512xf32>
    %192 = tpu.matmul %190, %191, %cst_59 {dimension_numbers = #tpu.dot_dimension_numbers<[1], [0], [0], [1], [0, 0, 1, 1], [], []>} : vector<8x128xbf16>, vector<128x512xbf16>, vector<8x512xf32> -> vector<8x512xf32>
    %193 = arith.addf %189, %192 : vector<8x512xf32>
    %194 = vector.extract_strided_slice %193 {offsets = [0, 0], sizes = [8, 128], strides = [1, 1]} : vector<8x512xf32> to vector<8x128xf32>
    %195 = arith.negf %194 : vector<8x128xf32>
    %196 = math.exp %195 : vector<8x128xf32>
    %cst_60 = arith.constant 1.000000e+00 : f32
    %197 = vector.broadcast %cst_60 : f32 to vector<8x128xf32>
    %198 = arith.addf %197, %196 : vector<8x128xf32>
    %199 = arith.divf %197, %198 : vector<8x128xf32>
    %200 = vector.extract_strided_slice %193 {offsets = [0, 128], sizes = [8, 128], strides = [1, 1]} : vector<8x512xf32> to vector<8x128xf32>
    %201 = arith.negf %200 : vector<8x128xf32>
    %202 = math.exp %201 : vector<8x128xf32>
    %cst_61 = arith.constant 1.000000e+00 : f32
    %203 = vector.broadcast %cst_61 : f32 to vector<8x128xf32>
    %204 = arith.addf %203, %202 : vector<8x128xf32>
    %205 = arith.divf %203, %204 : vector<8x128xf32>
    %206 = vector.extract_strided_slice %193 {offsets = [0, 256], sizes = [8, 128], strides = [1, 1]} : vector<8x512xf32> to vector<8x128xf32>
    %207 = math.tanh %206 : vector<8x128xf32>
    %208 = vector.extract_strided_slice %193 {offsets = [0, 384], sizes = [8, 128], strides = [1, 1]} : vector<8x512xf32> to vector<8x128xf32>
    %209 = arith.negf %208 : vector<8x128xf32>
    %210 = math.exp %209 : vector<8x128xf32>
    %cst_62 = arith.constant 1.000000e+00 : f32
    %211 = vector.broadcast %cst_62 : f32 to vector<8x128xf32>
    %212 = arith.addf %211, %210 : vector<8x128xf32>
    %213 = arith.divf %211, %212 : vector<8x128xf32>
    %214 = arith.mulf %205, %181 : vector<8x128xf32>
    %215 = arith.mulf %199, %207 : vector<8x128xf32>
    %216 = arith.addf %214, %215 : vector<8x128xf32>
    %217 = math.tanh %216 : vector<8x128xf32>
    %218 = arith.mulf %213, %217 : vector<8x128xf32>
    %219 = vector.broadcast %187 : i32 to vector<8x1xi32>
    %220 = arith.cmpi sgt, %5, %219 : vector<8x1xi32>
    %221 = vector.shape_cast %220 : vector<8x1xi1> to vector<8x1xi1>
    %222 = vector.broadcast %221 : vector<8x1xi1> to vector<8x128xi1>
    %223 = arith.select %222, %218, %178 : vector<8x128xi1>, vector<8x128xf32>
    %224 = vector.shape_cast %220 : vector<8x1xi1> to vector<8x1xi1>
    %225 = vector.broadcast %224 : vector<8x1xi1> to vector<8x128xi1>
    %226 = arith.select %225, %216, %181 : vector<8x128xi1>, vector<8x128xf32>
    %227 = arith.truncf %223 : vector<8x128xf32> to vector<8x128xbf16>
    %c4_63 = arith.constant 4 : index
    %c0_64 = arith.constant 0 : index
    %c0_65 = arith.constant 0 : index
    %228 = vector.load %arg4[%c4_63, %c0_64, %c0_65] : memref<8x8x128xbf16, #tpu.memory_space<vmem>>, vector<1x8x128xbf16>
    %229 = vector.shape_cast %228 : vector<1x8x128xbf16> to vector<8x128xbf16>
    %230 = vector.shape_cast %227 : vector<8x128xbf16> to vector<1x8x128xbf16>
    tpu.vector_store %arg4[%c4_63, %c0_64, %c0_65], %230 {strides = array<i32>} : memref<8x8x128xbf16, #tpu.memory_space<vmem>>, vector<1x8x128xbf16>,
    %c8_i32_66 = arith.constant 8 : i32
    %231 = arith.muli %arg0, %c8_i32_66 : i32
    %c5_i32 = arith.constant 5 : i32
    %232 = arith.addi %231, %c5_i32 : i32
    %c5 = arith.constant 5 : index
    %c0_67 = arith.constant 0 : index
    %c0_68 = arith.constant 0 : index
    %233 = vector.load %arg1[%c5, %c0_67, %c0_68] : memref<8x8x512xf32, #tpu.memory_space<vmem>>, vector<1x8x512xf32>
    %234 = vector.shape_cast %233 : vector<1x8x512xf32> to vector<8x512xf32>
    %235 = arith.truncf %223 : vector<8x128xf32> to vector<8x128xbf16>
    %c0_69 = arith.constant 0 : index
    %c0_70 = arith.constant 0 : index
    %236 = vector.load %arg2[%c0_69, %c0_70] : memref<128x512xbf16, #tpu.memory_space<vmem>>, vector<128x512xbf16>
    %cst_71 = arith.constant dense<0.000000e+00> : vector<8x512xf32>
    %237 = tpu.matmul %235, %236, %cst_71 {dimension_numbers = #tpu.dot_dimension_numbers<[1], [0], [0], [1], [0, 0, 1, 1], [], []>} : vector<8x128xbf16>, vector<128x512xbf16>, vector<8x512xf32> -> vector<8x512xf32>
    %238 = arith.addf %234, %237 : vector<8x512xf32>
    %239 = vector.extract_strided_slice %238 {offsets = [0, 0], sizes = [8, 128], strides = [1, 1]} : vector<8x512xf32> to vector<8x128xf32>
    %240 = arith.negf %239 : vector<8x128xf32>
    %241 = math.exp %240 : vector<8x128xf32>
    %cst_72 = arith.constant 1.000000e+00 : f32
    %242 = vector.broadcast %cst_72 : f32 to vector<8x128xf32>
    %243 = arith.addf %242, %241 : vector<8x128xf32>
    %244 = arith.divf %242, %243 : vector<8x128xf32>
    %245 = vector.extract_strided_slice %238 {offsets = [0, 128], sizes = [8, 128], strides = [1, 1]} : vector<8x512xf32> to vector<8x128xf32>
    %246 = arith.negf %245 : vector<8x128xf32>
    %247 = math.exp %246 : vector<8x128xf32>
    %cst_73 = arith.constant 1.000000e+00 : f32
    %248 = vector.broadcast %cst_73 : f32 to vector<8x128xf32>
    %249 = arith.addf %248, %247 : vector<8x128xf32>
    %250 = arith.divf %248, %249 : vector<8x128xf32>
    %251 = vector.extract_strided_slice %238 {offsets = [0, 256], sizes = [8, 128], strides = [1, 1]} : vector<8x512xf32> to vector<8x128xf32>
    %252 = math.tanh %251 : vector<8x128xf32>
    %253 = vector.extract_strided_slice %238 {offsets = [0, 384], sizes = [8, 128], strides = [1, 1]} : vector<8x512xf32> to vector<8x128xf32>
    %254 = arith.negf %253 : vector<8x128xf32>
    %255 = math.exp %254 : vector<8x128xf32>
    %cst_74 = arith.constant 1.000000e+00 : f32
    %256 = vector.broadcast %cst_74 : f32 to vector<8x128xf32>
    %257 = arith.addf %256, %255 : vector<8x128xf32>
    %258 = arith.divf %256, %257 : vector<8x128xf32>
    %259 = arith.mulf %250, %226 : vector<8x128xf32>
    %260 = arith.mulf %244, %252 : vector<8x128xf32>
    %261 = arith.addf %259, %260 : vector<8x128xf32>
    %262 = math.tanh %261 : vector<8x128xf32>
    %263 = arith.mulf %258, %262 : vector<8x128xf32>
    %264 = vector.broadcast %232 : i32 to vector<8x1xi32>
    %265 = arith.cmpi sgt, %5, %264 : vector<8x1xi32>
    %266 = vector.shape_cast %265 : vector<8x1xi1> to vector<8x1xi1>
    %267 = vector.broadcast %266 : vector<8x1xi1> to vector<8x128xi1>
    %268 = arith.select %267, %263, %223 : vector<8x128xi1>, vector<8x128xf32>
    %269 = vector.shape_cast %265 : vector<8x1xi1> to vector<8x1xi1>
    %270 = vector.broadcast %269 : vector<8x1xi1> to vector<8x128xi1>
    %271 = arith.select %270, %261, %226 : vector<8x128xi1>, vector<8x128xf32>
    %272 = arith.truncf %268 : vector<8x128xf32> to vector<8x128xbf16>
    %c5_75 = arith.constant 5 : index
    %c0_76 = arith.constant 0 : index
    %c0_77 = arith.constant 0 : index
    %273 = vector.load %arg4[%c5_75, %c0_76, %c0_77] : memref<8x8x128xbf16, #tpu.memory_space<vmem>>, vector<1x8x128xbf16>
    %274 = vector.shape_cast %273 : vector<1x8x128xbf16> to vector<8x128xbf16>
    %275 = vector.shape_cast %272 : vector<8x128xbf16> to vector<1x8x128xbf16>
    tpu.vector_store %arg4[%c5_75, %c0_76, %c0_77], %275 {strides = array<i32>} : memref<8x8x128xbf16, #tpu.memory_space<vmem>>, vector<1x8x128xbf16>,
    %c8_i32_78 = arith.constant 8 : i32
    %276 = arith.muli %arg0, %c8_i32_78 : i32
    %c6_i32 = arith.constant 6 : i32
    %277 = arith.addi %276, %c6_i32 : i32
    %c6 = arith.constant 6 : index
    %c0_79 = arith.constant 0 : index
    %c0_80 = arith.constant 0 : index
    %278 = vector.load %arg1[%c6, %c0_79, %c0_80] : memref<8x8x512xf32, #tpu.memory_space<vmem>>, vector<1x8x512xf32>
    %279 = vector.shape_cast %278 : vector<1x8x512xf32> to vector<8x512xf32>
    %280 = arith.truncf %268 : vector<8x128xf32> to vector<8x128xbf16>
    %c0_81 = arith.constant 0 : index
    %c0_82 = arith.constant 0 : index
    %281 = vector.load %arg2[%c0_81, %c0_82] : memref<128x512xbf16, #tpu.memory_space<vmem>>, vector<128x512xbf16>
    %cst_83 = arith.constant dense<0.000000e+00> : vector<8x512xf32>
    %282 = tpu.matmul %280, %281, %cst_83 {dimension_numbers = #tpu.dot_dimension_numbers<[1], [0], [0], [1], [0, 0, 1, 1], [], []>} : vector<8x128xbf16>, vector<128x512xbf16>, vector<8x512xf32> -> vector<8x512xf32>
    %283 = arith.addf %279, %282 : vector<8x512xf32>
    %284 = vector.extract_strided_slice %283 {offsets = [0, 0], sizes = [8, 128], strides = [1, 1]} : vector<8x512xf32> to vector<8x128xf32>
    %285 = arith.negf %284 : vector<8x128xf32>
    %286 = math.exp %285 : vector<8x128xf32>
    %cst_84 = arith.constant 1.000000e+00 : f32
    %287 = vector.broadcast %cst_84 : f32 to vector<8x128xf32>
    %288 = arith.addf %287, %286 : vector<8x128xf32>
    %289 = arith.divf %287, %288 : vector<8x128xf32>
    %290 = vector.extract_strided_slice %283 {offsets = [0, 128], sizes = [8, 128], strides = [1, 1]} : vector<8x512xf32> to vector<8x128xf32>
    %291 = arith.negf %290 : vector<8x128xf32>
    %292 = math.exp %291 : vector<8x128xf32>
    %cst_85 = arith.constant 1.000000e+00 : f32
    %293 = vector.broadcast %cst_85 : f32 to vector<8x128xf32>
    %294 = arith.addf %293, %292 : vector<8x128xf32>
    %295 = arith.divf %293, %294 : vector<8x128xf32>
    %296 = vector.extract_strided_slice %283 {offsets = [0, 256], sizes = [8, 128], strides = [1, 1]} : vector<8x512xf32> to vector<8x128xf32>
    %297 = math.tanh %296 : vector<8x128xf32>
    %298 = vector.extract_strided_slice %283 {offsets = [0, 384], sizes = [8, 128], strides = [1, 1]} : vector<8x512xf32> to vector<8x128xf32>
    %299 = arith.negf %298 : vector<8x128xf32>
    %300 = math.exp %299 : vector<8x128xf32>
    %cst_86 = arith.constant 1.000000e+00 : f32
    %301 = vector.broadcast %cst_86 : f32 to vector<8x128xf32>
    %302 = arith.addf %301, %300 : vector<8x128xf32>
    %303 = arith.divf %301, %302 : vector<8x128xf32>
    %304 = arith.mulf %295, %271 : vector<8x128xf32>
    %305 = arith.mulf %289, %297 : vector<8x128xf32>
    %306 = arith.addf %304, %305 : vector<8x128xf32>
    %307 = math.tanh %306 : vector<8x128xf32>
    %308 = arith.mulf %303, %307 : vector<8x128xf32>
    %309 = vector.broadcast %277 : i32 to vector<8x1xi32>
    %310 = arith.cmpi sgt, %5, %309 : vector<8x1xi32>
    %311 = vector.shape_cast %310 : vector<8x1xi1> to vector<8x1xi1>
    %312 = vector.broadcast %311 : vector<8x1xi1> to vector<8x128xi1>
    %313 = arith.select %312, %308, %268 : vector<8x128xi1>, vector<8x128xf32>
    %314 = vector.shape_cast %310 : vector<8x1xi1> to vector<8x1xi1>
    %315 = vector.broadcast %314 : vector<8x1xi1> to vector<8x128xi1>
    %316 = arith.select %315, %306, %271 : vector<8x128xi1>, vector<8x128xf32>
    %317 = arith.truncf %313 : vector<8x128xf32> to vector<8x128xbf16>
    %c6_87 = arith.constant 6 : index
    %c0_88 = arith.constant 0 : index
    %c0_89 = arith.constant 0 : index
    %318 = vector.load %arg4[%c6_87, %c0_88, %c0_89] : memref<8x8x128xbf16, #tpu.memory_space<vmem>>, vector<1x8x128xbf16>
    %319 = vector.shape_cast %318 : vector<1x8x128xbf16> to vector<8x128xbf16>
    %320 = vector.shape_cast %317 : vector<8x128xbf16> to vector<1x8x128xbf16>
    tpu.vector_store %arg4[%c6_87, %c0_88, %c0_89], %320 {strides = array<i32>} : memref<8x8x128xbf16, #tpu.memory_space<vmem>>, vector<1x8x128xbf16>,
    %c8_i32_90 = arith.constant 8 : i32
    %321 = arith.muli %arg0, %c8_i32_90 : i32
    %c7_i32 = arith.constant 7 : i32
    %322 = arith.addi %321, %c7_i32 : i32
    %c7 = arith.constant 7 : index
    %c0_91 = arith.constant 0 : index
    %c0_92 = arith.constant 0 : index
    %323 = vector.load %arg1[%c7, %c0_91, %c0_92] : memref<8x8x512xf32, #tpu.memory_space<vmem>>, vector<1x8x512xf32>
    %324 = vector.shape_cast %323 : vector<1x8x512xf32> to vector<8x512xf32>
    %325 = arith.truncf %313 : vector<8x128xf32> to vector<8x128xbf16>
    %c0_93 = arith.constant 0 : index
    %c0_94 = arith.constant 0 : index
    %326 = vector.load %arg2[%c0_93, %c0_94] : memref<128x512xbf16, #tpu.memory_space<vmem>>, vector<128x512xbf16>
    %cst_95 = arith.constant dense<0.000000e+00> : vector<8x512xf32>
    %327 = tpu.matmul %325, %326, %cst_95 {dimension_numbers = #tpu.dot_dimension_numbers<[1], [0], [0], [1], [0, 0, 1, 1], [], []>} : vector<8x128xbf16>, vector<128x512xbf16>, vector<8x512xf32> -> vector<8x512xf32>
    %328 = arith.addf %324, %327 : vector<8x512xf32>
    %329 = vector.extract_strided_slice %328 {offsets = [0, 0], sizes = [8, 128], strides = [1, 1]} : vector<8x512xf32> to vector<8x128xf32>
    %330 = arith.negf %329 : vector<8x128xf32>
    %331 = math.exp %330 : vector<8x128xf32>
    %cst_96 = arith.constant 1.000000e+00 : f32
    %332 = vector.broadcast %cst_96 : f32 to vector<8x128xf32>
    %333 = arith.addf %332, %331 : vector<8x128xf32>
    %334 = arith.divf %332, %333 : vector<8x128xf32>
    %335 = vector.extract_strided_slice %328 {offsets = [0, 128], sizes = [8, 128], strides = [1, 1]} : vector<8x512xf32> to vector<8x128xf32>
    %336 = arith.negf %335 : vector<8x128xf32>
    %337 = math.exp %336 : vector<8x128xf32>
    %cst_97 = arith.constant 1.000000e+00 : f32
    %338 = vector.broadcast %cst_97 : f32 to vector<8x128xf32>
    %339 = arith.addf %338, %337 : vector<8x128xf32>
    %340 = arith.divf %338, %339 : vector<8x128xf32>
    %341 = vector.extract_strided_slice %328 {offsets = [0, 256], sizes = [8, 128], strides = [1, 1]} : vector<8x512xf32> to vector<8x128xf32>
    %342 = math.tanh %341 : vector<8x128xf32>
    %343 = vector.extract_strided_slice %328 {offsets = [0, 384], sizes = [8, 128], strides = [1, 1]} : vector<8x512xf32> to vector<8x128xf32>
    %344 = arith.negf %343 : vector<8x128xf32>
    %345 = math.exp %344 : vector<8x128xf32>
    %cst_98 = arith.constant 1.000000e+00 : f32
    %346 = vector.broadcast %cst_98 : f32 to vector<8x128xf32>
    %347 = arith.addf %346, %345 : vector<8x128xf32>
    %348 = arith.divf %346, %347 : vector<8x128xf32>
    %349 = arith.mulf %340, %316 : vector<8x128xf32>
    %350 = arith.mulf %334, %342 : vector<8x128xf32>
    %351 = arith.addf %349, %350 : vector<8x128xf32>
    %352 = math.tanh %351 : vector<8x128xf32>
    %353 = arith.mulf %348, %352 : vector<8x128xf32>
    %354 = vector.broadcast %322 : i32 to vector<8x1xi32>
    %355 = arith.cmpi sgt, %5, %354 : vector<8x1xi32>
    %356 = vector.shape_cast %355 : vector<8x1xi1> to vector<8x1xi1>
    %357 = vector.broadcast %356 : vector<8x1xi1> to vector<8x128xi1>
    %358 = arith.select %357, %353, %313 : vector<8x128xi1>, vector<8x128xf32>
    %359 = vector.shape_cast %355 : vector<8x1xi1> to vector<8x1xi1>
    %360 = vector.broadcast %359 : vector<8x1xi1> to vector<8x128xi1>
    %361 = arith.select %360, %351, %316 : vector<8x128xi1>, vector<8x128xf32>
    %362 = arith.truncf %358 : vector<8x128xf32> to vector<8x128xbf16>
    %c7_99 = arith.constant 7 : index
    %c0_100 = arith.constant 0 : index
    %c0_101 = arith.constant 0 : index
    %363 = vector.load %arg4[%c7_99, %c0_100, %c0_101] : memref<8x8x128xbf16, #tpu.memory_space<vmem>>, vector<1x8x128xbf16>
    %364 = vector.shape_cast %363 : vector<1x8x128xbf16> to vector<8x128xbf16>
    %365 = vector.shape_cast %362 : vector<8x128xbf16> to vector<1x8x128xbf16>
    tpu.vector_store %arg4[%c7_99, %c0_100, %c0_101], %365 {strides = array<i32>} : memref<8x8x128xbf16, #tpu.memory_space<vmem>>, vector<1x8x128xbf16>,
    %c0_102 = arith.constant 0 : index
    %c0_103 = arith.constant 0 : index
    %366 = vector.load %arg7[%c0_102, %c0_103] : memref<8x128xf32, #tpu.memory_space<vmem>>, vector<8x128xf32>
    tpu.vector_store %arg7[%c0_102, %c0_103], %358 {strides = array<i32>} : memref<8x128xf32, #tpu.memory_space<vmem>>, vector<8x128xf32>,
    %c0_104 = arith.constant 0 : index
    %c0_105 = arith.constant 0 : index
    %367 = vector.load %arg8[%c0_104, %c0_105] : memref<8x128xf32, #tpu.memory_space<vmem>>, vector<8x128xf32>
    tpu.vector_store %arg8[%c0_104, %c0_105], %361 {strides = array<i32>} : memref<8x128xf32, #tpu.memory_space<vmem>>, vector<8x128xf32>,
    %c0_i32_106 = arith.constant 0 : i32
    %368 = arith.cmpi eq, %arg0, %c0_i32_106 : i32
    %369 = arith.extui %368 : i1 to i32
    %c0_i32_107 = arith.constant 0 : i32
    %370 = arith.cmpi ne, %369, %c0_i32_107 : i32
    scf.if %370 {
      %c0_108 = arith.constant 0 : index
      %c0_109 = arith.constant 0 : index
      %371 = vector.load %arg5[%c0_108, %c0_109] : memref<8x128xf32, #tpu.memory_space<vmem>>, vector<8x128xf32>
      tpu.vector_store %arg5[%c0_108, %c0_109], %358 {strides = array<i32>} : memref<8x128xf32, #tpu.memory_space<vmem>>, vector<8x128xf32>,
      %c0_110 = arith.constant 0 : index
      %c0_111 = arith.constant 0 : index
      %372 = vector.load %arg6[%c0_110, %c0_111] : memref<8x128xf32, #tpu.memory_space<vmem>>, vector<8x128xf32>
      tpu.vector_store %arg6[%c0_110, %c0_111], %361 {strides = array<i32>} : memref<8x128xf32, #tpu.memory_space<vmem>>, vector<8x128xf32>,
    } else {
    }
    return
  }
  func.func @transform_0(%arg0: i32) -> (i32, i32, i32) {
    %c0_i32 = arith.constant 0 : i32
    %c0_i32_0 = arith.constant 0 : i32
    %c0_i32_1 = arith.constant 0 : i32
    return %arg0, %c0_i32, %c0_i32_0 : i32, i32, i32
  }
  func.func @transform_1(%arg0: i32) -> (i32, i32) {
    %c0_i32 = arith.constant 0 : i32
    %c0_i32_0 = arith.constant 0 : i32
    %c0_i32_1 = arith.constant 0 : i32
    return %c0_i32, %c0_i32_0 : i32, i32
  }
  func.func @transform_2(%arg0: i32) -> (i32, i32) {
    %c0_i32 = arith.constant 0 : i32
    %c0_i32_0 = arith.constant 0 : i32
    %c0_i32_1 = arith.constant 0 : i32
    return %c0_i32, %c0_i32_0 : i32, i32
  }
  func.func @transform_3(%arg0: i32) -> (i32, i32, i32) {
    %c0_i32 = arith.constant 0 : i32
    %c0_i32_0 = arith.constant 0 : i32
    %c0_i32_1 = arith.constant 0 : i32
    return %arg0, %c0_i32, %c0_i32_0 : i32, i32, i32
  }
  func.func @transform_4(%arg0: i32) -> (i32, i32) {
    %c0_i32 = arith.constant 0 : i32
    %c0_i32_0 = arith.constant 0 : i32
    %c0_i32_1 = arith.constant 0 : i32
    return %c0_i32, %c0_i32_0 : i32, i32
  }
  func.func @transform_5(%arg0: i32) -> (i32, i32) {
    %c0_i32 = arith.constant 0 : i32
    %c0_i32_0 = arith.constant 0 : i32
    %c0_i32_1 = arith.constant 0 : i32
    return %c0_i32, %c0_i32_0 : i32, i32
  }
}

module attributes {stable_mosaic.version = 11 : i64} {
  func.func @enc_lstm_layer_kernel(%arg0: i32, %arg1: memref<8x8x512xf32, #tpu.memory_space<vmem>>, %arg2: memref<128x512xbf16, #tpu.memory_space<vmem>>, %arg3: memref<8x1xi32, #tpu.memory_space<vmem>>, %arg4: memref<8x8x128xbf16, #tpu.memory_space<vmem>>, %arg5: memref<8x128xf32, #tpu.memory_space<vmem>>, %arg6: memref<8x128xf32, #tpu.memory_space<vmem>>, %arg7: memref<8x128xf32, #tpu.memory_space<vmem>>, %arg8: memref<8x128xf32, #tpu.memory_space<vmem>>) attributes {dimension_semantics = [#tpu.dimension_semantics<arbitrary>], iteration_bounds = array<i64: 1>, scalar_prefetch = 0 : i64, scratch_operands = 2 : i64, tpu.core_type = #tpu.core_type<tc>, window_params = [{transform_indices = @transform_0, window_bounds = array<i64: 8, 8, 512>}, {pipeline_mode = #tpu.pipeline_mode<synchronous>, transform_indices = @transform_1, window_bounds = array<i64: 128, 512>}, {pipeline_mode = #tpu.pipeline_mode<synchronous>, transform_indices = @transform_2, window_bounds = array<i64: 8, 1>}, {transform_indices = @transform_3, window_bounds = array<i64: 8, 8, 128>}, {pipeline_mode = #tpu.pipeline_mode<synchronous>, transform_indices = @transform_4, window_bounds = array<i64: 8, 128>}, {pipeline_mode = #tpu.pipeline_mode<synchronous>, transform_indices = @transform_5, window_bounds = array<i64: 8, 128>}]} {
    %c0_i32 = arith.constant 0 : i32
    %0 = arith.cmpi eq, %arg0, %c0_i32 : i32
    %1 = arith.extui %0 : i1 to i32
    %c0_i32_0 = arith.constant 0 : i32
    %2 = arith.cmpi ne, %1, %c0_i32_0 : i32
    scf.if %2 {
      %cst_108 = arith.constant 0.000000e+00 : f32
      %371 = vector.broadcast %cst_108 : f32 to vector<8x128xf32>
      %c0_109 = arith.constant 0 : index
      %c0_110 = arith.constant 0 : index
      %372 = vector.load %arg7[%c0_109, %c0_110] : memref<8x128xf32, #tpu.memory_space<vmem>>, vector<8x128xf32>
      tpu.vector_store %arg7[%c0_109, %c0_110], %371 {strides = array<i32>} : memref<8x128xf32, #tpu.memory_space<vmem>>, vector<8x128xf32>,
      %cst_111 = arith.constant 0.000000e+00 : f32
      %373 = vector.broadcast %cst_111 : f32 to vector<8x128xf32>
      %c0_112 = arith.constant 0 : index
      %c0_113 = arith.constant 0 : index
      %374 = vector.load %arg8[%c0_112, %c0_113] : memref<8x128xf32, #tpu.memory_space<vmem>>, vector<8x128xf32>
      tpu.vector_store %arg8[%c0_112, %c0_113], %373 {strides = array<i32>} : memref<8x128xf32, #tpu.memory_space<vmem>>, vector<8x128xf32>,
    } else {
    }
    %c0 = arith.constant 0 : index
    %c0_1 = arith.constant 0 : index
    %3 = vector.load %arg7[%c0, %c0_1] : memref<8x128xf32, #tpu.memory_space<vmem>>, vector<8x128xf32>
    %c0_2 = arith.constant 0 : index
    %c0_3 = arith.constant 0 : index
    %4 = vector.load %arg8[%c0_2, %c0_3] : memref<8x128xf32, #tpu.memory_space<vmem>>, vector<8x128xf32>
    %c0_4 = arith.constant 0 : index
    %c0_5 = arith.constant 0 : index
    %5 = vector.load %arg3[%c0_4, %c0_5] : memref<8x1xi32, #tpu.memory_space<vmem>>, vector<8x1xi32>
    %c8_i32 = arith.constant 8 : i32
    %6 = arith.muli %arg0, %c8_i32 : i32
    %c0_i32_6 = arith.constant 0 : i32
    %7 = arith.addi %6, %c0_i32_6 : i32
    %c0_7 = arith.constant 0 : index
    %c0_8 = arith.constant 0 : index
    %c0_9 = arith.constant 0 : index
    %8 = vector.load %arg1[%c0_7, %c0_8, %c0_9] : memref<8x8x512xf32, #tpu.memory_space<vmem>>, vector<1x8x512xf32>
    %9 = vector.shape_cast %8 : vector<1x8x512xf32> to vector<8x512xf32>
    %10 = arith.truncf %3 : vector<8x128xf32> to vector<8x128xbf16>
    %c0_10 = arith.constant 0 : index
    %c0_11 = arith.constant 0 : index
    %11 = vector.load %arg2[%c0_10, %c0_11] : memref<128x512xbf16, #tpu.memory_space<vmem>>, vector<128x512xbf16>
    %cst = arith.constant dense<0.000000e+00> : vector<8x512xf32>
    %12 = tpu.matmul %10, %11, %cst {dimension_numbers = #tpu.dot_dimension_numbers<[1], [0], [0], [1], [0, 0, 1, 1], [], []>} : vector<8x128xbf16>, vector<128x512xbf16>, vector<8x512xf32> -> vector<8x512xf32>
    %13 = arith.addf %9, %12 : vector<8x512xf32>
    %14 = vector.extract_strided_slice %13 {offsets = [0, 0], sizes = [8, 128], strides = [1, 1]} : vector<8x512xf32> to vector<8x128xf32>
    %15 = arith.negf %14 : vector<8x128xf32>
    %16 = math.exp %15 : vector<8x128xf32>
    %cst_12 = arith.constant 1.000000e+00 : f32
    %17 = vector.broadcast %cst_12 : f32 to vector<8x128xf32>
    %18 = arith.addf %17, %16 : vector<8x128xf32>
    %19 = arith.divf %17, %18 : vector<8x128xf32>
    %20 = vector.extract_strided_slice %13 {offsets = [0, 128], sizes = [8, 128], strides = [1, 1]} : vector<8x512xf32> to vector<8x128xf32>
    %21 = arith.negf %20 : vector<8x128xf32>
    %22 = math.exp %21 : vector<8x128xf32>
    %cst_13 = arith.constant 1.000000e+00 : f32
    %23 = vector.broadcast %cst_13 : f32 to vector<8x128xf32>
    %24 = arith.addf %23, %22 : vector<8x128xf32>
    %25 = arith.divf %23, %24 : vector<8x128xf32>
    %26 = vector.extract_strided_slice %13 {offsets = [0, 256], sizes = [8, 128], strides = [1, 1]} : vector<8x512xf32> to vector<8x128xf32>
    %27 = math.tanh %26 : vector<8x128xf32>
    %28 = vector.extract_strided_slice %13 {offsets = [0, 384], sizes = [8, 128], strides = [1, 1]} : vector<8x512xf32> to vector<8x128xf32>
    %29 = arith.negf %28 : vector<8x128xf32>
    %30 = math.exp %29 : vector<8x128xf32>
    %cst_14 = arith.constant 1.000000e+00 : f32
    %31 = vector.broadcast %cst_14 : f32 to vector<8x128xf32>
    %32 = arith.addf %31, %30 : vector<8x128xf32>
    %33 = arith.divf %31, %32 : vector<8x128xf32>
    %34 = arith.mulf %25, %4 : vector<8x128xf32>
    %35 = arith.mulf %19, %27 : vector<8x128xf32>
    %36 = arith.addf %34, %35 : vector<8x128xf32>
    %37 = math.tanh %36 : vector<8x128xf32>
    %38 = arith.mulf %33, %37 : vector<8x128xf32>
    %39 = vector.broadcast %7 : i32 to vector<8x1xi32>
    %40 = arith.cmpi sgt, %5, %39 : vector<8x1xi32>
    %41 = vector.shape_cast %40 : vector<8x1xi1> to vector<8x1xi1>
    %42 = vector.broadcast %41 : vector<8x1xi1> to vector<8x128xi1>
    %43 = arith.select %42, %38, %3 : vector<8x128xi1>, vector<8x128xf32>
    %44 = vector.shape_cast %40 : vector<8x1xi1> to vector<8x1xi1>
    %45 = vector.broadcast %44 : vector<8x1xi1> to vector<8x128xi1>
    %46 = arith.select %45, %36, %4 : vector<8x128xi1>, vector<8x128xf32>
    %47 = arith.truncf %43 : vector<8x128xf32> to vector<8x128xbf16>
    %c0_15 = arith.constant 0 : index
    %c0_16 = arith.constant 0 : index
    %c0_17 = arith.constant 0 : index
    %48 = vector.load %arg4[%c0_15, %c0_16, %c0_17] : memref<8x8x128xbf16, #tpu.memory_space<vmem>>, vector<1x8x128xbf16>
    %49 = vector.shape_cast %48 : vector<1x8x128xbf16> to vector<8x128xbf16>
    %50 = vector.shape_cast %47 : vector<8x128xbf16> to vector<1x8x128xbf16>
    tpu.vector_store %arg4[%c0_15, %c0_16, %c0_17], %50 {strides = array<i32>} : memref<8x8x128xbf16, #tpu.memory_space<vmem>>, vector<1x8x128xbf16>,
    %c8_i32_18 = arith.constant 8 : i32
    %51 = arith.muli %arg0, %c8_i32_18 : i32
    %c1_i32 = arith.constant 1 : i32
    %52 = arith.addi %51, %c1_i32 : i32
    %c1 = arith.constant 1 : index
    %c0_19 = arith.constant 0 : index
    %c0_20 = arith.constant 0 : index
    %53 = vector.load %arg1[%c1, %c0_19, %c0_20] : memref<8x8x512xf32, #tpu.memory_space<vmem>>, vector<1x8x512xf32>
    %54 = vector.shape_cast %53 : vector<1x8x512xf32> to vector<8x512xf32>
    %55 = arith.truncf %43 : vector<8x128xf32> to vector<8x128xbf16>
    %c0_21 = arith.constant 0 : index
    %c0_22 = arith.constant 0 : index
    %56 = vector.load %arg2[%c0_21, %c0_22] : memref<128x512xbf16, #tpu.memory_space<vmem>>, vector<128x512xbf16>
    %cst_23 = arith.constant dense<0.000000e+00> : vector<8x512xf32>
    %57 = tpu.matmul %55, %56, %cst_23 {dimension_numbers = #tpu.dot_dimension_numbers<[1], [0], [0], [1], [0, 0, 1, 1], [], []>} : vector<8x128xbf16>, vector<128x512xbf16>, vector<8x512xf32> -> vector<8x512xf32>
    %58 = arith.addf %54, %57 : vector<8x512xf32>
    %59 = vector.extract_strided_slice %58 {offsets = [0, 0], sizes = [8, 128], strides = [1, 1]} : vector<8x512xf32> to vector<8x128xf32>
    %60 = arith.negf %59 : vector<8x128xf32>
    %61 = math.exp %60 : vector<8x128xf32>
    %cst_24 = arith.constant 1.000000e+00 : f32
    %62 = vector.broadcast %cst_24 : f32 to vector<8x128xf32>
    %63 = arith.addf %62, %61 : vector<8x128xf32>
    %64 = arith.divf %62, %63 : vector<8x128xf32>
    %65 = vector.extract_strided_slice %58 {offsets = [0, 128], sizes = [8, 128], strides = [1, 1]} : vector<8x512xf32> to vector<8x128xf32>
    %66 = arith.negf %65 : vector<8x128xf32>
    %67 = math.exp %66 : vector<8x128xf32>
    %cst_25 = arith.constant 1.000000e+00 : f32
    %68 = vector.broadcast %cst_25 : f32 to vector<8x128xf32>
    %69 = arith.addf %68, %67 : vector<8x128xf32>
    %70 = arith.divf %68, %69 : vector<8x128xf32>
    %71 = vector.extract_strided_slice %58 {offsets = [0, 256], sizes = [8, 128], strides = [1, 1]} : vector<8x512xf32> to vector<8x128xf32>
    %72 = math.tanh %71 : vector<8x128xf32>
    %73 = vector.extract_strided_slice %58 {offsets = [0, 384], sizes = [8, 128], strides = [1, 1]} : vector<8x512xf32> to vector<8x128xf32>
    %74 = arith.negf %73 : vector<8x128xf32>
    %75 = math.exp %74 : vector<8x128xf32>
    %cst_26 = arith.constant 1.000000e+00 : f32
    %76 = vector.broadcast %cst_26 : f32 to vector<8x128xf32>
    %77 = arith.addf %76, %75 : vector<8x128xf32>
    %78 = arith.divf %76, %77 : vector<8x128xf32>
    %79 = arith.mulf %70, %46 : vector<8x128xf32>
    %80 = arith.mulf %64, %72 : vector<8x128xf32>
    %81 = arith.addf %79, %80 : vector<8x128xf32>
    %82 = math.tanh %81 : vector<8x128xf32>
    %83 = arith.mulf %78, %82 : vector<8x128xf32>
    %84 = vector.broadcast %52 : i32 to vector<8x1xi32>
    %85 = arith.cmpi sgt, %5, %84 : vector<8x1xi32>
    %86 = vector.shape_cast %85 : vector<8x1xi1> to vector<8x1xi1>
    %87 = vector.broadcast %86 : vector<8x1xi1> to vector<8x128xi1>
    %88 = arith.select %87, %83, %43 : vector<8x128xi1>, vector<8x128xf32>
    %89 = vector.shape_cast %85 : vector<8x1xi1> to vector<8x1xi1>
    %90 = vector.broadcast %89 : vector<8x1xi1> to vector<8x128xi1>
    %91 = arith.select %90, %81, %46 : vector<8x128xi1>, vector<8x128xf32>
    %92 = arith.truncf %88 : vector<8x128xf32> to vector<8x128xbf16>
    %c1_27 = arith.constant 1 : index
    %c0_28 = arith.constant 0 : index
    %c0_29 = arith.constant 0 : index
    %93 = vector.load %arg4[%c1_27, %c0_28, %c0_29] : memref<8x8x128xbf16, #tpu.memory_space<vmem>>, vector<1x8x128xbf16>
    %94 = vector.shape_cast %93 : vector<1x8x128xbf16> to vector<8x128xbf16>
    %95 = vector.shape_cast %92 : vector<8x128xbf16> to vector<1x8x128xbf16>
    tpu.vector_store %arg4[%c1_27, %c0_28, %c0_29], %95 {strides = array<i32>} : memref<8x8x128xbf16, #tpu.memory_space<vmem>>, vector<1x8x128xbf16>,
    %c8_i32_30 = arith.constant 8 : i32
    %96 = arith.muli %arg0, %c8_i32_30 : i32
    %c2_i32 = arith.constant 2 : i32
    %97 = arith.addi %96, %c2_i32 : i32
    %c2 = arith.constant 2 : index
    %c0_31 = arith.constant 0 : index
    %c0_32 = arith.constant 0 : index
    %98 = vector.load %arg1[%c2, %c0_31, %c0_32] : memref<8x8x512xf32, #tpu.memory_space<vmem>>, vector<1x8x512xf32>
    %99 = vector.shape_cast %98 : vector<1x8x512xf32> to vector<8x512xf32>
    %100 = arith.truncf %88 : vector<8x128xf32> to vector<8x128xbf16>
    %c0_33 = arith.constant 0 : index
    %c0_34 = arith.constant 0 : index
    %101 = vector.load %arg2[%c0_33, %c0_34] : memref<128x512xbf16, #tpu.memory_space<vmem>>, vector<128x512xbf16>
    %cst_35 = arith.constant dense<0.000000e+00> : vector<8x512xf32>
    %102 = tpu.matmul %100, %101, %cst_35 {dimension_numbers = #tpu.dot_dimension_numbers<[1], [0], [0], [1], [0, 0, 1, 1], [], []>} : vector<8x128xbf16>, vector<128x512xbf16>, vector<8x512xf32> -> vector<8x512xf32>
    %103 = arith.addf %99, %102 : vector<8x512xf32>
    %104 = vector.extract_strided_slice %103 {offsets = [0, 0], sizes = [8, 128], strides = [1, 1]} : vector<8x512xf32> to vector<8x128xf32>
    %105 = arith.negf %104 : vector<8x128xf32>
    %106 = math.exp %105 : vector<8x128xf32>
    %cst_36 = arith.constant 1.000000e+00 : f32
    %107 = vector.broadcast %cst_36 : f32 to vector<8x128xf32>
    %108 = arith.addf %107, %106 : vector<8x128xf32>
    %109 = arith.divf %107, %108 : vector<8x128xf32>
    %110 = vector.extract_strided_slice %103 {offsets = [0, 128], sizes = [8, 128], strides = [1, 1]} : vector<8x512xf32> to vector<8x128xf32>
    %111 = arith.negf %110 : vector<8x128xf32>
    %112 = math.exp %111 : vector<8x128xf32>
    %cst_37 = arith.constant 1.000000e+00 : f32
    %113 = vector.broadcast %cst_37 : f32 to vector<8x128xf32>
    %114 = arith.addf %113, %112 : vector<8x128xf32>
    %115 = arith.divf %113, %114 : vector<8x128xf32>
    %116 = vector.extract_strided_slice %103 {offsets = [0, 256], sizes = [8, 128], strides = [1, 1]} : vector<8x512xf32> to vector<8x128xf32>
    %117 = math.tanh %116 : vector<8x128xf32>
    %118 = vector.extract_strided_slice %103 {offsets = [0, 384], sizes = [8, 128], strides = [1, 1]} : vector<8x512xf32> to vector<8x128xf32>
    %119 = arith.negf %118 : vector<8x128xf32>
    %120 = math.exp %119 : vector<8x128xf32>
    %cst_38 = arith.constant 1.000000e+00 : f32
    %121 = vector.broadcast %cst_38 : f32 to vector<8x128xf32>
    %122 = arith.addf %121, %120 : vector<8x128xf32>
    %123 = arith.divf %121, %122 : vector<8x128xf32>
    %124 = arith.mulf %115, %91 : vector<8x128xf32>
    %125 = arith.mulf %109, %117 : vector<8x128xf32>
    %126 = arith.addf %124, %125 : vector<8x128xf32>
    %127 = math.tanh %126 : vector<8x128xf32>
    %128 = arith.mulf %123, %127 : vector<8x128xf32>
    %129 = vector.broadcast %97 : i32 to vector<8x1xi32>
    %130 = arith.cmpi sgt, %5, %129 : vector<8x1xi32>
    %131 = vector.shape_cast %130 : vector<8x1xi1> to vector<8x1xi1>
    %132 = vector.broadcast %131 : vector<8x1xi1> to vector<8x128xi1>
    %133 = arith.select %132, %128, %88 : vector<8x128xi1>, vector<8x128xf32>
    %134 = vector.shape_cast %130 : vector<8x1xi1> to vector<8x1xi1>
    %135 = vector.broadcast %134 : vector<8x1xi1> to vector<8x128xi1>
    %136 = arith.select %135, %126, %91 : vector<8x128xi1>, vector<8x128xf32>
    %137 = arith.truncf %133 : vector<8x128xf32> to vector<8x128xbf16>
    %c2_39 = arith.constant 2 : index
    %c0_40 = arith.constant 0 : index
    %c0_41 = arith.constant 0 : index
    %138 = vector.load %arg4[%c2_39, %c0_40, %c0_41] : memref<8x8x128xbf16, #tpu.memory_space<vmem>>, vector<1x8x128xbf16>
    %139 = vector.shape_cast %138 : vector<1x8x128xbf16> to vector<8x128xbf16>
    %140 = vector.shape_cast %137 : vector<8x128xbf16> to vector<1x8x128xbf16>
    tpu.vector_store %arg4[%c2_39, %c0_40, %c0_41], %140 {strides = array<i32>} : memref<8x8x128xbf16, #tpu.memory_space<vmem>>, vector<1x8x128xbf16>,
    %c8_i32_42 = arith.constant 8 : i32
    %141 = arith.muli %arg0, %c8_i32_42 : i32
    %c3_i32 = arith.constant 3 : i32
    %142 = arith.addi %141, %c3_i32 : i32
    %c3 = arith.constant 3 : index
    %c0_43 = arith.constant 0 : index
    %c0_44 = arith.constant 0 : index
    %143 = vector.load %arg1[%c3, %c0_43, %c0_44] : memref<8x8x512xf32, #tpu.memory_space<vmem>>, vector<1x8x512xf32>
    %144 = vector.shape_cast %143 : vector<1x8x512xf32> to vector<8x512xf32>
    %145 = arith.truncf %133 : vector<8x128xf32> to vector<8x128xbf16>
    %c0_45 = arith.constant 0 : index
    %c0_46 = arith.constant 0 : index
    %146 = vector.load %arg2[%c0_45, %c0_46] : memref<128x512xbf16, #tpu.memory_space<vmem>>, vector<128x512xbf16>
    %cst_47 = arith.constant dense<0.000000e+00> : vector<8x512xf32>
    %147 = tpu.matmul %145, %146, %cst_47 {dimension_numbers = #tpu.dot_dimension_numbers<[1], [0], [0], [1], [0, 0, 1, 1], [], []>} : vector<8x128xbf16>, vector<128x512xbf16>, vector<8x512xf32> -> vector<8x512xf32>
    %148 = arith.addf %144, %147 : vector<8x512xf32>
    %149 = vector.extract_strided_slice %148 {offsets = [0, 0], sizes = [8, 128], strides = [1, 1]} : vector<8x512xf32> to vector<8x128xf32>
    %150 = arith.negf %149 : vector<8x128xf32>
    %151 = math.exp %150 : vector<8x128xf32>
    %cst_48 = arith.constant 1.000000e+00 : f32
    %152 = vector.broadcast %cst_48 : f32 to vector<8x128xf32>
    %153 = arith.addf %152, %151 : vector<8x128xf32>
    %154 = arith.divf %152, %153 : vector<8x128xf32>
    %155 = vector.extract_strided_slice %148 {offsets = [0, 128], sizes = [8, 128], strides = [1, 1]} : vector<8x512xf32> to vector<8x128xf32>
    %156 = arith.negf %155 : vector<8x128xf32>
    %157 = math.exp %156 : vector<8x128xf32>
    %cst_49 = arith.constant 1.000000e+00 : f32
    %158 = vector.broadcast %cst_49 : f32 to vector<8x128xf32>
    %159 = arith.addf %158, %157 : vector<8x128xf32>
    %160 = arith.divf %158, %159 : vector<8x128xf32>
    %161 = vector.extract_strided_slice %148 {offsets = [0, 256], sizes = [8, 128], strides = [1, 1]} : vector<8x512xf32> to vector<8x128xf32>
    %162 = math.tanh %161 : vector<8x128xf32>
    %163 = vector.extract_strided_slice %148 {offsets = [0, 384], sizes = [8, 128], strides = [1, 1]} : vector<8x512xf32> to vector<8x128xf32>
    %164 = arith.negf %163 : vector<8x128xf32>
    %165 = math.exp %164 : vector<8x128xf32>
    %cst_50 = arith.constant 1.000000e+00 : f32
    %166 = vector.broadcast %cst_50 : f32 to vector<8x128xf32>
    %167 = arith.addf %166, %165 : vector<8x128xf32>
    %168 = arith.divf %166, %167 : vector<8x128xf32>
    %169 = arith.mulf %160, %136 : vector<8x128xf32>
    %170 = arith.mulf %154, %162 : vector<8x128xf32>
    %171 = arith.addf %169, %170 : vector<8x128xf32>
    %172 = math.tanh %171 : vector<8x128xf32>
    %173 = arith.mulf %168, %172 : vector<8x128xf32>
    %174 = vector.broadcast %142 : i32 to vector<8x1xi32>
    %175 = arith.cmpi sgt, %5, %174 : vector<8x1xi32>
    %176 = vector.shape_cast %175 : vector<8x1xi1> to vector<8x1xi1>
    %177 = vector.broadcast %176 : vector<8x1xi1> to vector<8x128xi1>
    %178 = arith.select %177, %173, %133 : vector<8x128xi1>, vector<8x128xf32>
    %179 = vector.shape_cast %175 : vector<8x1xi1> to vector<8x1xi1>
    %180 = vector.broadcast %179 : vector<8x1xi1> to vector<8x128xi1>
    %181 = arith.select %180, %171, %136 : vector<8x128xi1>, vector<8x128xf32>
    %182 = arith.truncf %178 : vector<8x128xf32> to vector<8x128xbf16>
    %c3_51 = arith.constant 3 : index
    %c0_52 = arith.constant 0 : index
    %c0_53 = arith.constant 0 : index
    %183 = vector.load %arg4[%c3_51, %c0_52, %c0_53] : memref<8x8x128xbf16, #tpu.memory_space<vmem>>, vector<1x8x128xbf16>
    %184 = vector.shape_cast %183 : vector<1x8x128xbf16> to vector<8x128xbf16>
    %185 = vector.shape_cast %182 : vector<8x128xbf16> to vector<1x8x128xbf16>
    tpu.vector_store %arg4[%c3_51, %c0_52, %c0_53], %185 {strides = array<i32>} : memref<8x8x128xbf16, #tpu.memory_space<vmem>>, vector<1x8x128xbf16>,
    %c8_i32_54 = arith.constant 8 : i32
    %186 = arith.muli %arg0, %c8_i32_54 : i32
    %c4_i32 = arith.constant 4 : i32
    %187 = arith.addi %186, %c4_i32 : i32
    %c4 = arith.constant 4 : index
    %c0_55 = arith.constant 0 : index
    %c0_56 = arith.constant 0 : index
    %188 = vector.load %arg1[%c4, %c0_55, %c0_56] : memref<8x8x512xf32, #tpu.memory_space<vmem>>, vector<1x8x512xf32>
    %189 = vector.shape_cast %188 : vector<1x8x512xf32> to vector<8x512xf32>
    %190 = arith.truncf %178 : vector<8x128xf32> to vector<8x128xbf16>
    %c0_57 = arith.constant 0 : index
    %c0_58 = arith.constant 0 : index
    %191 = vector.load %arg2[%c0_57, %c0_58] : memref<128x512xbf16, #tpu.memory_space<vmem>>, vector<128x512xbf16>
    %cst_59 = arith.constant dense<0.000000e+00> : vector<8x512xf32>
    %192 = tpu.matmul %190, %191, %cst_59 {dimension_numbers = #tpu.dot_dimension_numbers<[1], [0], [0], [1], [0, 0, 1, 1], [], []>} : vector<8x128xbf16>, vector<128x512xbf16>, vector<8x512xf32> -> vector<8x512xf32>
    %193 = arith.addf %189, %192 : vector<8x512xf32>
    %194 = vector.extract_strided_slice %193 {offsets = [0, 0], sizes = [8, 128], strides = [1, 1]} : vector<8x512xf32> to vector<8x128xf32>
    %195 = arith.negf %194 : vector<8x128xf32>
    %196 = math.exp %195 : vector<8x128xf32>
    %cst_60 = arith.constant 1.000000e+00 : f32
    %197 = vector.broadcast %cst_60 : f32 to vector<8x128xf32>
    %198 = arith.addf %197, %196 : vector<8x128xf32>
    %199 = arith.divf %197, %198 : vector<8x128xf32>
    %200 = vector.extract_strided_slice %193 {offsets = [0, 128], sizes = [8, 128], strides = [1, 1]} : vector<8x512xf32> to vector<8x128xf32>
    %201 = arith.negf %200 : vector<8x128xf32>
    %202 = math.exp %201 : vector<8x128xf32>
    %cst_61 = arith.constant 1.000000e+00 : f32
    %203 = vector.broadcast %cst_61 : f32 to vector<8x128xf32>
    %204 = arith.addf %203, %202 : vector<8x128xf32>
    %205 = arith.divf %203, %204 : vector<8x128xf32>
    %206 = vector.extract_strided_slice %193 {offsets = [0, 256], sizes = [8, 128], strides = [1, 1]} : vector<8x512xf32> to vector<8x128xf32>
    %207 = math.tanh %206 : vector<8x128xf32>
    %208 = vector.extract_strided_slice %193 {offsets = [0, 384], sizes = [8, 128], strides = [1, 1]} : vector<8x512xf32> to vector<8x128xf32>
    %209 = arith.negf %208 : vector<8x128xf32>
    %210 = math.exp %209 : vector<8x128xf32>
    %cst_62 = arith.constant 1.000000e+00 : f32
    %211 = vector.broadcast %cst_62 : f32 to vector<8x128xf32>
    %212 = arith.addf %211, %210 : vector<8x128xf32>
    %213 = arith.divf %211, %212 : vector<8x128xf32>
    %214 = arith.mulf %205, %181 : vector<8x128xf32>
    %215 = arith.mulf %199, %207 : vector<8x128xf32>
    %216 = arith.addf %214, %215 : vector<8x128xf32>
    %217 = math.tanh %216 : vector<8x128xf32>
    %218 = arith.mulf %213, %217 : vector<8x128xf32>
    %219 = vector.broadcast %187 : i32 to vector<8x1xi32>
    %220 = arith.cmpi sgt, %5, %219 : vector<8x1xi32>
    %221 = vector.shape_cast %220 : vector<8x1xi1> to vector<8x1xi1>
    %222 = vector.broadcast %221 : vector<8x1xi1> to vector<8x128xi1>
    %223 = arith.select %222, %218, %178 : vector<8x128xi1>, vector<8x128xf32>
    %224 = vector.shape_cast %220 : vector<8x1xi1> to vector<8x1xi1>
    %225 = vector.broadcast %224 : vector<8x1xi1> to vector<8x128xi1>
    %226 = arith.select %225, %216, %181 : vector<8x128xi1>, vector<8x128xf32>
    %227 = arith.truncf %223 : vector<8x128xf32> to vector<8x128xbf16>
    %c4_63 = arith.constant 4 : index
    %c0_64 = arith.constant 0 : index
    %c0_65 = arith.constant 0 : index
    %228 = vector.load %arg4[%c4_63, %c0_64, %c0_65] : memref<8x8x128xbf16, #tpu.memory_space<vmem>>, vector<1x8x128xbf16>
    %229 = vector.shape_cast %228 : vector<1x8x128xbf16> to vector<8x128xbf16>
    %230 = vector.shape_cast %227 : vector<8x128xbf16> to vector<1x8x128xbf16>
    tpu.vector_store %arg4[%c4_63, %c0_64, %c0_65], %230 {strides = array<i32>} : memref<8x8x128xbf16, #tpu.memory_space<vmem>>, vector<1x8x128xbf16>,
    %c8_i32_66 = arith.constant 8 : i32
    %231 = arith.muli %arg0, %c8_i32_66 : i32
    %c5_i32 = arith.constant 5 : i32
    %232 = arith.addi %231, %c5_i32 : i32
    %c5 = arith.constant 5 : index
    %c0_67 = arith.constant 0 : index
    %c0_68 = arith.constant 0 : index
    %233 = vector.load %arg1[%c5, %c0_67, %c0_68] : memref<8x8x512xf32, #tpu.memory_space<vmem>>, vector<1x8x512xf32>
    %234 = vector.shape_cast %233 : vector<1x8x512xf32> to vector<8x512xf32>
    %235 = arith.truncf %223 : vector<8x128xf32> to vector<8x128xbf16>
    %c0_69 = arith.constant 0 : index
    %c0_70 = arith.constant 0 : index
    %236 = vector.load %arg2[%c0_69, %c0_70] : memref<128x512xbf16, #tpu.memory_space<vmem>>, vector<128x512xbf16>
    %cst_71 = arith.constant dense<0.000000e+00> : vector<8x512xf32>
    %237 = tpu.matmul %235, %236, %cst_71 {dimension_numbers = #tpu.dot_dimension_numbers<[1], [0], [0], [1], [0, 0, 1, 1], [], []>} : vector<8x128xbf16>, vector<128x512xbf16>, vector<8x512xf32> -> vector<8x512xf32>
    %238 = arith.addf %234, %237 : vector<8x512xf32>
    %239 = vector.extract_strided_slice %238 {offsets = [0, 0], sizes = [8, 128], strides = [1, 1]} : vector<8x512xf32> to vector<8x128xf32>
    %240 = arith.negf %239 : vector<8x128xf32>
    %241 = math.exp %240 : vector<8x128xf32>
    %cst_72 = arith.constant 1.000000e+00 : f32
    %242 = vector.broadcast %cst_72 : f32 to vector<8x128xf32>
    %243 = arith.addf %242, %241 : vector<8x128xf32>
    %244 = arith.divf %242, %243 : vector<8x128xf32>
    %245 = vector.extract_strided_slice %238 {offsets = [0, 128], sizes = [8, 128], strides = [1, 1]} : vector<8x512xf32> to vector<8x128xf32>
    %246 = arith.negf %245 : vector<8x128xf32>
    %247 = math.exp %246 : vector<8x128xf32>
    %cst_73 = arith.constant 1.000000e+00 : f32
    %248 = vector.broadcast %cst_73 : f32 to vector<8x128xf32>
    %249 = arith.addf %248, %247 : vector<8x128xf32>
    %250 = arith.divf %248, %249 : vector<8x128xf32>
    %251 = vector.extract_strided_slice %238 {offsets = [0, 256], sizes = [8, 128], strides = [1, 1]} : vector<8x512xf32> to vector<8x128xf32>
    %252 = math.tanh %251 : vector<8x128xf32>
    %253 = vector.extract_strided_slice %238 {offsets = [0, 384], sizes = [8, 128], strides = [1, 1]} : vector<8x512xf32> to vector<8x128xf32>
    %254 = arith.negf %253 : vector<8x128xf32>
    %255 = math.exp %254 : vector<8x128xf32>
    %cst_74 = arith.constant 1.000000e+00 : f32
    %256 = vector.broadcast %cst_74 : f32 to vector<8x128xf32>
    %257 = arith.addf %256, %255 : vector<8x128xf32>
    %258 = arith.divf %256, %257 : vector<8x128xf32>
    %259 = arith.mulf %250, %226 : vector<8x128xf32>
    %260 = arith.mulf %244, %252 : vector<8x128xf32>
    %261 = arith.addf %259, %260 : vector<8x128xf32>
    %262 = math.tanh %261 : vector<8x128xf32>
    %263 = arith.mulf %258, %262 : vector<8x128xf32>
    %264 = vector.broadcast %232 : i32 to vector<8x1xi32>
    %265 = arith.cmpi sgt, %5, %264 : vector<8x1xi32>
    %266 = vector.shape_cast %265 : vector<8x1xi1> to vector<8x1xi1>
    %267 = vector.broadcast %266 : vector<8x1xi1> to vector<8x128xi1>
    %268 = arith.select %267, %263, %223 : vector<8x128xi1>, vector<8x128xf32>
    %269 = vector.shape_cast %265 : vector<8x1xi1> to vector<8x1xi1>
    %270 = vector.broadcast %269 : vector<8x1xi1> to vector<8x128xi1>
    %271 = arith.select %270, %261, %226 : vector<8x128xi1>, vector<8x128xf32>
    %272 = arith.truncf %268 : vector<8x128xf32> to vector<8x128xbf16>
    %c5_75 = arith.constant 5 : index
    %c0_76 = arith.constant 0 : index
    %c0_77 = arith.constant 0 : index
    %273 = vector.load %arg4[%c5_75, %c0_76, %c0_77] : memref<8x8x128xbf16, #tpu.memory_space<vmem>>, vector<1x8x128xbf16>
    %274 = vector.shape_cast %273 : vector<1x8x128xbf16> to vector<8x128xbf16>
    %275 = vector.shape_cast %272 : vector<8x128xbf16> to vector<1x8x128xbf16>
    tpu.vector_store %arg4[%c5_75, %c0_76, %c0_77], %275 {strides = array<i32>} : memref<8x8x128xbf16, #tpu.memory_space<vmem>>, vector<1x8x128xbf16>,
    %c8_i32_78 = arith.constant 8 : i32
    %276 = arith.muli %arg0, %c8_i32_78 : i32
    %c6_i32 = arith.constant 6 : i32
    %277 = arith.addi %276, %c6_i32 : i32
    %c6 = arith.constant 6 : index
    %c0_79 = arith.constant 0 : index
    %c0_80 = arith.constant 0 : index
    %278 = vector.load %arg1[%c6, %c0_79, %c0_80] : memref<8x8x512xf32, #tpu.memory_space<vmem>>, vector<1x8x512xf32>
    %279 = vector.shape_cast %278 : vector<1x8x512xf32> to vector<8x512xf32>
    %280 = arith.truncf %268 : vector<8x128xf32> to vector<8x128xbf16>
    %c0_81 = arith.constant 0 : index
    %c0_82 = arith.constant 0 : index
    %281 = vector.load %arg2[%c0_81, %c0_82] : memref<128x512xbf16, #tpu.memory_space<vmem>>, vector<128x512xbf16>
    %cst_83 = arith.constant dense<0.000000e+00> : vector<8x512xf32>
    %282 = tpu.matmul %280, %281, %cst_83 {dimension_numbers = #tpu.dot_dimension_numbers<[1], [0], [0], [1], [0, 0, 1, 1], [], []>} : vector<8x128xbf16>, vector<128x512xbf16>, vector<8x512xf32> -> vector<8x512xf32>
    %283 = arith.addf %279, %282 : vector<8x512xf32>
    %284 = vector.extract_strided_slice %283 {offsets = [0, 0], sizes = [8, 128], strides = [1, 1]} : vector<8x512xf32> to vector<8x128xf32>
    %285 = arith.negf %284 : vector<8x128xf32>
    %286 = math.exp %285 : vector<8x128xf32>
    %cst_84 = arith.constant 1.000000e+00 : f32
    %287 = vector.broadcast %cst_84 : f32 to vector<8x128xf32>
    %288 = arith.addf %287, %286 : vector<8x128xf32>
    %289 = arith.divf %287, %288 : vector<8x128xf32>
    %290 = vector.extract_strided_slice %283 {offsets = [0, 128], sizes = [8, 128], strides = [1, 1]} : vector<8x512xf32> to vector<8x128xf32>
    %291 = arith.negf %290 : vector<8x128xf32>
    %292 = math.exp %291 : vector<8x128xf32>
    %cst_85 = arith.constant 1.000000e+00 : f32
    %293 = vector.broadcast %cst_85 : f32 to vector<8x128xf32>
    %294 = arith.addf %293, %292 : vector<8x128xf32>
    %295 = arith.divf %293, %294 : vector<8x128xf32>
    %296 = vector.extract_strided_slice %283 {offsets = [0, 256], sizes = [8, 128], strides = [1, 1]} : vector<8x512xf32> to vector<8x128xf32>
    %297 = math.tanh %296 : vector<8x128xf32>
    %298 = vector.extract_strided_slice %283 {offsets = [0, 384], sizes = [8, 128], strides = [1, 1]} : vector<8x512xf32> to vector<8x128xf32>
    %299 = arith.negf %298 : vector<8x128xf32>
    %300 = math.exp %299 : vector<8x128xf32>
    %cst_86 = arith.constant 1.000000e+00 : f32
    %301 = vector.broadcast %cst_86 : f32 to vector<8x128xf32>
    %302 = arith.addf %301, %300 : vector<8x128xf32>
    %303 = arith.divf %301, %302 : vector<8x128xf32>
    %304 = arith.mulf %295, %271 : vector<8x128xf32>
    %305 = arith.mulf %289, %297 : vector<8x128xf32>
    %306 = arith.addf %304, %305 : vector<8x128xf32>
    %307 = math.tanh %306 : vector<8x128xf32>
    %308 = arith.mulf %303, %307 : vector<8x128xf32>
    %309 = vector.broadcast %277 : i32 to vector<8x1xi32>
    %310 = arith.cmpi sgt, %5, %309 : vector<8x1xi32>
    %311 = vector.shape_cast %310 : vector<8x1xi1> to vector<8x1xi1>
    %312 = vector.broadcast %311 : vector<8x1xi1> to vector<8x128xi1>
    %313 = arith.select %312, %308, %268 : vector<8x128xi1>, vector<8x128xf32>
    %314 = vector.shape_cast %310 : vector<8x1xi1> to vector<8x1xi1>
    %315 = vector.broadcast %314 : vector<8x1xi1> to vector<8x128xi1>
    %316 = arith.select %315, %306, %271 : vector<8x128xi1>, vector<8x128xf32>
    %317 = arith.truncf %313 : vector<8x128xf32> to vector<8x128xbf16>
    %c6_87 = arith.constant 6 : index
    %c0_88 = arith.constant 0 : index
    %c0_89 = arith.constant 0 : index
    %318 = vector.load %arg4[%c6_87, %c0_88, %c0_89] : memref<8x8x128xbf16, #tpu.memory_space<vmem>>, vector<1x8x128xbf16>
    %319 = vector.shape_cast %318 : vector<1x8x128xbf16> to vector<8x128xbf16>
    %320 = vector.shape_cast %317 : vector<8x128xbf16> to vector<1x8x128xbf16>
    tpu.vector_store %arg4[%c6_87, %c0_88, %c0_89], %320 {strides = array<i32>} : memref<8x8x128xbf16, #tpu.memory_space<vmem>>, vector<1x8x128xbf16>,
    %c8_i32_90 = arith.constant 8 : i32
    %321 = arith.muli %arg0, %c8_i32_90 : i32
    %c7_i32 = arith.constant 7 : i32
    %322 = arith.addi %321, %c7_i32 : i32
    %c7 = arith.constant 7 : index
    %c0_91 = arith.constant 0 : index
    %c0_92 = arith.constant 0 : index
    %323 = vector.load %arg1[%c7, %c0_91, %c0_92] : memref<8x8x512xf32, #tpu.memory_space<vmem>>, vector<1x8x512xf32>
    %324 = vector.shape_cast %323 : vector<1x8x512xf32> to vector<8x512xf32>
    %325 = arith.truncf %313 : vector<8x128xf32> to vector<8x128xbf16>
    %c0_93 = arith.constant 0 : index
    %c0_94 = arith.constant 0 : index
    %326 = vector.load %arg2[%c0_93, %c0_94] : memref<128x512xbf16, #tpu.memory_space<vmem>>, vector<128x512xbf16>
    %cst_95 = arith.constant dense<0.000000e+00> : vector<8x512xf32>
    %327 = tpu.matmul %325, %326, %cst_95 {dimension_numbers = #tpu.dot_dimension_numbers<[1], [0], [0], [1], [0, 0, 1, 1], [], []>} : vector<8x128xbf16>, vector<128x512xbf16>, vector<8x512xf32> -> vector<8x512xf32>
    %328 = arith.addf %324, %327 : vector<8x512xf32>
    %329 = vector.extract_strided_slice %328 {offsets = [0, 0], sizes = [8, 128], strides = [1, 1]} : vector<8x512xf32> to vector<8x128xf32>
    %330 = arith.negf %329 : vector<8x128xf32>
    %331 = math.exp %330 : vector<8x128xf32>
    %cst_96 = arith.constant 1.000000e+00 : f32
    %332 = vector.broadcast %cst_96 : f32 to vector<8x128xf32>
    %333 = arith.addf %332, %331 : vector<8x128xf32>
    %334 = arith.divf %332, %333 : vector<8x128xf32>
    %335 = vector.extract_strided_slice %328 {offsets = [0, 128], sizes = [8, 128], strides = [1, 1]} : vector<8x512xf32> to vector<8x128xf32>
    %336 = arith.negf %335 : vector<8x128xf32>
    %337 = math.exp %336 : vector<8x128xf32>
    %cst_97 = arith.constant 1.000000e+00 : f32
    %338 = vector.broadcast %cst_97 : f32 to vector<8x128xf32>
    %339 = arith.addf %338, %337 : vector<8x128xf32>
    %340 = arith.divf %338, %339 : vector<8x128xf32>
    %341 = vector.extract_strided_slice %328 {offsets = [0, 256], sizes = [8, 128], strides = [1, 1]} : vector<8x512xf32> to vector<8x128xf32>
    %342 = math.tanh %341 : vector<8x128xf32>
    %343 = vector.extract_strided_slice %328 {offsets = [0, 384], sizes = [8, 128], strides = [1, 1]} : vector<8x512xf32> to vector<8x128xf32>
    %344 = arith.negf %343 : vector<8x128xf32>
    %345 = math.exp %344 : vector<8x128xf32>
    %cst_98 = arith.constant 1.000000e+00 : f32
    %346 = vector.broadcast %cst_98 : f32 to vector<8x128xf32>
    %347 = arith.addf %346, %345 : vector<8x128xf32>
    %348 = arith.divf %346, %347 : vector<8x128xf32>
    %349 = arith.mulf %340, %316 : vector<8x128xf32>
    %350 = arith.mulf %334, %342 : vector<8x128xf32>
    %351 = arith.addf %349, %350 : vector<8x128xf32>
    %352 = math.tanh %351 : vector<8x128xf32>
    %353 = arith.mulf %348, %352 : vector<8x128xf32>
    %354 = vector.broadcast %322 : i32 to vector<8x1xi32>
    %355 = arith.cmpi sgt, %5, %354 : vector<8x1xi32>
    %356 = vector.shape_cast %355 : vector<8x1xi1> to vector<8x1xi1>
    %357 = vector.broadcast %356 : vector<8x1xi1> to vector<8x128xi1>
    %358 = arith.select %357, %353, %313 : vector<8x128xi1>, vector<8x128xf32>
    %359 = vector.shape_cast %355 : vector<8x1xi1> to vector<8x1xi1>
    %360 = vector.broadcast %359 : vector<8x1xi1> to vector<8x128xi1>
    %361 = arith.select %360, %351, %316 : vector<8x128xi1>, vector<8x128xf32>
    %362 = arith.truncf %358 : vector<8x128xf32> to vector<8x128xbf16>
    %c7_99 = arith.constant 7 : index
    %c0_100 = arith.constant 0 : index
    %c0_101 = arith.constant 0 : index
    %363 = vector.load %arg4[%c7_99, %c0_100, %c0_101] : memref<8x8x128xbf16, #tpu.memory_space<vmem>>, vector<1x8x128xbf16>
    %364 = vector.shape_cast %363 : vector<1x8x128xbf16> to vector<8x128xbf16>
    %365 = vector.shape_cast %362 : vector<8x128xbf16> to vector<1x8x128xbf16>
    tpu.vector_store %arg4[%c7_99, %c0_100, %c0_101], %365 {strides = array<i32>} : memref<8x8x128xbf16, #tpu.memory_space<vmem>>, vector<1x8x128xbf16>,
    %c0_102 = arith.constant 0 : index
    %c0_103 = arith.constant 0 : index
    %366 = vector.load %arg7[%c0_102, %c0_103] : memref<8x128xf32, #tpu.memory_space<vmem>>, vector<8x128xf32>
    tpu.vector_store %arg7[%c0_102, %c0_103], %358 {strides = array<i32>} : memref<8x128xf32, #tpu.memory_space<vmem>>, vector<8x128xf32>,
    %c0_104 = arith.constant 0 : index
    %c0_105 = arith.constant 0 : index
    %367 = vector.load %arg8[%c0_104, %c0_105] : memref<8x128xf32, #tpu.memory_space<vmem>>, vector<8x128xf32>
    tpu.vector_store %arg8[%c0_104, %c0_105], %361 {strides = array<i32>} : memref<8x128xf32, #tpu.memory_space<vmem>>, vector<8x128xf32>,
    %c0_i32_106 = arith.constant 0 : i32
    %368 = arith.cmpi eq, %arg0, %c0_i32_106 : i32
    %369 = arith.extui %368 : i1 to i32
    %c0_i32_107 = arith.constant 0 : i32
    %370 = arith.cmpi ne, %369, %c0_i32_107 : i32
    scf.if %370 {
      %c0_108 = arith.constant 0 : index
      %c0_109 = arith.constant 0 : index
      %371 = vector.load %arg5[%c0_108, %c0_109] : memref<8x128xf32, #tpu.memory_space<vmem>>, vector<8x128xf32>
      tpu.vector_store %arg5[%c0_108, %c0_109], %358 {strides = array<i32>} : memref<8x128xf32, #tpu.memory_space<vmem>>, vector<8x128xf32>,
      %c0_110 = arith.constant 0 : index
      %c0_111 = arith.constant 0 : index
      %372 = vector.load %arg6[%c0_110, %c0_111] : memref<8x128xf32, #tpu.memory_space<vmem>>, vector<8x128xf32>
      tpu.vector_store %arg6[%c0_110, %c0_111], %361 {strides = array<i32>} : memref<8x128xf32, #tpu.memory_space<vmem>>, vector<8x128xf32>,
    } else {
    }
    return
  }
  func.func @transform_0(%arg0: i32) -> (i32, i32, i32) {
    %c0_i32 = arith.constant 0 : i32
    %c0_i32_0 = arith.constant 0 : i32
    %c0_i32_1 = arith.constant 0 : i32
    return %arg0, %c0_i32, %c0_i32_0 : i32, i32, i32
  }
  func.func @transform_1(%arg0: i32) -> (i32, i32) {
    %c0_i32 = arith.constant 0 : i32
    %c0_i32_0 = arith.constant 0 : i32
    %c0_i32_1 = arith.constant 0 : i32
    return %c0_i32, %c0_i32_0 : i32, i32
  }
  func.func @transform_2(%arg0: i32) -> (i32, i32) {
    %c0_i32 = arith.constant 0 : i32
    %c0_i32_0 = arith.constant 0 : i32
    %c0_i32_1 = arith.constant 0 : i32
    return %c0_i32, %c0_i32_0 : i32, i32
  }
  func.func @transform_3(%arg0: i32) -> (i32, i32, i32) {
    %c0_i32 = arith.constant 0 : i32
    %c0_i32_0 = arith.constant 0 : i32
    %c0_i32_1 = arith.constant 0 : i32
    return %arg0, %c0_i32, %c0_i32_0 : i32, i32, i32
  }
  func.func @transform_4(%arg0: i32) -> (i32, i32) {
    %c0_i32 = arith.constant 0 : i32
    %c0_i32_0 = arith.constant 0 : i32
    %c0_i32_1 = arith.constant 0 : i32
    return %c0_i32, %c0_i32_0 : i32, i32
  }
  func.func @transform_5(%arg0: i32) -> (i32, i32) {
    %c0_i32 = arith.constant 0 : i32
    %c0_i32_0 = arith.constant 0 : i32
    %c0_i32_1 = arith.constant 0 : i32
    return %c0_i32, %c0_i32_0 : i32, i32
  }
}

module attributes {stable_mosaic.version = 11 : i64} {
  func.func @dec_seq_kernel(%arg0: i32, %arg1: memref<5xi32, #tpu.memory_space<smem>>, %arg2: memref<8x128xf32, #tpu.memory_space<vmem>>, %arg3: memref<1x8x128xf32, #tpu.memory_space<vmem>>, %arg4: memref<2x8x128xf32, #tpu.memory_space<vmem>>, %arg5: memref<2x8x128xf32, #tpu.memory_space<vmem>>, %arg6: memref<2x128x512xbf16, #tpu.memory_space<vmem>>, %arg7: memref<2x128x512xbf16, #tpu.memory_space<vmem>>, %arg8: memref<2x1x512xf32, #tpu.memory_space<vmem>>, %arg9: memref<128x128xbf16, #tpu.memory_space<vmem>>, %arg10: memref<1x128xf32, #tpu.memory_space<vmem>>, %arg11: memref<128x128xf32, #tpu.memory_space<vmem>>, %arg12: memref<1x8x128xf32, #tpu.memory_space<vmem>>, %arg13: memref<2x8x128xf32, #tpu.memory_space<vmem>>, %arg14: memref<2x8x128xf32, #tpu.memory_space<vmem>>, %arg15: memref<8x128xf32, #tpu.memory_space<vmem>>) attributes {dimension_semantics = [#tpu.dimension_semantics<arbitrary>], iteration_bounds = array<i64: 5>, scalar_prefetch = 1 : i64, scratch_operands = 3 : i64, tpu.core_type = #tpu.core_type<tc>, window_params = [{pipeline_mode = #tpu.pipeline_mode<synchronous>, transform_indices = @transform_0, window_bounds = array<i64: 8, 128>}, {transform_indices = @transform_1, window_bounds = array<i64: 1, 8, 128>}, {pipeline_mode = #tpu.pipeline_mode<synchronous>, transform_indices = @transform_2, window_bounds = array<i64: 2, 8, 128>}, {pipeline_mode = #tpu.pipeline_mode<synchronous>, transform_indices = @transform_3, window_bounds = array<i64: 2, 8, 128>}, {pipeline_mode = #tpu.pipeline_mode<synchronous>, transform_indices = @transform_4, window_bounds = array<i64: 2, 128, 512>}, {pipeline_mode = #tpu.pipeline_mode<synchronous>, transform_indices = @transform_5, window_bounds = array<i64: 2, 128, 512>}, {pipeline_mode = #tpu.pipeline_mode<synchronous>, transform_indices = @transform_6, window_bounds = array<i64: 2, 1, 512>}, {pipeline_mode = #tpu.pipeline_mode<synchronous>, transform_indices = @transform_7, window_bounds = array<i64: 128, 128>}, {pipeline_mode = #tpu.pipeline_mode<synchronous>, transform_indices = @transform_8, window_bounds = array<i64: 1, 128>}, {pipeline_mode = #tpu.pipeline_mode<synchronous>, transform_indices = @transform_9, window_bounds = array<i64: 128, 128>}, {transform_indices = @transform_10, window_bounds = array<i64: 1, 8, 128>}]} {
    %c0_i32 = arith.constant 0 : i32
    %0 = arith.cmpi eq, %arg0, %c0_i32 : i32
    %1 = arith.extui %0 : i1 to i32
    %c0_i32_0 = arith.constant 0 : i32
    %2 = arith.cmpi ne, %1, %c0_i32_0 : i32
    scf.if %2 {
      %c0_73 = arith.constant 0 : index
      %c0_74 = arith.constant 0 : index
      %c0_75 = arith.constant 0 : index
      %141 = vector.load %arg4[%c0_73, %c0_74, %c0_75] : memref<2x8x128xf32, #tpu.memory_space<vmem>>, vector<2x8x128xf32>
      %c0_76 = arith.constant 0 : index
      %c0_77 = arith.constant 0 : index
      %c0_78 = arith.constant 0 : index
      %142 = vector.load %arg13[%c0_76, %c0_77, %c0_78] : memref<2x8x128xf32, #tpu.memory_space<vmem>>, vector<2x8x128xf32>
      tpu.vector_store %arg13[%c0_76, %c0_77, %c0_78], %141 {strides = array<i32>} : memref<2x8x128xf32, #tpu.memory_space<vmem>>, vector<2x8x128xf32>,
      %c0_79 = arith.constant 0 : index
      %c0_80 = arith.constant 0 : index
      %c0_81 = arith.constant 0 : index
      %143 = vector.load %arg5[%c0_79, %c0_80, %c0_81] : memref<2x8x128xf32, #tpu.memory_space<vmem>>, vector<2x8x128xf32>
      %c0_82 = arith.constant 0 : index
      %c0_83 = arith.constant 0 : index
      %c0_84 = arith.constant 0 : index
      %144 = vector.load %arg14[%c0_82, %c0_83, %c0_84] : memref<2x8x128xf32, #tpu.memory_space<vmem>>, vector<2x8x128xf32>
      tpu.vector_store %arg14[%c0_82, %c0_83, %c0_84], %143 {strides = array<i32>} : memref<2x8x128xf32, #tpu.memory_space<vmem>>, vector<2x8x128xf32>,
      %c0_85 = arith.constant 0 : index
      %c0_86 = arith.constant 0 : index
      %145 = vector.load %arg2[%c0_85, %c0_86] : memref<8x128xf32, #tpu.memory_space<vmem>>, vector<8x128xf32>
      %c0_87 = arith.constant 0 : index
      %c0_88 = arith.constant 0 : index
      %146 = vector.load %arg15[%c0_87, %c0_88] : memref<8x128xf32, #tpu.memory_space<vmem>>, vector<8x128xf32>
      tpu.vector_store %arg15[%c0_87, %c0_88], %145 {strides = array<i32>} : memref<8x128xf32, #tpu.memory_space<vmem>>, vector<8x128xf32>,
    } else {
    }
    %c0 = arith.constant 0 : index
    %c0_1 = arith.constant 0 : index
    %3 = vector.load %arg15[%c0, %c0_1] : memref<8x128xf32, #tpu.memory_space<vmem>>, vector<8x128xf32>
    %c0_2 = arith.constant 0 : index
    %c0_3 = arith.constant 0 : index
    %c0_4 = arith.constant 0 : index
    %4 = vector.load %arg13[%c0_2, %c0_3, %c0_4] : memref<2x8x128xf32, #tpu.memory_space<vmem>>, vector<1x8x128xf32>
    %5 = vector.shape_cast %4 : vector<1x8x128xf32> to vector<8x128xf32>
    %c0_5 = arith.constant 0 : index
    %c0_6 = arith.constant 0 : index
    %c0_7 = arith.constant 0 : index
    %6 = vector.load %arg14[%c0_5, %c0_6, %c0_7] : memref<2x8x128xf32, #tpu.memory_space<vmem>>, vector<1x8x128xf32>
    %7 = vector.shape_cast %6 : vector<1x8x128xf32> to vector<8x128xf32>
    %8 = arith.truncf %3 : vector<8x128xf32> to vector<8x128xbf16>
    %c0_8 = arith.constant 0 : index
    %c0_9 = arith.constant 0 : index
    %c0_10 = arith.constant 0 : index
    %9 = vector.load %arg6[%c0_8, %c0_9, %c0_10] : memref<2x128x512xbf16, #tpu.memory_space<vmem>>, vector<1x128x512xbf16>
    %10 = vector.shape_cast %9 : vector<1x128x512xbf16> to vector<128x512xbf16>
    %cst = arith.constant dense<0.000000e+00> : vector<8x512xf32>
    %11 = tpu.matmul %8, %10, %cst {dimension_numbers = #tpu.dot_dimension_numbers<[1], [0], [0], [1], [0, 0, 1, 1], [], []>} : vector<8x128xbf16>, vector<128x512xbf16>, vector<8x512xf32> -> vector<8x512xf32>
    %12 = arith.truncf %5 : vector<8x128xf32> to vector<8x128xbf16>
    %c0_11 = arith.constant 0 : index
    %c0_12 = arith.constant 0 : index
    %c0_13 = arith.constant 0 : index
    %13 = vector.load %arg7[%c0_11, %c0_12, %c0_13] : memref<2x128x512xbf16, #tpu.memory_space<vmem>>, vector<1x128x512xbf16>
    %14 = vector.shape_cast %13 : vector<1x128x512xbf16> to vector<128x512xbf16>
    %cst_14 = arith.constant dense<0.000000e+00> : vector<8x512xf32>
    %15 = tpu.matmul %12, %14, %cst_14 {dimension_numbers = #tpu.dot_dimension_numbers<[1], [0], [0], [1], [0, 0, 1, 1], [], []>} : vector<8x128xbf16>, vector<128x512xbf16>, vector<8x512xf32> -> vector<8x512xf32>
    %16 = arith.addf %11, %15 : vector<8x512xf32>
    %c0_15 = arith.constant 0 : index
    %c0_16 = arith.constant 0 : index
    %c0_17 = arith.constant 0 : index
    %17 = vector.load %arg8[%c0_15, %c0_16, %c0_17] : memref<2x1x512xf32, #tpu.memory_space<vmem>>, vector<1x1x512xf32>
    %18 = vector.shape_cast %17 : vector<1x1x512xf32> to vector<1x512xf32>
    %19 = vector.broadcast %18 : vector<1x512xf32> to vector<8x512xf32>
    %20 = arith.addf %16, %19 : vector<8x512xf32>
    %21 = vector.extract_strided_slice %20 {offsets = [0, 0], sizes = [8, 128], strides = [1, 1]} : vector<8x512xf32> to vector<8x128xf32>
    %22 = arith.negf %21 : vector<8x128xf32>
    %23 = math.exp %22 : vector<8x128xf32>
    %cst_18 = arith.constant 1.000000e+00 : f32
    %24 = vector.broadcast %cst_18 : f32 to vector<8x128xf32>
    %25 = arith.addf %24, %23 : vector<8x128xf32>
    %26 = arith.divf %24, %25 : vector<8x128xf32>
    %27 = vector.extract_strided_slice %20 {offsets = [0, 128], sizes = [8, 128], strides = [1, 1]} : vector<8x512xf32> to vector<8x128xf32>
    %28 = arith.negf %27 : vector<8x128xf32>
    %29 = math.exp %28 : vector<8x128xf32>
    %cst_19 = arith.constant 1.000000e+00 : f32
    %30 = vector.broadcast %cst_19 : f32 to vector<8x128xf32>
    %31 = arith.addf %30, %29 : vector<8x128xf32>
    %32 = arith.divf %30, %31 : vector<8x128xf32>
    %33 = vector.extract_strided_slice %20 {offsets = [0, 256], sizes = [8, 128], strides = [1, 1]} : vector<8x512xf32> to vector<8x128xf32>
    %34 = math.tanh %33 : vector<8x128xf32>
    %35 = vector.extract_strided_slice %20 {offsets = [0, 384], sizes = [8, 128], strides = [1, 1]} : vector<8x512xf32> to vector<8x128xf32>
    %36 = arith.negf %35 : vector<8x128xf32>
    %37 = math.exp %36 : vector<8x128xf32>
    %cst_20 = arith.constant 1.000000e+00 : f32
    %38 = vector.broadcast %cst_20 : f32 to vector<8x128xf32>
    %39 = arith.addf %38, %37 : vector<8x128xf32>
    %40 = arith.divf %38, %39 : vector<8x128xf32>
    %41 = arith.mulf %32, %7 : vector<8x128xf32>
    %42 = arith.mulf %26, %34 : vector<8x128xf32>
    %43 = arith.addf %41, %42 : vector<8x128xf32>
    %44 = math.tanh %43 : vector<8x128xf32>
    %45 = arith.mulf %40, %44 : vector<8x128xf32>
    %c0_21 = arith.constant 0 : index
    %c0_22 = arith.constant 0 : index
    %c0_23 = arith.constant 0 : index
    %46 = vector.load %arg13[%c0_21, %c0_22, %c0_23] : memref<2x8x128xf32, #tpu.memory_space<vmem>>, vector<1x8x128xf32>
    %47 = vector.shape_cast %46 : vector<1x8x128xf32> to vector<8x128xf32>
    %48 = vector.shape_cast %45 : vector<8x128xf32> to vector<1x8x128xf32>
    tpu.vector_store %arg13[%c0_21, %c0_22, %c0_23], %48 {strides = array<i32>} : memref<2x8x128xf32, #tpu.memory_space<vmem>>, vector<1x8x128xf32>,
    %c0_24 = arith.constant 0 : index
    %c0_25 = arith.constant 0 : index
    %c0_26 = arith.constant 0 : index
    %49 = vector.load %arg14[%c0_24, %c0_25, %c0_26] : memref<2x8x128xf32, #tpu.memory_space<vmem>>, vector<1x8x128xf32>
    %50 = vector.shape_cast %49 : vector<1x8x128xf32> to vector<8x128xf32>
    %51 = vector.shape_cast %43 : vector<8x128xf32> to vector<1x8x128xf32>
    tpu.vector_store %arg14[%c0_24, %c0_25, %c0_26], %51 {strides = array<i32>} : memref<2x8x128xf32, #tpu.memory_space<vmem>>, vector<1x8x128xf32>,
    %c1 = arith.constant 1 : index
    %c0_27 = arith.constant 0 : index
    %c0_28 = arith.constant 0 : index
    %52 = vector.load %arg13[%c1, %c0_27, %c0_28] : memref<2x8x128xf32, #tpu.memory_space<vmem>>, vector<1x8x128xf32>
    %53 = vector.shape_cast %52 : vector<1x8x128xf32> to vector<8x128xf32>
    %c1_29 = arith.constant 1 : index
    %c0_30 = arith.constant 0 : index
    %c0_31 = arith.constant 0 : index
    %54 = vector.load %arg14[%c1_29, %c0_30, %c0_31] : memref<2x8x128xf32, #tpu.memory_space<vmem>>, vector<1x8x128xf32>
    %55 = vector.shape_cast %54 : vector<1x8x128xf32> to vector<8x128xf32>
    %56 = arith.truncf %45 : vector<8x128xf32> to vector<8x128xbf16>
    %c1_32 = arith.constant 1 : index
    %c0_33 = arith.constant 0 : index
    %c0_34 = arith.constant 0 : index
    %57 = vector.load %arg6[%c1_32, %c0_33, %c0_34] : memref<2x128x512xbf16, #tpu.memory_space<vmem>>, vector<1x128x512xbf16>
    %58 = vector.shape_cast %57 : vector<1x128x512xbf16> to vector<128x512xbf16>
    %cst_35 = arith.constant dense<0.000000e+00> : vector<8x512xf32>
    %59 = tpu.matmul %56, %58, %cst_35 {dimension_numbers = #tpu.dot_dimension_numbers<[1], [0], [0], [1], [0, 0, 1, 1], [], []>} : vector<8x128xbf16>, vector<128x512xbf16>, vector<8x512xf32> -> vector<8x512xf32>
    %60 = arith.truncf %53 : vector<8x128xf32> to vector<8x128xbf16>
    %c1_36 = arith.constant 1 : index
    %c0_37 = arith.constant 0 : index
    %c0_38 = arith.constant 0 : index
    %61 = vector.load %arg7[%c1_36, %c0_37, %c0_38] : memref<2x128x512xbf16, #tpu.memory_space<vmem>>, vector<1x128x512xbf16>
    %62 = vector.shape_cast %61 : vector<1x128x512xbf16> to vector<128x512xbf16>
    %cst_39 = arith.constant dense<0.000000e+00> : vector<8x512xf32>
    %63 = tpu.matmul %60, %62, %cst_39 {dimension_numbers = #tpu.dot_dimension_numbers<[1], [0], [0], [1], [0, 0, 1, 1], [], []>} : vector<8x128xbf16>, vector<128x512xbf16>, vector<8x512xf32> -> vector<8x512xf32>
    %64 = arith.addf %59, %63 : vector<8x512xf32>
    %c1_40 = arith.constant 1 : index
    %c0_41 = arith.constant 0 : index
    %c0_42 = arith.constant 0 : index
    %65 = vector.load %arg8[%c1_40, %c0_41, %c0_42] : memref<2x1x512xf32, #tpu.memory_space<vmem>>, vector<1x1x512xf32>
    %66 = vector.shape_cast %65 : vector<1x1x512xf32> to vector<1x512xf32>
    %67 = vector.broadcast %66 : vector<1x512xf32> to vector<8x512xf32>
    %68 = arith.addf %64, %67 : vector<8x512xf32>
    %69 = vector.extract_strided_slice %68 {offsets = [0, 0], sizes = [8, 128], strides = [1, 1]} : vector<8x512xf32> to vector<8x128xf32>
    %70 = arith.negf %69 : vector<8x128xf32>
    %71 = math.exp %70 : vector<8x128xf32>
    %cst_43 = arith.constant 1.000000e+00 : f32
    %72 = vector.broadcast %cst_43 : f32 to vector<8x128xf32>
    %73 = arith.addf %72, %71 : vector<8x128xf32>
    %74 = arith.divf %72, %73 : vector<8x128xf32>
    %75 = vector.extract_strided_slice %68 {offsets = [0, 128], sizes = [8, 128], strides = [1, 1]} : vector<8x512xf32> to vector<8x128xf32>
    %76 = arith.negf %75 : vector<8x128xf32>
    %77 = math.exp %76 : vector<8x128xf32>
    %cst_44 = arith.constant 1.000000e+00 : f32
    %78 = vector.broadcast %cst_44 : f32 to vector<8x128xf32>
    %79 = arith.addf %78, %77 : vector<8x128xf32>
    %80 = arith.divf %78, %79 : vector<8x128xf32>
    %81 = vector.extract_strided_slice %68 {offsets = [0, 256], sizes = [8, 128], strides = [1, 1]} : vector<8x512xf32> to vector<8x128xf32>
    %82 = math.tanh %81 : vector<8x128xf32>
    %83 = vector.extract_strided_slice %68 {offsets = [0, 384], sizes = [8, 128], strides = [1, 1]} : vector<8x512xf32> to vector<8x128xf32>
    %84 = arith.negf %83 : vector<8x128xf32>
    %85 = math.exp %84 : vector<8x128xf32>
    %cst_45 = arith.constant 1.000000e+00 : f32
    %86 = vector.broadcast %cst_45 : f32 to vector<8x128xf32>
    %87 = arith.addf %86, %85 : vector<8x128xf32>
    %88 = arith.divf %86, %87 : vector<8x128xf32>
    %89 = arith.mulf %80, %55 : vector<8x128xf32>
    %90 = arith.mulf %74, %82 : vector<8x128xf32>
    %91 = arith.addf %89, %90 : vector<8x128xf32>
    %92 = math.tanh %91 : vector<8x128xf32>
    %93 = arith.mulf %88, %92 : vector<8x128xf32>
    %c1_46 = arith.constant 1 : index
    %c0_47 = arith.constant 0 : index
    %c0_48 = arith.constant 0 : index
    %94 = vector.load %arg13[%c1_46, %c0_47, %c0_48] : memref<2x8x128xf32, #tpu.memory_space<vmem>>, vector<1x8x128xf32>
    %95 = vector.shape_cast %94 : vector<1x8x128xf32> to vector<8x128xf32>
    %96 = vector.shape_cast %93 : vector<8x128xf32> to vector<1x8x128xf32>
    tpu.vector_store %arg13[%c1_46, %c0_47, %c0_48], %96 {strides = array<i32>} : memref<2x8x128xf32, #tpu.memory_space<vmem>>, vector<1x8x128xf32>,
    %c1_49 = arith.constant 1 : index
    %c0_50 = arith.constant 0 : index
    %c0_51 = arith.constant 0 : index
    %97 = vector.load %arg14[%c1_49, %c0_50, %c0_51] : memref<2x8x128xf32, #tpu.memory_space<vmem>>, vector<1x8x128xf32>
    %98 = vector.shape_cast %97 : vector<1x8x128xf32> to vector<8x128xf32>
    %99 = vector.shape_cast %91 : vector<8x128xf32> to vector<1x8x128xf32>
    tpu.vector_store %arg14[%c1_49, %c0_50, %c0_51], %99 {strides = array<i32>} : memref<2x8x128xf32, #tpu.memory_space<vmem>>, vector<1x8x128xf32>,
    %100 = arith.truncf %93 : vector<8x128xf32> to vector<8x128xbf16>
    %c0_52 = arith.constant 0 : index
    %c0_53 = arith.constant 0 : index
    %101 = vector.load %arg9[%c0_52, %c0_53] : memref<128x128xbf16, #tpu.memory_space<vmem>>, vector<128x128xbf16>
    %cst_54 = arith.constant dense<0.000000e+00> : vector<8x128xf32>
    %102 = tpu.matmul %100, %101, %cst_54 {dimension_numbers = #tpu.dot_dimension_numbers<[1], [0], [0], [1], [0, 0, 1, 1], [], []>} : vector<8x128xbf16>, vector<128x128xbf16>, vector<8x128xf32> -> vector<8x128xf32>
    %c0_55 = arith.constant 0 : index
    %c0_56 = arith.constant 0 : index
    %103 = vector.load %arg10[%c0_55, %c0_56] : memref<1x128xf32, #tpu.memory_space<vmem>>, vector<1x128xf32>
    %104 = vector.broadcast %103 : vector<1x128xf32> to vector<8x128xf32>
    %105 = arith.addf %102, %104 : vector<8x128xf32>
    %c0_57 = arith.constant 0 : index
    %c0_58 = arith.constant 0 : index
    %c0_59 = arith.constant 0 : index
    %106 = vector.load %arg12[%c0_57, %c0_58, %c0_59] : memref<1x8x128xf32, #tpu.memory_space<vmem>>, vector<1x8x128xf32>
    %107 = vector.shape_cast %106 : vector<1x8x128xf32> to vector<8x128xf32>
    %108 = vector.shape_cast %105 : vector<8x128xf32> to vector<1x8x128xf32>
    tpu.vector_store %arg12[%c0_57, %c0_58, %c0_59], %108 {strides = array<i32>} : memref<1x8x128xf32, #tpu.memory_space<vmem>>, vector<1x8x128xf32>,
    %109 = tpu.iota {dimensions = array<i32: 1>} : vector<8x128xi32>
    %c11_i32 = arith.constant 11 : i32
    %110 = vector.broadcast %c11_i32 : i32 to vector<8x128xi32>
    %111 = arith.cmpi slt, %109, %110 : vector<8x128xi32>
    %cst_60 = arith.constant -1.000000e+30 : f32
    %112 = vector.broadcast %cst_60 : f32 to vector<8x128xf32>
    %113 = arith.select %111, %105, %112 : vector<8x128xi1>, vector<8x128xf32>
    %cst_61 = arith.constant dense<0xFF800000> : vector<8xf32>
    %114 = vector.multi_reduction <maximumf>, %113, %cst_61 [1] : vector<8x128xf32> to vector<8xf32>
    %115 = vector.shape_cast %114 : vector<8xf32> to vector<8x1xf32>
    %116 = arith.sitofp %109 : vector<8x128xi32> to vector<8x128xf32>
    %117 = vector.broadcast %115 : vector<8x1xf32> to vector<8x128xf32>
    %118 = arith.cmpf oeq, %113, %117 : vector<8x128xf32>
    %cst_62 = arith.constant 1.000000e+09 : f32
    %119 = vector.broadcast %cst_62 : f32 to vector<8x128xf32>
    %120 = arith.select %118, %116, %119 : vector<8x128xi1>, vector<8x128xf32>
    %cst_63 = arith.constant dense<0x7F800000> : vector<8xf32>
    %121 = vector.multi_reduction <minimumf>, %120, %cst_63 [1] : vector<8x128xf32> to vector<8xf32>
    %122 = vector.shape_cast %121 : vector<8xf32> to vector<8x1xf32>
    %123 = vector.broadcast %122 : vector<8x1xf32> to vector<8x128xf32>
    %124 = arith.cmpf oeq, %116, %123 : vector<8x128xf32>
    %125 = arith.extui %124 : vector<8x128xi1> to vector<8x128xi32>
    %126 = arith.sitofp %125 : vector<8x128xi32> to vector<8x128xf32>
    %c0_64 = arith.constant 0 : index
    %c0_65 = arith.constant 0 : index
    %127 = vector.load %arg11[%c0_64, %c0_65] : memref<128x128xf32, #tpu.memory_space<vmem>>, vector<128x128xf32>
    %cst_66 = arith.constant dense<0.000000e+00> : vector<8x128xf32>
    %128 = tpu.matmul %126, %127, %cst_66 {dimension_numbers = #tpu.dot_dimension_numbers<[1], [0], [0], [1], [0, 0, 1, 1], [], []>} : vector<8x128xf32>, vector<128x128xf32>, vector<8x128xf32> -> vector<8x128xf32>
    %129 = arith.index_cast %arg0 : i32 to index
    %130 = memref.load %arg1[%129] : memref<5xi32, #tpu.memory_space<smem>>
    %131 = arith.sitofp %130 : i32 to f32
    %c0_67 = arith.constant 0 : index
    %c0_68 = arith.constant 0 : index
    %c0_69 = arith.constant 0 : index
    %132 = vector.load %arg3[%c0_67, %c0_68, %c0_69] : memref<1x8x128xf32, #tpu.memory_space<vmem>>, vector<1x8x128xf32>
    %133 = vector.shape_cast %132 : vector<1x8x128xf32> to vector<8x128xf32>
    %134 = vector.broadcast %131 : f32 to vector<8x128xf32>
    %135 = arith.mulf %134, %133 : vector<8x128xf32>
    %cst_70 = arith.constant 1.000000e+00 : f32
    %136 = arith.subf %cst_70, %131 : f32
    %137 = vector.broadcast %136 : f32 to vector<8x128xf32>
    %138 = arith.mulf %137, %128 : vector<8x128xf32>
    %139 = arith.addf %135, %138 : vector<8x128xf32>
    %c0_71 = arith.constant 0 : index
    %c0_72 = arith.constant 0 : index
    %140 = vector.load %arg15[%c0_71, %c0_72] : memref<8x128xf32, #tpu.memory_space<vmem>>, vector<8x128xf32>
    tpu.vector_store %arg15[%c0_71, %c0_72], %139 {strides = array<i32>} : memref<8x128xf32, #tpu.memory_space<vmem>>, vector<8x128xf32>,
    return
  }
  func.func @transform_0(%arg0: i32, %arg1: memref<5xi32, #tpu.memory_space<smem>>) -> (i32, i32) {
    %c0_i32 = arith.constant 0 : i32
    %c0_i32_0 = arith.constant 0 : i32
    %c0_i32_1 = arith.constant 0 : i32
    return %c0_i32, %c0_i32_0 : i32, i32
  }
  func.func @transform_1(%arg0: i32, %arg1: memref<5xi32, #tpu.memory_space<smem>>) -> (i32, i32, i32) {
    %c0_i32 = arith.constant 0 : i32
    %c0_i32_0 = arith.constant 0 : i32
    %c0_i32_1 = arith.constant 0 : i32
    return %arg0, %c0_i32, %c0_i32_0 : i32, i32, i32
  }
  func.func @transform_2(%arg0: i32, %arg1: memref<5xi32, #tpu.memory_space<smem>>) -> (i32, i32, i32) {
    %c0_i32 = arith.constant 0 : i32
    %c0_i32_0 = arith.constant 0 : i32
    %c0_i32_1 = arith.constant 0 : i32
    %c0_i32_2 = arith.constant 0 : i32
    return %c0_i32, %c0_i32_0, %c0_i32_1 : i32, i32, i32
  }
  func.func @transform_3(%arg0: i32, %arg1: memref<5xi32, #tpu.memory_space<smem>>) -> (i32, i32, i32) {
    %c0_i32 = arith.constant 0 : i32
    %c0_i32_0 = arith.constant 0 : i32
    %c0_i32_1 = arith.constant 0 : i32
    %c0_i32_2 = arith.constant 0 : i32
    return %c0_i32, %c0_i32_0, %c0_i32_1 : i32, i32, i32
  }
  func.func @transform_4(%arg0: i32, %arg1: memref<5xi32, #tpu.memory_space<smem>>) -> (i32, i32, i32) {
    %c0_i32 = arith.constant 0 : i32
    %c0_i32_0 = arith.constant 0 : i32
    %c0_i32_1 = arith.constant 0 : i32
    %c0_i32_2 = arith.constant 0 : i32
    return %c0_i32, %c0_i32_0, %c0_i32_1 : i32, i32, i32
  }
  func.func @transform_5(%arg0: i32, %arg1: memref<5xi32, #tpu.memory_space<smem>>) -> (i32, i32, i32) {
    %c0_i32 = arith.constant 0 : i32
    %c0_i32_0 = arith.constant 0 : i32
    %c0_i32_1 = arith.constant 0 : i32
    %c0_i32_2 = arith.constant 0 : i32
    return %c0_i32, %c0_i32_0, %c0_i32_1 : i32, i32, i32
  }
  func.func @transform_6(%arg0: i32, %arg1: memref<5xi32, #tpu.memory_space<smem>>) -> (i32, i32, i32) {
    %c0_i32 = arith.constant 0 : i32
    %c0_i32_0 = arith.constant 0 : i32
    %c0_i32_1 = arith.constant 0 : i32
    %c0_i32_2 = arith.constant 0 : i32
    return %c0_i32, %c0_i32_0, %c0_i32_1 : i32, i32, i32
  }
  func.func @transform_7(%arg0: i32, %arg1: memref<5xi32, #tpu.memory_space<smem>>) -> (i32, i32) {
    %c0_i32 = arith.constant 0 : i32
    %c0_i32_0 = arith.constant 0 : i32
    %c0_i32_1 = arith.constant 0 : i32
    return %c0_i32, %c0_i32_0 : i32, i32
  }
  func.func @transform_8(%arg0: i32, %arg1: memref<5xi32, #tpu.memory_space<smem>>) -> (i32, i32) {
    %c0_i32 = arith.constant 0 : i32
    %c0_i32_0 = arith.constant 0 : i32
    %c0_i32_1 = arith.constant 0 : i32
    return %c0_i32, %c0_i32_0 : i32, i32
  }
  func.func @transform_9(%arg0: i32, %arg1: memref<5xi32, #tpu.memory_space<smem>>) -> (i32, i32) {
    %c0_i32 = arith.constant 0 : i32
    %c0_i32_0 = arith.constant 0 : i32
    %c0_i32_1 = arith.constant 0 : i32
    return %c0_i32, %c0_i32_0 : i32, i32
  }
  func.func @transform_10(%arg0: i32, %arg1: memref<5xi32, #tpu.memory_space<smem>>) -> (i32, i32, i32) {
    %c0_i32 = arith.constant 0 : i32
    %c0_i32_0 = arith.constant 0 : i32
    %c0_i32_1 = arith.constant 0 : i32
    return %arg0, %c0_i32, %c0_i32_0 : i32, i32, i32
  }
}

</mosaic_0001>

<bundles_post_ra>
// kernel: seq2seq_forward.5
= control target key start
LH: loop header
LB: loop body
LE: loop exit
PB: predicated region body
PF: predicated region fallthrough
CT: control target
= control target key end

     0   :  { %v311_v1 = vmov 0   ;;  %vm89_vm0 = vcmask 130048   ;;  %v29_v9 = vlaneseq  ;;  %s503_s1 = inlined_call_operand.vmem [shape: bf16[16,512], index: 1, kind: input, shape index: {}]   ;;  %s504_s0 = inlined_call_operand.vmem [shape: bf16[64,16], index: 0, kind: input, shape index: {}]   ;;  %s505_s2 = inlined_call_operand.vmem [shape: f32[1,512], index: 2, kind: input, shape index: {}]   ;;  %s506_s3 = inlined_call_operand.vmem [shape: f32[64,512], index: 3, kind: output, shape index: {}]  }
   0x1   :  { %v301_v0 = vld [vmem:[%s503_s1 + $0x4] ss:$16 sps:$4 sm:$0xff]   ;;  %134 = vmatprep.mubr.bf16.mxu0 %v311_v1  ;;  %207 = vmatprep.mubr.bf16.mxu1 %v311_v1  ;;  %v303_v2 = vld [vmem:[%s503_s1 + $0xc] ss:$16 sps:$4 sm:$0xff]   ;;  %v305_v3 = vld [vmem:[%s503_s1] ss:$16 sps:$4 sm:$0xff]  }
   0x2   :  { %116 = vmatprep.subr.bf16.mxu0 %v301_v0  ;;  %v306_v4 = vld [vmem:[%s503_s1 + $0x8] ss:$16 sps:$4 sm:$0xff]   ;;  %189 = vmatprep.subr.bf16.mxu1 %v303_v2  ;;  %v307_v5 = vld [vmem:[%s504_s0] sm:$0xff]   ;;  %v309_v7 = vld [vmem:[%s504_s0 + $0x10] sm:$0xff]   ;;  %v30_v10 = vshrl.u32 %v29_v9, 7 }
   0x3   :  { %117 = vmatpush1.bf16.msra.mxu0 %v305_v3  ;;  %190 = vmatpush1.bf16.msra.mxu1 %v306_v4  ;;  %v308_v6 = vld [vmem:[%s504_s0 + $0x8] sm:$0xff]   ;;  %v310_v8 = vld [vmem:[%s504_s0 + $0x18] sm:$0xff]   ;;  %v27_v13 = vld [vmem:[%s505_s2] sm:$0xf] }
   0x4   :  { %v31_v11 = vsub.s32 0, %v30_v10  ;;  %v39_v12 = vsub.s32 2, %v30_v10  ;;  %v35_v14 = vsub.s32 1, %v30_v10  ;;  %v43_v15 = vsub.s32 3, %v30_v10 }
   0x6   :  { %292 = vmatmul.mubr.msk.bf16.vlgmr.msra.gmra.mxu0 %vm89_vm0, %v307_v5  ;;  %296 = vmatmul.mubr.msk.bf16.vlgmr.msra.gmra.mxu1 %vm89_vm0, %v307_v5  ;;  %v367_v16 = vrot.slane %v27_v13, %v31_v11  ;;  %v369_v17 = vrot.slane %v27_v13, %v39_v12  ;;  %v371_v18 = vrot.slane %v27_v13, %v35_v14 }
   0x7   :  { %144 = vmatprep.mubr.bf16.mxu0 %v311_v1  ;;  %217 = vmatprep.mubr.bf16.mxu1 %v311_v1  ;;  %v373_v19 = vrot.slane %v27_v13, %v43_v15 }
   0xe   :  { %293 = vmatmul.mubr.msk.bf16.gmra.mxu0 %vm89_vm0, %v308_v6  ;;  %297 = vmatmul.mubr.msk.bf16.gmra.mxu1 %vm89_vm0, %v308_v6 }
   0xf   :  { %154 = vmatprep.mubr.bf16.mxu0 %v311_v1  ;;  %227 = vmatprep.mubr.bf16.mxu1 %v311_v1 }
  0x16   :  { %294 = vmatmul.mubr.msk.bf16.gmra.mxu0 %vm89_vm0, %v309_v7  ;;  %298 = vmatmul.mubr.msk.bf16.gmra.mxu1 %vm89_vm0, %v309_v7 }
  0x17   :  { %164 = vmatprep.mubr.bf16.mxu0 %v311_v1  ;;  %237 = vmatprep.mubr.bf16.mxu1 %v311_v1 }
  0x1e   :  { %295 = vmatmul.mubr.msk.bf16.gmra.mxu0 %vm89_vm0, %v310_v8  ;;  %299 = vmatmul.mubr.msk.bf16.gmra.mxu1 %vm89_vm0, %v310_v8 }
  0xc6   :  { %v136_v20 = vpop.f32.mrf.mxu0  ;;  %v209_v21 = vpop.f32.mrf.mxu1 }
  0xc7   :  { %v137_v22 = vadd.f32 %v136_v20, %v367_v16  ;;  %v210_v23 = vadd.f32 %v209_v21, %v369_v17 }
  0xc8   :  { %v138_v24 = vpop.f32.mrf.mxu0  ;;  %v211_v25 = vpop.f32.mrf.mxu1 }
  0xc9   :  { %248 = vst [vmem:[%s506_s3] sm:$0xff] %v137_v22  ;;  %250 = vst [vmem:[%s506_s3 + $0x10] sm:$0xff] %v210_v23  ;;  %v139_v26 = vadd.f32 %v138_v24, %v371_v18  ;;  %v212_v27 = vadd.f32 %v211_v25, %v373_v19 }
  0xca   :  { %v140_v28 = vpop.f32.mrf.mxu0  ;;  %v213_v29 = vpop.f32.mrf.mxu1 }
  0xcb   :  { %249 = vst [vmem:[%s506_s3 + $0x8] sm:$0xff] %v139_v26  ;;  %251 = vst [vmem:[%s506_s3 + $0x18] sm:$0xff] %v212_v27  ;;  %v141_v30 = vadd.f32 %v140_v28, %v367_v16  ;;  %v214_v31 = vadd.f32 %v213_v29, %v369_v17 }
  0xcc   :  { %v142_v32 = vpop.f32.mrf.mxu0  ;;  %v215_v33 = vpop.f32.mrf.mxu1 }
  0xcd   :  { %252 = vst [vmem:[%s506_s3 + $0x20] sm:$0xff] %v141_v30  ;;  %254 = vst [vmem:[%s506_s3 + $0x30] sm:$0xff] %v214_v31  ;;  %v143_v34 = vadd.f32 %v142_v32, %v371_v18  ;;  %v216_v35 = vadd.f32 %v215_v33, %v373_v19 }
  0xce   :  { %v146_v36 = vpop.f32.mrf.mxu0  ;;  %v219_v37 = vpop.f32.mrf.mxu1 }
  0xcf   :  { %253 = vst [vmem:[%s506_s3 + $0x28] sm:$0xff] %v143_v34  ;;  %255 = vst [vmem:[%s506_s3 + $0x38] sm:$0xff] %v216_v35  ;;  %v147_v38 = vadd.f32 %v146_v36, %v367_v16  ;;  %v220_v39 = vadd.f32 %v219_v37, %v369_v17 }
  0xd0   :  { %v148_v40 = vpop.f32.mrf.mxu0  ;;  %v221_v41 = vpop.f32.mrf.mxu1 }
  0xd1   :  { %256 = vst [vmem:[%s506_s3 + $0x40] sm:$0xff] %v147_v38  ;;  %258 = vst [vmem:[%s506_s3 + $0x50] sm:$0xff] %v220_v39  ;;  %v149_v42 = vadd.f32 %v148_v40, %v371_v18  ;;  %v222_v43 = vadd.f32 %v221_v41, %v373_v19 }
  0xd2   :  { %v150_v44 = vpop.f32.mrf.mxu0  ;;  %v223_v45 = vpop.f32.mrf.mxu1 }
  0xd3   :  { %257 = vst [vmem:[%s506_s3 + $0x48] sm:$0xff] %v149_v42  ;;  %259 = vst [vmem:[%s506_s3 + $0x58] sm:$0xff] %v222_v43  ;;  %v151_v46 = vadd.f32 %v150_v44, %v367_v16  ;;  %v224_v47 = vadd.f32 %v223_v45, %v369_v17 }
  0xd4   :  { %v152_v48 = vpop.f32.mrf.mxu0  ;;  %v225_v49 = vpop.f32.mrf.mxu1 }
  0xd5   :  { %260 = vst [vmem:[%s506_s3 + $0x60] sm:$0xff] %v151_v46  ;;  %262 = vst [vmem:[%s506_s3 + $0x70] sm:$0xff] %v224_v47  ;;  %v153_v50 = vadd.f32 %v152_v48, %v371_v18  ;;  %v226_v51 = vadd.f32 %v225_v49, %v373_v19 }
  0xd6   :  { %v156_v52 = vpop.f32.mrf.mxu0  ;;  %v229_v53 = vpop.f32.mrf.mxu1 }
  0xd7   :  { %261 = vst [vmem:[%s506_s3 + $0x68] sm:$0xff] %v153_v50  ;;  %263 = vst [vmem:[%s506_s3 + $0x78] sm:$0xff] %v226_v51  ;;  %v157_v54 = vadd.f32 %v156_v52, %v367_v16  ;;  %v230_v55 = vadd.f32 %v229_v53, %v369_v17 }
  0xd8   :  { %v158_v56 = vpop.f32.mrf.mxu0  ;;  %v231_v57 = vpop.f32.mrf.mxu1 }
  0xd9   :  { %264 = vst [vmem:[%s506_s3 + $0x80] sm:$0xff] %v157_v54  ;;  %266 = vst [vmem:[%s506_s3 + $0x90] sm:$0xff] %v230_v55  ;;  %v159_v58 = vadd.f32 %v158_v56, %v371_v18  ;;  %v232_v59 = vadd.f32 %v231_v57, %v373_v19 }
  0xda   :  { %v160_v60 = vpop.f32.mrf.mxu0  ;;  %v233_v61 = vpop.f32.mrf.mxu1 }
  0xdb   :  { %265 = vst [vmem:[%s506_s3 + $0x88] sm:$0xff] %v159_v58  ;;  %267 = vst [vmem:[%s506_s3 + $0x98] sm:$0xff] %v232_v59  ;;  %v161_v62 = vadd.f32 %v160_v60, %v367_v16  ;;  %v234_v63 = vadd.f32 %v233_v61, %v369_v17 }
  0xdc   :  { %v162_v0 = vpop.f32.mrf.mxu0  ;;  %v235_v1 = vpop.f32.mrf.mxu1 }
  0xdd   :  { %268 = vst [vmem:[%s506_s3 + $0xa0] sm:$0xff] %v161_v62  ;;  %270 = vst [vmem:[%s506_s3 + $0xb0] sm:$0xff] %v234_v63  ;;  %v163_v2 = vadd.f32 %v162_v0, %v371_v18  ;;  %v236_v3 = vadd.f32 %v235_v1, %v373_v19 }
  0xde   :  { %v166_v4 = vpop.f32.mrf.mxu0  ;;  %v239_v5 = vpop.f32.mrf.mxu1 }
  0xdf   :  { %269 = vst [vmem:[%s506_s3 + $0xa8] sm:$0xff] %v163_v2  ;;  %271 = vst [vmem:[%s506_s3 + $0xb8] sm:$0xff] %v236_v3  ;;  %v167_v6 = vadd.f32 %v166_v4, %v367_v16  ;;  %v240_v7 = vadd.f32 %v239_v5, %v369_v17 }
  0xe0   :  { %v168_v8 = vpop.f32.mrf.mxu0  ;;  %v241_v9 = vpop.f32.mrf.mxu1 }
  0xe1   :  { %272 = vst [vmem:[%s506_s3 + $0xc0] sm:$0xff] %v167_v6  ;;  %274 = vst [vmem:[%s506_s3 + $0xd0] sm:$0xff] %v240_v7  ;;  %v169_v10 = vadd.f32 %v168_v8, %v371_v18  ;;  %v242_v11 = vadd.f32 %v241_v9, %v373_v19 }
  0xe2   :  { %v170_v12 = vpop.f32.mrf.mxu0  ;;  %v243_v13 = vpop.f32.mrf.mxu1 }
  0xe3   :  { %273 = vst [vmem:[%s506_s3 + $0xc8] sm:$0xff] %v169_v10  ;;  %275 = vst [vmem:[%s506_s3 + $0xd8] sm:$0xff] %v242_v11  ;;  %v171_v14 = vadd.f32 %v170_v12, %v367_v16  ;;  %v244_v15 = vadd.f32 %v243_v13, %v369_v17 }
  0xe4   :  { %v172_v20 = vpop.f32.mrf.mxu0  ;;  %v245_v21 = vpop.f32.mrf.mxu1 }
  0xe5   :  { %276 = vst [vmem:[%s506_s3 + $0xe0] sm:$0xff] %v171_v14  ;;  %278 = vst [vmem:[%s506_s3 + $0xf0] sm:$0xff] %v244_v15  ;;  %v173_v22 = vadd.f32 %v172_v20, %v371_v18  ;;  %v246_v23 = vadd.f32 %v245_v21, %v373_v19 }
  0xe7   :  { %277 = vst [vmem:[%s506_s3 + $0xe8] sm:$0xff] %v173_v22  ;;  %279 = vst [vmem:[%s506_s3 + $0xf8] sm:$0xff] %v246_v23 }

// kernel: seq2seq_forward.7
= control target key start
LH: loop header
LB: loop body
LE: loop exit
PB: predicated region body
PF: predicated region fallthrough
CT: control target
= control target key end

     0   :  { %v532_v1 = vmov 0   ;;  %v57_v37 = vlaneseq  ;;  %s808_s1 = inlined_call_operand.vmem [shape: bf16[128,512], index: 1, kind: input, shape index: {}]   ;;  %s809_s0 = inlined_call_operand.vmem [shape: bf16[64,128], index: 0, kind: input, shape index: {}]   ;;  %s810_s2 = inlined_call_operand.vmem [shape: f32[1,512], index: 2, kind: input, shape index: {}]   ;;  %s811_s3 = inlined_call_operand.vmem [shape: f32[64,512], index: 3, kind: output, shape index: {}]  }
   0x1   :  { %v480_v0 = vld [vmem:[%s808_s1 + $0xe4] ss:$16 sps:$4 sm:$0xff]   ;;  %293 = vmatprep.mubr.bf16.mxu0 %v532_v1  ;;  %366 = vmatprep.mubr.bf16.mxu1 %v532_v1  ;;  %v482_v2 = vld [vmem:[%s808_s1 + $0xec] ss:$16 sps:$4 sm:$0xff]   ;;  %v484_v3 = vld [vmem:[%s808_s1 + $0xe0] ss:$16 sps:$4 sm:$0xff]  }
   0x2   :  { %261 = vmatprep.subr.bf16.mxu0 %v480_v0  ;;  %v485_v4 = vld [vmem:[%s808_s1 + $0xe8] ss:$16 sps:$4 sm:$0xff]   ;;  %334 = vmatprep.subr.bf16.mxu1 %v482_v2  ;;  %v486_v5 = vld [vmem:[%s808_s1 + $0xc4] ss:$16 sps:$4 sm:$0xff]   ;;  %v488_v6 = vld [vmem:[%s808_s1 + $0xcc] ss:$16 sps:$4 sm:$0xff]  }
   0x3   :  { %262 = vmatpush1.bf16.msra.mxu0 %v484_v3  ;;  %335 = vmatpush1.bf16.msra.mxu1 %v485_v4  ;;  %v490_v7 = vld [vmem:[%s808_s1 + $0xc0] ss:$16 sps:$4 sm:$0xff]   ;;  %v491_v8 = vld [vmem:[%s808_s1 + $0xc8] ss:$16 sps:$4 sm:$0xff]   ;;  %v492_v9 = vld [vmem:[%s808_s1 + $0xa4] ss:$16 sps:$4 sm:$0xff]  }
   0x4   :  { %263 = vmatprep.subr.bf16.mxu0 %v486_v5  ;;  %336 = vmatprep.subr.bf16.mxu1 %v488_v6  ;;  %v494_v10 = vld [vmem:[%s808_s1 + $0xac] ss:$16 sps:$4 sm:$0xff]   ;;  %v496_v11 = vld [vmem:[%s808_s1 + $0xa0] ss:$16 sps:$4 sm:$0xff]   ;;  %v497_v12 = vld [vmem:[%s808_s1 + $0xa8] ss:$16 sps:$4 sm:$0xff]  }
   0x5   :  { %v498_v13 = vld [vmem:[%s808_s1 + $0x84] ss:$16 sps:$4 sm:$0xff]   ;;  %v500_v14 = vld [vmem:[%s808_s1 + $0x8c] ss:$16 sps:$4 sm:$0xff]   ;;  %v502_v15 = vld [vmem:[%s808_s1 + $0x80] ss:$16 sps:$4 sm:$0xff]  }
   0x6   :  { %v503_v16 = vld [vmem:[%s808_s1 + $0x88] ss:$16 sps:$4 sm:$0xff]   ;;  %v504_v17 = vld [vmem:[%s808_s1 + $0x64] ss:$16 sps:$4 sm:$0xff]   ;;  %v506_v18 = vld [vmem:[%s808_s1 + $0x6c] ss:$16 sps:$4 sm:$0xff]  }
   0x7   :  { %264 = vmatpush1.bf16.msra.mxu0 %v490_v7  ;;  %337 = vmatpush1.bf16.msra.mxu1 %v491_v8  ;;  %v508_v19 = vld [vmem:[%s808_s1 + $0x60] ss:$16 sps:$4 sm:$0xff]   ;;  %v509_v20 = vld [vmem:[%s808_s1 + $0x68] ss:$16 sps:$4 sm:$0xff]   ;;  %v510_v21 = vld [vmem:[%s808_s1 + $0x44] ss:$16 sps:$4 sm:$0xff]  }
   0x8   :  { %265 = vmatprep.subr.bf16.mxu0 %v492_v9  ;;  %338 = vmatprep.subr.bf16.mxu1 %v494_v10  ;;  %v512_v22 = vld [vmem:[%s808_s1 + $0x4c] ss:$16 sps:$4 sm:$0xff]   ;;  %v514_v23 = vld [vmem:[%s808_s1 + $0x40] ss:$16 sps:$4 sm:$0xff]   ;;  %v515_v24 = vld [vmem:[%s808_s1 + $0x48] ss:$16 sps:$4 sm:$0xff]  }
   0x9   :  { %v516_v25 = vld [vmem:[%s808_s1 + $0x24] ss:$16 sps:$4 sm:$0xff]   ;;  %v518_v26 = vld [vmem:[%s808_s1 + $0x2c] ss:$16 sps:$4 sm:$0xff]   ;;  %v520_v27 = vld [vmem:[%s808_s1 + $0x20] ss:$16 sps:$4 sm:$0xff]  }
   0xa   :  { %v521_v28 = vld [vmem:[%s808_s1 + $0x28] ss:$16 sps:$4 sm:$0xff]   ;;  %v522_v29 = vld [vmem:[%s808_s1 + $0x4] ss:$16 sps:$4 sm:$0xff]   ;;  %v524_v30 = vld [vmem:[%s808_s1 + $0xc] ss:$16 sps:$4 sm:$0xff]  }
   0xb   :  { %266 = vmatpush1.bf16.msra.mxu0 %v496_v11  ;;  %339 = vmatpush1.bf16.msra.mxu1 %v497_v12  ;;  %v526_v31 = vld [vmem:[%s808_s1] ss:$16 sps:$4 sm:$0xff]   ;;  %v527_v32 = vld [vmem:[%s808_s1 + $0x8] ss:$16 sps:$4 sm:$0xff]   ;;  %v58_v38 = vshrl.u32 %v57_v37, 7 }
   0xc   :  { %267 = vmatprep.subr.bf16.mxu0 %v498_v13  ;;  %340 = vmatprep.subr.bf16.mxu1 %v500_v14  ;;  %v528_v33 = vld [vmem:[%s809_s0] sm:$0xff]   ;;  %v529_v34 = vld [vmem:[%s809_s0 + $0x8] sm:$0xff]   ;;  %v530_v35 = vld [vmem:[%s809_s0 + $0x10] sm:$0xff]  }
   0xd   :  { %v531_v36 = vld [vmem:[%s809_s0 + $0x18] sm:$0xff]   ;;  %v59_v39 = vsub.s32 0, %v58_v38  ;;  %v67_v40 = vsub.s32 2, %v58_v38  ;;  %v55_v41 = vld [vmem:[%s810_s2] sm:$0xf]  ;;  %v63_v42 = vsub.s32 1, %v58_v38 }
   0xe   :  { %v71_v43 = vsub.s32 3, %v58_v38 }
   0xf   :  { %268 = vmatpush1.bf16.msra.mxu0 %v502_v15  ;;  %341 = vmatpush1.bf16.msra.mxu1 %v503_v16  ;;  %v672_v44 = vrot.slane %v55_v41, %v59_v39  ;;  %v674_v45 = vrot.slane %v55_v41, %v67_v40  ;;  %v676_v46 = vrot.slane %v55_v41, %v63_v42 }
  0x10   :  { %269 = vmatprep.subr.bf16.mxu0 %v504_v17  ;;  %342 = vmatprep.subr.bf16.mxu1 %v506_v18  ;;  %v678_v47 = vrot.slane %v55_v41, %v71_v43 }
  0x13   :  { %270 = vmatpush1.bf16.msra.mxu0 %v508_v19  ;;  %343 = vmatpush1.bf16.msra.mxu1 %v509_v20 }
  0x14   :  { %271 = vmatprep.subr.bf16.mxu0 %v510_v21  ;;  %344 = vmatprep.subr.bf16.mxu1 %v512_v22 }
  0x17   :  { %272 = vmatpush1.bf16.msra.mxu0 %v514_v23  ;;  %345 = vmatpush1.bf16.msra.mxu1 %v515_v24 }
  0x18   :  { %273 = vmatprep.subr.bf16.mxu0 %v516_v25  ;;  %346 = vmatprep.subr.bf16.mxu1 %v518_v26 }
  0x1b   :  { %274 = vmatpush1.bf16.msra.mxu0 %v520_v27  ;;  %347 = vmatpush1.bf16.msra.mxu1 %v521_v28 }
  0x1c   :  { %275 = vmatprep.subr.bf16.mxu0 %v522_v29  ;;  %348 = vmatprep.subr.bf16.mxu1 %v524_v30 }
  0x1f   :  { %276 = vmatpush1.bf16.msra.mxu0 %v526_v31  ;;  %349 = vmatpush1.bf16.msra.mxu1 %v527_v32 }
  0x22   :  { %294 = vmatmul.mubr.bf16.vlgmr.msra.gmra.mxu0 %v528_v33  ;;  %367 = vmatmul.mubr.bf16.vlgmr.msra.gmra.mxu1 %v528_v33 }
  0x23   :  { %303 = vmatprep.mubr.bf16.mxu0 %v532_v1  ;;  %376 = vmatprep.mubr.bf16.mxu1 %v532_v1 }
  0x2a   :  { %304 = vmatmul.mubr.bf16.gmra.mxu0 %v529_v34  ;;  %377 = vmatmul.mubr.bf16.gmra.mxu1 %v529_v34 }
  0x2b   :  { %313 = vmatprep.mubr.bf16.mxu0 %v532_v1  ;;  %386 = vmatprep.mubr.bf16.mxu1 %v532_v1 }
  0x32   :  { %314 = vmatmul.mubr.bf16.gmra.mxu0 %v530_v35  ;;  %387 = vmatmul.mubr.bf16.gmra.mxu1 %v530_v35 }
  0x33   :  { %323 = vmatprep.mubr.bf16.mxu0 %v532_v1  ;;  %396 = vmatprep.mubr.bf16.mxu1 %v532_v1 }
  0x3a   :  { %324 = vmatmul.mubr.bf16.gmra.mxu0 %v531_v36  ;;  %397 = vmatmul.mubr.bf16.gmra.mxu1 %v531_v36 }
  0xe2   :  { %v295_v48 = vpop.f32.mrf.mxu0  ;;  %v368_v49 = vpop.f32.mrf.mxu1 }
  0xe3   :  { %v296_v50 = vadd.f32 %v295_v48, %v672_v44  ;;  %v369_v51 = vadd.f32 %v368_v49, %v674_v45 }
  0xe4   :  { %v297_v52 = vpop.f32.mrf.mxu0  ;;  %v370_v53 = vpop.f32.mrf.mxu1 }
  0xe5   :  { %407 = vst [vmem:[%s811_s3] sm:$0xff] %v296_v50  ;;  %409 = vst [vmem:[%s811_s3 + $0x10] sm:$0xff] %v369_v51  ;;  %v298_v54 = vadd.f32 %v297_v52, %v676_v46  ;;  %v371_v55 = vadd.f32 %v370_v53, %v678_v47 }
  0xe6   :  { %v299_v56 = vpop.f32.mrf.mxu0  ;;  %v372_v57 = vpop.f32.mrf.mxu1 }
  0xe7   :  { %408 = vst [vmem:[%s811_s3 + $0x8] sm:$0xff] %v298_v54  ;;  %410 = vst [vmem:[%s811_s3 + $0x18] sm:$0xff] %v371_v55  ;;  %v300_v58 = vadd.f32 %v299_v56, %v672_v44  ;;  %v373_v59 = vadd.f32 %v372_v57, %v674_v45 }
  0xe8   :  { %v301_v60 = vpop.f32.mrf.mxu0  ;;  %v374_v61 = vpop.f32.mrf.mxu1 }
  0xe9   :  { %411 = vst [vmem:[%s811_s3 + $0x20] sm:$0xff] %v300_v58  ;;  %413 = vst [vmem:[%s811_s3 + $0x30] sm:$0xff] %v373_v59  ;;  %v302_v62 = vadd.f32 %v301_v60, %v676_v46  ;;  %v375_v63 = vadd.f32 %v374_v61, %v678_v47 }
  0xea   :  { %v305_v0 = vpop.f32.mrf.mxu0  ;;  %v378_v1 = vpop.f32.mrf.mxu1 }
  0xeb   :  { %412 = vst [vmem:[%s811_s3 + $0x28] sm:$0xff] %v302_v62  ;;  %414 = vst [vmem:[%s811_s3 + $0x38] sm:$0xff] %v375_v63  ;;  %v306_v2 = vadd.f32 %v305_v0, %v672_v44  ;;  %v379_v3 = vadd.f32 %v378_v1, %v674_v45 }
  0xec   :  { %v307_v4 = vpop.f32.mrf.mxu0  ;;  %v380_v5 = vpop.f32.mrf.mxu1 }
  0xed   :  { %415 = vst [vmem:[%s811_s3 + $0x40] sm:$0xff] %v306_v2  ;;  %417 = vst [vmem:[%s811_s3 + $0x50] sm:$0xff] %v379_v3  ;;  %v308_v6 = vadd.f32 %v307_v4, %v676_v46  ;;  %v381_v7 = vadd.f32 %v380_v5, %v678_v47 }
  0xee   :  { %v309_v8 = vpop.f32.mrf.mxu0  ;;  %v382_v9 = vpop.f32.mrf.mxu1 }
  0xef   :  { %416 = vst [vmem:[%s811_s3 + $0x48] sm:$0xff] %v308_v6  ;;  %418 = vst [vmem:[%s811_s3 + $0x58] sm:$0xff] %v381_v7  ;;  %v310_v10 = vadd.f32 %v309_v8, %v672_v44  ;;  %v383_v11 = vadd.f32 %v382_v9, %v674_v45 }
  0xf0   :  { %v311_v12 = vpop.f32.mrf.mxu0  ;;  %v384_v13 = vpop.f32.mrf.mxu1 }
  0xf1   :  { %419 = vst [vmem:[%s811_s3 + $0x60] sm:$0xff] %v310_v10  ;;  %421 = vst [vmem:[%s811_s3 + $0x70] sm:$0xff] %v383_v11  ;;  %v312_v14 = vadd.f32 %v311_v12, %v676_v46  ;;  %v385_v15 = vadd.f32 %v384_v13, %v678_v47 }
  0xf2   :  { %v315_v16 = vpop.f32.mrf.mxu0  ;;  %v388_v17 = vpop.f32.mrf.mxu1 }
  0xf3   :  { %420 = vst [vmem:[%s811_s3 + $0x68] sm:$0xff] %v312_v14  ;;  %422 = vst [vmem:[%s811_s3 + $0x78] sm:$0xff] %v385_v15  ;;  %v316_v18 = vadd.f32 %v315_v16, %v672_v44  ;;  %v389_v19 = vadd.f32 %v388_v17, %v674_v45 }
  0xf4   :  { %v317_v20 = vpop.f32.mrf.mxu0  ;;  %v390_v21 = vpop.f32.mrf.mxu1 }
  0xf5   :  { %423 = vst [vmem:[%s811_s3 + $0x80] sm:$0xff] %v316_v18  ;;  %425 = vst [vmem:[%s811_s3 + $0x90] sm:$0xff] %v389_v19  ;;  %v318_v22 = vadd.f32 %v317_v20, %v676_v46  ;;  %v391_v23 = vadd.f32 %v390_v21, %v678_v47 }
  0xf6   :  { %v319_v24 = vpop.f32.mrf.mxu0  ;;  %v392_v25 = vpop.f32.mrf.mxu1 }
  0xf7   :  { %424 = vst [vmem:[%s811_s3 + $0x88] sm:$0xff] %v318_v22  ;;  %426 = vst [vmem:[%s811_s3 + $0x98] sm:$0xff] %v391_v23  ;;  %v320_v26 = vadd.f32 %v319_v24, %v672_v44  ;;  %v393_v27 = vadd.f32 %v392_v25, %v674_v45 }
  0xf8   :  { %v321_v28 = vpop.f32.mrf.mxu0  ;;  %v394_v29 = vpop.f32.mrf.mxu1 }
  0xf9   :  { %427 = vst [vmem:[%s811_s3 + $0xa0] sm:$0xff] %v320_v26  ;;  %429 = vst [vmem:[%s811_s3 + $0xb0] sm:$0xff] %v393_v27  ;;  %v322_v30 = vadd.f32 %v321_v28, %v676_v46  ;;  %v395_v31 = vadd.f32 %v394_v29, %v678_v47 }
  0xfa   :  { %v325_v32 = vpop.f32.mrf.mxu0  ;;  %v398_v33 = vpop.f32.mrf.mxu1 }
  0xfb   :  { %428 = vst [vmem:[%s811_s3 + $0xa8] sm:$0xff] %v322_v30  ;;  %430 = vst [vmem:[%s811_s3 + $0xb8] sm:$0xff] %v395_v31  ;;  %v326_v34 = vadd.f32 %v325_v32, %v672_v44  ;;  %v399_v35 = vadd.f32 %v398_v33, %v674_v45 }
  0xfc   :  { %v327_v36 = vpop.f32.mrf.mxu0  ;;  %v400_v37 = vpop.f32.mrf.mxu1 }
  0xfd   :  { %431 = vst [vmem:[%s811_s3 + $0xc0] sm:$0xff] %v326_v34  ;;  %433 = vst [vmem:[%s811_s3 + $0xd0] sm:$0xff] %v399_v35  ;;  %v328_v38 = vadd.f32 %v327_v36, %v676_v46  ;;  %v401_v39 = vadd.f32 %v400_v37, %v678_v47 }
  0xfe   :  { %v329_v40 = vpop.f32.mrf.mxu0  ;;  %v402_v41 = vpop.f32.mrf.mxu1 }
  0xff   :  { %432 = vst [vmem:[%s811_s3 + $0xc8] sm:$0xff] %v328_v38  ;;  %434 = vst [vmem:[%s811_s3 + $0xd8] sm:$0xff] %v401_v39  ;;  %v330_v42 = vadd.f32 %v329_v40, %v672_v44  ;;  %v403_v43 = vadd.f32 %v402_v41, %v674_v45 }
 0x100   :  { %v331_v48 = vpop.f32.mrf.mxu0  ;;  %v404_v49 = vpop.f32.mrf.mxu1 }
 0x101   :  { %435 = vst [vmem:[%s811_s3 + $0xe0] sm:$0xff] %v330_v42  ;;  %437 = vst [vmem:[%s811_s3 + $0xf0] sm:$0xff] %v403_v43  ;;  %v332_v50 = vadd.f32 %v331_v48, %v676_v46  ;;  %v405_v51 = vadd.f32 %v404_v49, %v678_v47 }
 0x103   :  { %436 = vst [vmem:[%s811_s3 + $0xe8] sm:$0xff] %v332_v50  ;;  %438 = vst [vmem:[%s811_s3 + $0xf8] sm:$0xff] %v405_v51 }

// kernel: seq2seq_forward.8
= control target key start
LH: loop header
LB: loop body
LE: loop exit
PB: predicated region body
PF: predicated region fallthrough
CT: control target
= control target key end

     0   :  { %v3185_v2 = vmov 0   ;;  %s4004_s0 = inlined_call_operand.vmem [shape: f32[8,8,512], index: 0, kind: input, shape index: {}]   ;;  %s4005_s1 = inlined_call_operand.vmem [shape: bf16[128,512], index: 1, kind: input, shape index: {}]   ;;  %s4006_s2 = inlined_call_operand.vmem [shape: s32[8,1], index: 2, kind: input, shape index: {}]   ;;  %s4007_s3 = inlined_call_operand.hbm [shape: bf16[8,8,128], index: 3, kind: output, shape index: {0}]   ;;  %s4008_s4 = inlined_call_operand.vmem [shape: f32[8,128], index: 4, kind: output, shape index: {1}]   ;;  %s4009_s5 = inlined_call_operand.vmem [shape: f32[8,128], index: 5, kind: output, shape index: {2}]  }
   0x1   :  { %v3223_v0 = vld [vmem:[%s4005_s1 + $0xe4] ss:$16 sps:$4 sm:$0xff]   ;;  %v3228_v1 = vld [vmem:[%s4005_s1 + $0xe0] ss:$16 sps:$4 sm:$0xff]   ;;  %258 = vmatprep.mubr.bf16.mxu0 %v3185_v2  ;;  %299 = vmatprep.mubr.bf16.mxu1 %v3185_v2  ;;  %v3255_v6 = vld [vmem:[%s4005_s1 + $0xec] ss:$16 sps:$4 sm:$0xff]  }
   0x2   :  { %226 = vmatprep.subr.bf16.mxu0 %v3223_v0  ;;  %v3236_v3 = vld [vmem:[%s4005_s1 + $0xc4] ss:$16 sps:$4 sm:$0xff]   ;;  %2937 = vset.pattern.permute.xlu0 %v3185_v2  ;;  %v3243_v4 = vld [vmem:[%s4005_s1 + $0xc0] ss:$16 sps:$4 sm:$0xff]   ;;  %v3260_v7 = vld [vmem:[%s4005_s1 + $0xe8] ss:$16 sps:$4 sm:$0xff]  }
   0x3   :  { %227 = vmatpush1.bf16.msra.mxu0 %v3228_v1  ;;  %2938 = vset.pattern.permute.xlu1 %v3185_v2  ;;  %v3250_v5 = vld [vmem:[%s4005_s1 + $0xa4] ss:$16 sps:$4 sm:$0xff]   ;;  %v3266_v8 = vld [vmem:[%s4005_s1 + $0xa0] ss:$16 sps:$4 sm:$0xff]   ;;  %v3279_v10 = vld [vmem:[%s4005_s1 + $0xcc] ss:$16 sps:$4 sm:$0xff]  }
   0x4   :  { %228 = vmatprep.subr.bf16.mxu0 %v3236_v3  ;;  %267 = vmatprep.subr.bf16.mxu1 %v3255_v6  ;;  %v3273_v9 = vld [vmem:[%s4005_s1 + $0x84] ss:$16 sps:$4 sm:$0xff]   ;;  %v3284_v11 = vld [vmem:[%s4005_s1 + $0xc8] ss:$16 sps:$4 sm:$0xff]   ;;  %v3291_v12 = vld [vmem:[%s4005_s1 + $0x80] ss:$16 sps:$4 sm:$0xff]  }
   0x5   :  { %268 = vmatpush1.bf16.msra.mxu1 %v3260_v7  ;;  %v3296_v13 = vld [vmem:[%s4005_s1 + $0x64] ss:$16 sps:$4 sm:$0xff]   ;;  %v3301_v14 = vld [vmem:[%s4005_s1 + $0xac] ss:$16 sps:$4 sm:$0xff]   ;;  %v3308_v15 = vld [vmem:[%s4005_s1 + $0xa8] ss:$16 sps:$4 sm:$0xff]  }
   0x6   :  { %269 = vmatprep.subr.bf16.mxu1 %v3279_v10  ;;  %v3314_v16 = vld [vmem:[%s4005_s1 + $0x8c] ss:$16 sps:$4 sm:$0xff]   ;;  %v3320_v17 = vld [vmem:[%s4005_s1 + $0x60] ss:$16 sps:$4 sm:$0xff]   ;;  %v3326_v18 = vld [vmem:[%s4005_s1 + $0x44] ss:$16 sps:$4 sm:$0xff]  }
   0x7   :  { %229 = vmatpush1.bf16.msra.mxu0 %v3243_v4  ;;  %v3332_v19 = vld [vmem:[%s4005_s1 + $0x88] ss:$16 sps:$4 sm:$0xff]   ;;  %v3338_v20 = vld [vmem:[%s4005_s1 + $0x6c] ss:$16 sps:$4 sm:$0xff]   ;;  %v3344_v21 = vld [vmem:[%s4005_s1 + $0x40] ss:$16 sps:$4 sm:$0xff]  }
   0x8   :  { %230 = vmatprep.subr.bf16.mxu0 %v3250_v5  ;;  %v3349_v22 = vld [vmem:[%s4005_s1 + $0x24] ss:$16 sps:$4 sm:$0xff]   ;;  %v3356_v23 = vld [vmem:[%s4005_s1 + $0x68] ss:$16 sps:$4 sm:$0xff]   ;;  %v3361_v24 = vld [vmem:[%s4005_s1 + $0x20] ss:$16 sps:$4 sm:$0xff]  }
   0x9   :  { %270 = vmatpush1.bf16.msra.mxu1 %v3284_v11  ;;  %v3367_v25 = vld [vmem:[%s4005_s1 + $0x4c] ss:$16 sps:$4 sm:$0xff]   ;;  %v3372_v26 = vld [vmem:[%s4006_s2] sm:$0xff]  ;;  %v3382_v28 = vld [vmem:[%s4005_s1 + $0x48] ss:$16 sps:$4 sm:$0xff]  }
   0xa   :  { %271 = vmatprep.subr.bf16.mxu1 %v3301_v14  ;;  %v3377_v27 = vld [vmem:[%s4005_s1 + $0x4] ss:$16 sps:$4 sm:$0xff]   ;;  %vm337_vm0 = vcmp.gt.s32.totalorder %v3372_v26, 0  ;;  %v3389_v29 = vld [vmem:[%s4005_s1 + $0x2c] ss:$16 sps:$4 sm:$0xff]   ;;  %vm656_vm1 = vcmp.gt.s32.totalorder %v3372_v26, 1 }
   0xb   :  { %231 = vmatpush1.bf16.msra.mxu0 %v3266_v8  ;;  %v338_v30 = vsel %vm337_vm0, 1, %v3185_v2  ;;  %v3398_v31 = vld [vmem:[%s4005_s1] ss:$16 sps:$4 sm:$0xff]   ;;  %v3404_v32 = vld [vmem:[%s4005_s1 + $0x28] ss:$16 sps:$4 sm:$0xff]   ;;  %v657_v33 = vsel %vm656_vm1, 1, %v3185_v2 }
   0xc   :  { %232 = vmatprep.subr.bf16.mxu0 %v3273_v9  ;;  %340 = vperm.xlu0 %2937, %v338_v30   ;;  %v3411_v34 = vld [vmem:[%s4005_s1 + $0xc] ss:$16 sps:$4 sm:$0xff]   ;;  %vm1616_vm2 = vcmp.gt.s32.totalorder %v3372_v26, 4  ;;  %v3420_v35 = vld [vmem:[%s4005_s1 + $0x8] ss:$16 sps:$4 sm:$0xff]   ;;  %vm2256_vm3 = vcmp.gt.s32.totalorder %v3372_v26, 6 }
   0xd   :  { %272 = vmatpush1.bf16.msra.mxu1 %v3308_v15  ;;  %v1617_v36 = vsel %vm1616_vm2, 1, %v3185_v2 }
   0xe   :  { %273 = vmatprep.subr.bf16.mxu1 %v3314_v16 }
   0xf   :  { %233 = vmatpush1.bf16.msra.mxu0 %v3291_v12 }
  0x10   :  { %234 = vmatprep.subr.bf16.mxu0 %v3296_v13  ;;  %659 = vperm.xlu0 %2937, %v657_v33  }
  0x11   :  { %274 = vmatpush1.bf16.msra.mxu1 %v3332_v19 }
  0x12   :  { %275 = vmatprep.subr.bf16.mxu1 %v3338_v20 }
  0x13   :  { %235 = vmatpush1.bf16.msra.mxu0 %v3320_v17 }
  0x14   :  { %236 = vmatprep.subr.bf16.mxu0 %v3326_v18  ;;  %1619 = vperm.xlu0 %2937, %v1617_v36  }
  0x15   :  { %276 = vmatpush1.bf16.msra.mxu1 %v3356_v23 }
  0x16   :  { %277 = vmatprep.subr.bf16.mxu1 %v3367_v25 }
  0x17   :  { %237 = vmatpush1.bf16.msra.mxu0 %v3344_v21 }
  0x18   :  { %238 = vmatprep.subr.bf16.mxu0 %v3349_v22 }
  0x19   :  { %278 = vmatpush1.bf16.msra.mxu1 %v3382_v28 }
  0x1a   :  { %279 = vmatprep.subr.bf16.mxu1 %v3389_v29 }
  0x1b   :  { %239 = vmatpush1.bf16.msra.mxu0 %v3361_v24 }
  0x1c   :  { %240 = vmatprep.subr.bf16.mxu0 %v3377_v27 }
  0x1d   :  { %280 = vmatpush1.bf16.msra.mxu1 %v3404_v32 }
  0x1e   :  { %281 = vmatprep.subr.bf16.mxu1 %v3411_v34 }
  0x1f   :  { %241 = vmatpush1.bf16.msra.mxu0 %v3398_v31 }
  0x20   :  { %545 = vmatprep.subr.bf16.mxu0 %v3223_v0 }
  0x21   :  { %11 = vsyncpa [#allocation5], 0  ;;  %v3186_v37 = vmov 0.0|0.0   ;;  %v2257_v38 = vsel %vm2256_vm3, 1, %v3185_v2  ;;  %282 = vmatpush1.bf16.msra.mxu1 %v3420_v35  ;;  %v29_v39 = vld [vmem:[%s4004_s0] sm:$0xff]  ;;  %v30_v41 = vld [vmem:[%s4004_s0 + $0x8] sm:$0xff] }
  0x22   :  { %259 = vmatmul.mubr.bf16.vlgmr.msra.gmra.mxu0 %v3186_v37  ;;  %2259 = vperm.xlu0 %2937, %v2257_v38   ;;  %v32_v51 = vld [vmem:[%s4004_s0 + $0x18] sm:$0xff]  ;;  %v31_v54 = vld [vmem:[%s4004_s0 + $0x10] sm:$0xff]  ;;  %vm976_vm6 = vcmp.gt.s32.totalorder %v3372_v26, 2  ;;  %vm1296_vm7 = vcmp.gt.s32.totalorder %v3372_v26, 3  ;;  %vm1936_vm8 = vcmp.gt.s32.totalorder %v3372_v26, 5  ;;  %vm2576_vm9 = vcmp.gt.s32.totalorder %v3372_v26, 7 }
  0x23   :  { %546 = vmatpush1.bf16.msra.mxu0 %v3228_v1  ;;  %577 = vmatprep.mubr.bf16.mxu0 %v3185_v2  ;;  %s3187_s30 = smov [#allocation4]  }
  0x24   :  { %547 = vmatprep.subr.bf16.mxu0 %v3236_v3  ;;  %586 = vmatprep.subr.bf16.mxu1 %v3255_v6  ;;  %s2599_s6 = sshll.u32 %s3187_s30, 4  ;;  %s2600_s6 = int_to_ptr.vmem [resolvable:$true] %s2599_s6 }
  0x25   :  { %300 = vmatmul.mubr.bf16.vlgmr.msra.gmra.mxu1 %v3186_v37  ;;  %s3163_s9 = scalar_lea.vmem %s2600_s6, 512  ;;  %p3168_p1 = scmp.lt.s32.totalorder %s2600_s6, %s2600_s6 }
  0x26   :  { %587 = vmatpush1.bf16.msra.mxu1 %v3260_v7  ;;  %618 = vmatprep.mubr.bf16.mxu1 %v3185_v2  ;;  %p3164_p0 = scmp.ne.s32.totalorder %s2600_s6, %s3163_s9  ;;  %p3169_p2 = scmp.lt.s32.totalorder %s3163_s9, %s3163_s9 }
  0x27   :  { %548 = vmatpush1.bf16.msra.mxu0 %v3243_v4  ;;  %588 = vmatprep.subr.bf16.mxu1 %v3279_v10 }
  0x28   :  { %549 = vmatprep.subr.bf16.mxu0 %v3250_v5  ;;  %p3170_p3 = por %p3169_p2, %p3168_p1 }
  0x2a   :  { %589 = vmatpush1.bf16.msra.mxu1 %v3284_v11  ;;  %p3171_p4 = pnand %p3170_p3, %p3164_p0 }
  0x2b   :  { %550 = vmatpush1.bf16.msra.mxu0 %v3266_v8  ;;  %590 = vmatprep.subr.bf16.mxu1 %v3301_v14 }
  0x2c   :  { %551 = vmatprep.subr.bf16.mxu0 %v3273_v9 }
  0x2e   :  { %591 = vmatpush1.bf16.msra.mxu1 %v3308_v15 }
  0x2f   :  { %552 = vmatpush1.bf16.msra.mxu0 %v3291_v12  ;;  %592 = vmatprep.subr.bf16.mxu1 %v3314_v16 }
  0x30   :  { %553 = vmatprep.subr.bf16.mxu0 %v3296_v13 }
  0x32   :  { %593 = vmatpush1.bf16.msra.mxu1 %v3332_v19 }
  0x33   :  { %554 = vmatpush1.bf16.msra.mxu0 %v3320_v17  ;;  %594 = vmatprep.subr.bf16.mxu1 %v3338_v20 }
  0x34   :  { %555 = vmatprep.subr.bf16.mxu0 %v3326_v18 }
  0x36   :  { %595 = vmatpush1.bf16.msra.mxu1 %v3356_v23 }
  0x37   :  { %556 = vmatpush1.bf16.msra.mxu0 %v3344_v21  ;;  %596 = vmatprep.subr.bf16.mxu1 %v3367_v25 }
  0x38   :  { %557 = vmatprep.subr.bf16.mxu0 %v3349_v22 }
  0x3a   :  { %597 = vmatpush1.bf16.msra.mxu1 %v3382_v28 }
  0x3b   :  { %558 = vmatpush1.bf16.msra.mxu0 %v3361_v24  ;;  %598 = vmatprep.subr.bf16.mxu1 %v3389_v29 }
  0x3c   :  { %559 = vmatprep.subr.bf16.mxu0 %v3377_v27 }
  0x3e   :  { %599 = vmatpush1.bf16.msra.mxu1 %v3404_v32 }
  0x3f   :  { %560 = vmatpush1.bf16.msra.mxu0 %v3398_v31  ;;  %600 = vmatprep.subr.bf16.mxu1 %v3411_v34 }
  0x40   :  { %865 = vmatprep.subr.bf16.mxu0 %v3223_v0 }
  0x42   :  { %601 = vmatpush1.bf16.msra.mxu1 %v3420_v35 }
  0x43   :  { %906 = vmatprep.subr.bf16.mxu1 %v3255_v6 }
  0xe2   :  { %v260_v40 = vpop.f32.mrf.mxu0 }
  0xe3   :  { %v308_v42 = vadd.f32 %v260_v40, %v29_v39  ;;  %v3480_v40 = vpop.permute.xlu0 %340 }
  0xe4   :  { %v262_v43 = vpop.f32.mrf.mxu0  ;;  %vm342_vm4 = vcmp.eq.s32.totalorder %v3480_v40, 1 }
  0xe5   :  { %v2650_v44 = vmul.f32 -1.442695, %v308_v42  ;;  %v309_v45 = vadd.f32 %v262_v43, %v30_v41  ;;  %v301_v48 = vpop.f32.mrf.mxu1  ;;  %vm2926_vm5 = vmpackc.low %vm342_vm4, %vm342_vm4 }
  0xe6   :  { %v264_v46 = vpop.f32.mrf.mxu0  ;;  %v310_v56 = vadd.f32 %v301_v48, %v31_v54  ;;  %v1297_v48 = vsel %vm1296_vm7, 1, %v3185_v2 }
  0xe7   :  { %3035 = vpow2.f32 %v2650_v44  ;;  %v2651_v47 = vmul.f32 -1.442695, %v309_v45  ;;  %v303_v50 = vpop.f32.mrf.mxu1 }
  0xe8   :  { %v265_v49 = vpop.f32.mrf.mxu0  ;;  %v311_v55 = vadd.f32 %v303_v50, %v32_v51 }
  0xe9   :  { %3037 = vpow2.f32 %v2651_v47  ;;  %v305_v52 = vpop.f32.mrf.mxu1  ;;  %v977_v47 = vsel %vm976_vm6, 1, %v3185_v2  ;;  %v1937_v49 = vsel %vm1936_vm8, 1, %v3185_v2 }
  0xea   :  { %v2652_v57 = vmul.f32 -1.442695, %v311_v55  ;;  %3039 = vtanh.f32 %v310_v56  ;;  %979 = vperm.xlu1 %2938, %v977_v47   ;;  %v2654_v52 = vld [vmem:[%s4004_s0 + $0x28] sm:$0xff] }
  0xeb   :  { %v306_v53 = vpop.f32.mrf.mxu1 }
  0xec   :  { %3041 = vpow2.f32 %v2652_v57 }
  0xee   :  { %1299 = vperm.xlu1 %2938, %v1297_v48  }
  0xf2   :  { %1939 = vperm.xlu1 %2938, %v1937_v49  }
  0xf4   :  { %v3036_v58 = vpop.eup %3035 }
  0xf5   :  { %v315_v59 = vadd.f32 1.0, %v3036_v58 }
  0xf6   :  { %v3038_v60 = vpop.eup %3037 }
  0xf7   :  { %3043 = vrcp.f32 %v315_v59  ;;  %v321_v61 = vadd.f32 1.0, %v3038_v60  ;;  %v3040_v62 = vpop.eup %3039 }
  0xf9   :  { %3045 = vrcp.f32 %v321_v61  ;;  %v3042_v63 = vpop.eup %3041 }
  0xfa   :  { %v328_v36 = vadd.f32 1.0, %v3042_v63 }
  0xfc   :  { %3047 = vrcp.f32 %v328_v36 }
 0x104   :  { %v3044_v30 = vpop.eup %3043 }
 0x105   :  { %v332_v38 = vmul.f32 %v3044_v30, %v3040_v62  ;;  %v2656_v62 = vld [vmem:[%s4004_s0 + $0x38] sm:$0xff]  ;;  %v2655_v30 = vld [vmem:[%s4004_s0 + $0x30] sm:$0xff] }
 0x106   :  { %v3046_v33 = vpop.eup %3045 }
 0x107   :  { %v331_v37 = vmul.f32 0.0, %v3046_v33 }
 0x109   :  { %v3477_v39 = vadd.f32 %v332_v38, %v331_v37  ;;  %v3048_v41 = vpop.eup %3047 }
 0x10b   :  { %3049 = vtanh.f32 %v3477_v39  ;;  %v344_v48 = vsel %vm342_vm4, %v3477_v39, 0.0 }
 0x118   :  { %v3050_v42 = vpop.eup %3049 }
 0x119   :  { %v335_v43 = vmul.f32 %v3050_v42, %v3048_v41 }
 0x11b   :  { %v2927_v44 = vpack.c.bf16 %v335_v43, %v335_v43  ;;  %v3488_v45 = vsel %vm342_vm4, %v335_v43, 0.0 }
 0x11c   :  { %v345_v46 = vpack.c.bf16 %v3488_v45, %v3488_v45 }
 0x11d   :  { %2928 = vmatmul.mubr.msk.bf16.vlgmr.msra.gmra.mxu0 %vm2926_vm5, %v2927_v44  ;;  %2931 = vmatmul.mubr.msk.bf16.vlgmr.msra.gmra.mxu1 %vm2926_vm5, %v2927_v44 }
 0x11e   :  { %346 = vst [vmem:[#allocation4] sm:$0xf] %v345_v46  ;;  %866 = vmatpush1.bf16.msra.mxu0 %v3228_v1  ;;  %907 = vmatpush1.bf16.msra.mxu1 %v3260_v7 }
 0x11f   :  { %867 = vmatprep.subr.bf16.mxu0 %v3236_v3  ;;  %908 = vmatprep.subr.bf16.mxu1 %v3279_v10 }
 0x120   :  { %897 = vmatprep.mubr.bf16.mxu0 %v3185_v2  ;;  %938 = vmatprep.mubr.bf16.mxu1 %v3185_v2 }
 0x122   :  { %868 = vmatpush1.bf16.msra.mxu0 %v3243_v4  ;;  %909 = vmatpush1.bf16.msra.mxu1 %v3284_v11 }
 0x123   :  { %869 = vmatprep.subr.bf16.mxu0 %v3250_v5  ;;  %910 = vmatprep.subr.bf16.mxu1 %v3301_v14 }
 0x126   :  { %870 = vmatpush1.bf16.msra.mxu0 %v3266_v8  ;;  %911 = vmatpush1.bf16.msra.mxu1 %v3308_v15 }
 0x127   :  { %871 = vmatprep.subr.bf16.mxu0 %v3273_v9  ;;  %912 = vmatprep.subr.bf16.mxu1 %v3314_v16 }
 0x12a   :  { %872 = vmatpush1.bf16.msra.mxu0 %v3291_v12  ;;  %913 = vmatpush1.bf16.msra.mxu1 %v3332_v19 }
 0x12b   :  { %873 = vmatprep.subr.bf16.mxu0 %v3296_v13  ;;  %914 = vmatprep.subr.bf16.mxu1 %v3338_v20 }
 0x12e   :  { %874 = vmatpush1.bf16.msra.mxu0 %v3320_v17  ;;  %915 = vmatpush1.bf16.msra.mxu1 %v3356_v23 }
 0x12f   :  { %875 = vmatprep.subr.bf16.mxu0 %v3326_v18  ;;  %916 = vmatprep.subr.bf16.mxu1 %v3367_v25 }
 0x132   :  { %876 = vmatpush1.bf16.msra.mxu0 %v3344_v21  ;;  %917 = vmatpush1.bf16.msra.mxu1 %v3382_v28 }
 0x133   :  { %877 = vmatprep.subr.bf16.mxu0 %v3349_v22  ;;  %918 = vmatprep.subr.bf16.mxu1 %v3389_v29 }
 0x136   :  { %878 = vmatpush1.bf16.msra.mxu0 %v3361_v24  ;;  %919 = vmatpush1.bf16.msra.mxu1 %v3404_v32 }
 0x137   :  { %879 = vmatprep.subr.bf16.mxu0 %v3377_v27  ;;  %920 = vmatprep.subr.bf16.mxu1 %v3411_v34 }
 0x13a   :  { %880 = vmatpush1.bf16.msra.mxu0 %v3398_v31  ;;  %921 = vmatpush1.bf16.msra.mxu1 %v3420_v35 }
 0x13b   :  { %1185 = vmatprep.subr.bf16.mxu0 %v3223_v0  ;;  %1226 = vmatprep.subr.bf16.mxu1 %v3255_v6  ;;  %v2577_v0 = vsel %vm2576_vm9, 1, %v3185_v2  ;;  %v2653_v6 = vld [vmem:[%s4004_s0 + $0x20] sm:$0xff] }
 0x13c   :  { %2579 = vperm.xlu1 %2938, %v2577_v0  }
 0x1dd   :  { %v579_v50 = vpop.f32.mrf.mxu0  ;;  %v620_v51 = vpop.f32.mrf.mxu1 }
 0x1de   :  { %v627_v53 = vadd.f32 %v2653_v6, %v579_v50  ;;  %v629_v37 = vadd.f32 %v2655_v30, %v620_v51  ;;  %v660_v50 = vpop.permute.xlu0 %659  ;;  %v3624_v30 = vld [vmem:[%s4005_s1 + $0xe0] ss:$16 sps:$4 sm:$0xff]  }
 0x1df   :  { %v581_v54 = vpop.f32.mrf.mxu0  ;;  %v622_v55 = vpop.f32.mrf.mxu1  ;;  %vm661_vm10 = vcmp.eq.s32.totalorder %v660_v50, 1  ;;  %v3715_v50 = vld [vmem:[%s4005_s1 + $0x60] ss:$16 sps:$4 sm:$0xff]  }
 0x1e0   :  { %v2689_v56 = vmul.f32 -1.442695, %v627_v53  ;;  %v628_v57 = vadd.f32 %v2654_v52, %v581_v54  ;;  %v630_v63 = vadd.f32 %v2656_v62, %v622_v55  ;;  %v3614_v62 = vld [vmem:[%s4005_s1 + $0xe4] ss:$16 sps:$4 sm:$0xff]  }
 0x1e1   :  { %v583_v26 = vpop.f32.mrf.mxu0  ;;  %v624_v58 = vpop.f32.mrf.mxu1 }
 0x1e2   :  { %3051 = vpow2.f32 %v2689_v56  ;;  %v2690_v59 = vmul.f32 -1.442695, %v628_v57  ;;  %v2691_v33 = vmul.f32 -1.442695, %v630_v63  ;;  %v3619_v63 = vld [vmem:[%s4005_s1 + $0xec] ss:$16 sps:$4 sm:$0xff]  }
 0x1e3   :  { %v584_v60 = vpop.f32.mrf.mxu0  ;;  %v625_v61 = vpop.f32.mrf.mxu1 }
 0x1e4   :  { %3053 = vpow2.f32 %v2690_v59 }
 0x1e5   :  { %3055 = vpow2.f32 %v2691_v33  ;;  %v3629_v33 = vld [vmem:[%s4005_s1 + $0xe8] ss:$16 sps:$4 sm:$0xff]  }
 0x1ef   :  { %v3052_v36 = vpop.eup %3051 }
 0x1f0   :  { %v634_v38 = vadd.f32 1.0, %v3052_v36  ;;  %v3638_v36 = vld [vmem:[%s4005_s1 + $0xc4] ss:$16 sps:$4 sm:$0xff]  }
 0x1f1   :  { %v3054_v41 = vpop.eup %3053 }
 0x1f2   :  { %3057 = vrcp.f32 %v634_v38  ;;  %v640_v42 = vadd.f32 1.0, %v3054_v41  ;;  %v3056_v43 = vpop.eup %3055  ;;  %v3648_v38 = vld [vmem:[%s4005_s1 + $0xc0] ss:$16 sps:$4 sm:$0xff]   ;;  %v3653_v41 = vld [vmem:[%s4005_s1 + $0xc8] ss:$16 sps:$4 sm:$0xff]  }
 0x1f3   :  { %3059 = vtanh.f32 %v629_v37  ;;  %v647_v49 = vadd.f32 1.0, %v3056_v43  ;;  %v3643_v37 = vld [vmem:[%s4005_s1 + $0xcc] ss:$16 sps:$4 sm:$0xff]  }
 0x1f4   :  { %3061 = vrcp.f32 %v640_v42  ;;  %v3662_v42 = vld [vmem:[%s4005_s1 + $0xa4] ss:$16 sps:$4 sm:$0xff]   ;;  %v3667_v43 = vld [vmem:[%s4005_s1 + $0xac] ss:$16 sps:$4 sm:$0xff]  }
 0x1f5   :  { %3063 = vrcp.f32 %v647_v49  ;;  %v3696_v49 = vld [vmem:[%s4005_s1 + $0x80] ss:$16 sps:$4 sm:$0xff]  }
 0x1ff   :  { %v3058_v44 = vpop.eup %3057 }
 0x200   :  { %v3060_v46 = vpop.eup %3059 }
 0x201   :  { %v3062_v47 = vpop.eup %3061  ;;  %v651_v0 = vmul.f32 %v3060_v46, %v3058_v44  ;;  %v3672_v44 = vld [vmem:[%s4005_s1 + $0xa0] ss:$16 sps:$4 sm:$0xff]   ;;  %v3677_v46 = vld [vmem:[%s4005_s1 + $0xa8] ss:$16 sps:$4 sm:$0xff]  }
 0x202   :  { %v650_v6 = vmul.f32 %v3062_v47, %v344_v48  ;;  %v3064_v53 = vpop.eup %3063  ;;  %v3686_v47 = vld [vmem:[%s4005_s1 + $0x84] ss:$16 sps:$4 sm:$0xff]  }
 0x204   :  { %v652_v51 = vadd.f32 %v651_v0, %v650_v6  ;;  %v3701_v0 = vld [vmem:[%s4005_s1 + $0x88] ss:$16 sps:$4 sm:$0xff]   ;;  %v3708_v6 = vld [vmem:[%s4005_s1 + $0x64] ss:$16 sps:$4 sm:$0xff]  }
 0x206   :  { %3065 = vtanh.f32 %v652_v51  ;;  %v3549_v52 = vsel %vm661_vm10, %v652_v51, %v344_v48  ;;  %v3691_v48 = vld [vmem:[%s4005_s1 + $0x8c] ss:$16 sps:$4 sm:$0xff]   ;;  %v3720_v51 = vld [vmem:[%s4005_s1 + $0x68] ss:$16 sps:$4 sm:$0xff]  }
 0x213   :  { %v3066_v54 = vpop.eup %3065 }
 0x214   :  { %v654_v55 = vmul.f32 %v3066_v54, %v3064_v53  ;;  %v3731_v53 = vld [vmem:[%s4005_s1 + $0x44] ss:$16 sps:$4 sm:$0xff]   ;;  %v3736_v54 = vld [vmem:[%s4005_s1 + $0x4c] ss:$16 sps:$4 sm:$0xff]  }
 0x216   :  { %v3552_v56 = vsel %vm661_vm10, %v654_v55, %v3488_v45  ;;  %v3744_v55 = vld [vmem:[%s4005_s1 + $0x40] ss:$16 sps:$4 sm:$0xff]  }
 0x217   :  { %v664_v40 = vpack.c.bf16 %v3552_v56, %v3552_v56 }
 0x219   :  { %666 = vst [vmem:[#allocation4 + $0x4] sm:$0xf] %v664_v40  ;;  %898 = vmatmul.mubr.bf16.vlgmr.msra.gmra.mxu0 %v664_v40  ;;  %939 = vmatmul.mubr.bf16.vlgmr.msra.gmra.mxu1 %v664_v40  ;;  %v3756_v40 = vld [vmem:[%s4005_s1 + $0x24] ss:$16 sps:$4 sm:$0xff]  }
 0x21a   :  { %1186 = vmatpush1.bf16.msra.mxu0 %v3228_v1  ;;  %1227 = vmatpush1.bf16.msra.mxu1 %v3260_v7  ;;  %v2692_v1 = vld [vmem:[%s4004_s0 + $0x40] sm:$0xff] }
 0x21b   :  { %1187 = vmatprep.subr.bf16.mxu0 %v3236_v3  ;;  %1228 = vmatprep.subr.bf16.mxu1 %v3279_v10 }
 0x21c   :  { %1217 = vmatprep.mubr.bf16.mxu0 %v3185_v2  ;;  %1258 = vmatprep.mubr.bf16.mxu1 %v3185_v2 }
 0x21e   :  { %1188 = vmatpush1.bf16.msra.mxu0 %v3243_v4  ;;  %1229 = vmatpush1.bf16.msra.mxu1 %v3284_v11 }
 0x21f   :  { %1189 = vmatprep.subr.bf16.mxu0 %v3250_v5  ;;  %1230 = vmatprep.subr.bf16.mxu1 %v3301_v14  ;;  %v2693_v5 = vld [vmem:[%s4004_s0 + $0x48] sm:$0xff] }
 0x222   :  { %1190 = vmatpush1.bf16.msra.mxu0 %v3266_v8  ;;  %1231 = vmatpush1.bf16.msra.mxu1 %v3308_v15 }
 0x223   :  { %1191 = vmatprep.subr.bf16.mxu0 %v3273_v9  ;;  %1232 = vmatprep.subr.bf16.mxu1 %v3314_v16 }
 0x226   :  { %1192 = vmatpush1.bf16.msra.mxu0 %v3291_v12  ;;  %1233 = vmatpush1.bf16.msra.mxu1 %v3332_v19  ;;  %v2694_v19 = vld [vmem:[%s4004_s0 + $0x50] sm:$0xff] }
 0x227   :  { %1193 = vmatprep.subr.bf16.mxu0 %v3296_v13  ;;  %1234 = vmatprep.subr.bf16.mxu1 %v3338_v20 }
 0x22a   :  { %1194 = vmatpush1.bf16.msra.mxu0 %v3320_v17  ;;  %1235 = vmatpush1.bf16.msra.mxu1 %v3356_v23  ;;  %v2695_v17 = vld [vmem:[%s4004_s0 + $0x58] sm:$0xff] }
 0x22b   :  { %1195 = vmatprep.subr.bf16.mxu0 %v3326_v18  ;;  %1236 = vmatprep.subr.bf16.mxu1 %v3367_v25 }
 0x22e   :  { %1196 = vmatpush1.bf16.msra.mxu0 %v3344_v21  ;;  %1237 = vmatpush1.bf16.msra.mxu1 %v3382_v28 }
 0x22f   :  { %1197 = vmatprep.subr.bf16.mxu0 %v3349_v22  ;;  %1238 = vmatprep.subr.bf16.mxu1 %v3389_v29 }
 0x232   :  { %1198 = vmatpush1.bf16.msra.mxu0 %v3361_v24  ;;  %1239 = vmatpush1.bf16.msra.mxu1 %v3404_v32 }
 0x233   :  { %1199 = vmatprep.subr.bf16.mxu0 %v3377_v27  ;;  %1240 = vmatprep.subr.bf16.mxu1 %v3411_v34 }
 0x236   :  { %1200 = vmatpush1.bf16.msra.mxu0 %v3398_v31  ;;  %1241 = vmatpush1.bf16.msra.mxu1 %v3420_v35  ;;  %v980_v31 = vpop.permute.xlu1 %979 }
 0x237   :  { %vm981_vm11 = vcmp.eq.s32.totalorder %v980_v31, 1  ;;  %1505 = vmatprep.subr.bf16.mxu0 %v3614_v62  ;;  %1546 = vmatprep.subr.bf16.mxu1 %v3619_v63 }
 0x2d9   :  { %v899_v3 = vpop.f32.mrf.mxu0  ;;  %v940_v4 = vpop.f32.mrf.mxu1 }
 0x2da   :  { %v947_v7 = vadd.f32 %v2692_v1, %v899_v3  ;;  %v949_v22 = vadd.f32 %v2694_v19, %v940_v4  ;;  %v3761_v1 = vld [vmem:[%s4005_s1 + $0x2c] ss:$16 sps:$4 sm:$0xff]   ;;  %v3768_v3 = vld [vmem:[%s4005_s1 + $0x20] ss:$16 sps:$4 sm:$0xff]   ;;  %v3773_v4 = vld [vmem:[%s4005_s1 + $0x28] ss:$16 sps:$4 sm:$0xff]  }
 0x2db   :  { %v901_v8 = vpop.f32.mrf.mxu0  ;;  %v942_v9 = vpop.f32.mrf.mxu1 }
 0x2dc   :  { %v2728_v10 = vmul.f32 -1.442695, %v947_v7  ;;  %v948_v11 = vadd.f32 %v2693_v5, %v901_v8  ;;  %v950_v18 = vadd.f32 %v2695_v17, %v942_v9  ;;  %v3780_v5 = vld [vmem:[%s4005_s1 + $0x4] ss:$16 sps:$4 sm:$0xff]   ;;  %v3785_v7 = vld [vmem:[%s4005_s1 + $0xc] ss:$16 sps:$4 sm:$0xff]  }
 0x2dd   :  { %v903_v12 = vpop.f32.mrf.mxu0  ;;  %v944_v13 = vpop.f32.mrf.mxu1  ;;  %v3792_v8 = vld [vmem:[%s4005_s1] ss:$16 sps:$4 sm:$0xff]   ;;  %v3797_v9 = vld [vmem:[%s4005_s1 + $0x8] ss:$16 sps:$4 sm:$0xff]  }
 0x2de   :  { %3067 = vpow2.f32 %v2728_v10  ;;  %v2729_v14 = vmul.f32 -1.442695, %v948_v11  ;;  %v2730_v20 = vmul.f32 -1.442695, %v950_v18  ;;  %v2731_v10 = vld [vmem:[%s4004_s0 + $0x60] sm:$0xff]  ;;  %v2732_v13 = vld [vmem:[%s4004_s0 + $0x68] sm:$0xff] }
 0x2df   :  { %v904_v15 = vpop.f32.mrf.mxu0  ;;  %v945_v16 = vpop.f32.mrf.mxu1 }
 0x2e0   :  { %3069 = vpow2.f32 %v2729_v14 }
 0x2e1   :  { %3071 = vpow2.f32 %v2730_v20 }
 0x2eb   :  { %v3068_v21 = vpop.eup %3067 }
 0x2ec   :  { %v954_v23 = vadd.f32 1.0, %v3068_v21 }
 0x2ed   :  { %v3070_v24 = vpop.eup %3069 }
 0x2ee   :  { %3073 = vrcp.f32 %v954_v23  ;;  %v960_v25 = vadd.f32 1.0, %v3070_v24  ;;  %v3072_v27 = vpop.eup %3071  ;;  %v2734_v24 = vld [vmem:[%s4004_s0 + $0x78] sm:$0xff] }
 0x2ef   :  { %3075 = vtanh.f32 %v949_v22  ;;  %v967_v34 = vadd.f32 1.0, %v3072_v27  ;;  %v2733_v27 = vld [vmem:[%s4004_s0 + $0x70] sm:$0xff] }
 0x2f0   :  { %3077 = vrcp.f32 %v960_v25 }
 0x2f1   :  { %3079 = vrcp.f32 %v967_v34 }
 0x2fb   :  { %v3074_v28 = vpop.eup %3073 }
 0x2fc   :  { %v3076_v29 = vpop.eup %3075 }
 0x2fd   :  { %v3078_v32 = vpop.eup %3077  ;;  %v971_v39 = vmul.f32 %v3076_v29, %v3074_v28 }
 0x2fe   :  { %v970_v35 = vmul.f32 %v3078_v32, %v3549_v52  ;;  %v3080_v26 = vpop.eup %3079 }
 0x300   :  { %v972_v45 = vadd.f32 %v971_v39, %v970_v35 }
 0x302   :  { %3081 = vtanh.f32 %v972_v45  ;;  %v3602_v57 = vsel %vm981_vm11, %v972_v45, %v3549_v52  ;;  %v3725_v52 = vld [vmem:[%s4005_s1 + $0x6c] ss:$16 sps:$4 sm:$0xff]  }
 0x30f   :  { %v3082_v58 = vpop.eup %3081 }
 0x310   :  { %v974_v59 = vmul.f32 %v3082_v58, %v3080_v26 }
 0x312   :  { %v3605_v60 = vsel %vm981_vm11, %v974_v59, %v3552_v56  ;;  %v3749_v56 = vld [vmem:[%s4005_s1 + $0x48] ss:$16 sps:$4 sm:$0xff]  }
 0x313   :  { %v984_v61 = vpack.c.bf16 %v3605_v60, %v3605_v60 }
 0x315   :  { %986 = vst [vmem:[#allocation4 + $0x8] sm:$0xf] %v984_v61  ;;  %1218 = vmatmul.mubr.bf16.vlgmr.msra.gmra.mxu0 %v984_v61  ;;  %1259 = vmatmul.mubr.bf16.vlgmr.msra.gmra.mxu1 %v984_v61 }
 0x316   :  { %1537 = vmatprep.mubr.bf16.mxu0 %v3185_v2  ;;  %1578 = vmatprep.mubr.bf16.mxu1 %v3185_v2 }
 0x317   :  { %1506 = vmatpush1.bf16.msra.mxu0 %v3624_v30  ;;  %1547 = vmatpush1.bf16.msra.mxu1 %v3629_v33 }
 0x318   :  { %1507 = vmatprep.subr.bf16.mxu0 %v3638_v36  ;;  %1548 = vmatprep.subr.bf16.mxu1 %v3643_v37 }
 0x31b   :  { %1508 = vmatpush1.bf16.msra.mxu0 %v3648_v38  ;;  %1549 = vmatpush1.bf16.msra.mxu1 %v3653_v41 }
 0x31c   :  { %1509 = vmatprep.subr.bf16.mxu0 %v3662_v42  ;;  %1550 = vmatprep.subr.bf16.mxu1 %v3667_v43 }
 0x31f   :  { %1510 = vmatpush1.bf16.msra.mxu0 %v3672_v44  ;;  %1551 = vmatpush1.bf16.msra.mxu1 %v3677_v46 }
 0x320   :  { %1511 = vmatprep.subr.bf16.mxu0 %v3686_v47  ;;  %1552 = vmatprep.subr.bf16.mxu1 %v3691_v48 }
 0x323   :  { %1512 = vmatpush1.bf16.msra.mxu0 %v3696_v49  ;;  %1553 = vmatpush1.bf16.msra.mxu1 %v3701_v0 }
 0x324   :  { %1513 = vmatprep.subr.bf16.mxu0 %v3708_v6  ;;  %1554 = vmatprep.subr.bf16.mxu1 %v3725_v52 }
 0x327   :  { %1514 = vmatpush1.bf16.msra.mxu0 %v3715_v50  ;;  %1555 = vmatpush1.bf16.msra.mxu1 %v3720_v51 }
 0x328   :  { %1515 = vmatprep.subr.bf16.mxu0 %v3731_v53  ;;  %1556 = vmatprep.subr.bf16.mxu1 %v3736_v54 }
 0x32b   :  { %1516 = vmatpush1.bf16.msra.mxu0 %v3744_v55  ;;  %1557 = vmatpush1.bf16.msra.mxu1 %v3749_v56 }
 0x32c   :  { %1517 = vmatprep.subr.bf16.mxu0 %v3756_v40  ;;  %1558 = vmatprep.subr.bf16.mxu1 %v3761_v1 }
 0x32f   :  { %1518 = vmatpush1.bf16.msra.mxu0 %v3768_v3  ;;  %1559 = vmatpush1.bf16.msra.mxu1 %v3773_v4 }
 0x330   :  { %1519 = vmatprep.subr.bf16.mxu0 %v3780_v5  ;;  %1560 = vmatprep.subr.bf16.mxu1 %v3785_v7 }
 0x333   :  { %1520 = vmatpush1.bf16.msra.mxu0 %v3792_v8  ;;  %1561 = vmatpush1.bf16.msra.mxu1 %v3797_v9 }
 0x334   :  { %1825 = vmatprep.subr.bf16.mxu0 %v3614_v62  ;;  %1866 = vmatprep.subr.bf16.mxu1 %v3619_v63 }
 0x3d5   :  { %v1219_v11 = vpop.f32.mrf.mxu0  ;;  %v1260_v12 = vpop.f32.mrf.mxu1 }
 0x3d6   :  { %v1267_v14 = vadd.f32 %v2731_v10, %v1219_v11  ;;  %v1269_v31 = vadd.f32 %v2733_v27, %v1260_v12  ;;  %v1300_v11 = vpop.permute.xlu1 %1299 }
 0x3d7   :  { %v1221_v15 = vpop.f32.mrf.mxu0  ;;  %v1262_v16 = vpop.f32.mrf.mxu1  ;;  %vm1301_vm12 = vcmp.eq.s32.totalorder %v1300_v11, 1 }
 0x3d8   :  { %v2767_v17 = vmul.f32 -1.442695, %v1267_v14  ;;  %v1268_v18 = vadd.f32 %v2732_v13, %v1221_v15  ;;  %v1270_v25 = vadd.f32 %v2734_v24, %v1262_v16 }
 0x3d9   :  { %v1223_v19 = vpop.f32.mrf.mxu0  ;;  %v1264_v20 = vpop.f32.mrf.mxu1 }
 0x3da   :  { %3083 = vpow2.f32 %v2767_v17  ;;  %v2768_v21 = vmul.f32 -1.442695, %v1268_v18  ;;  %v2769_v28 = vmul.f32 -1.442695, %v1270_v25  ;;  %v2771_v20 = vld [vmem:[%s4004_s0 + $0x88] sm:$0xff] }
 0x3db   :  { %v1224_v22 = vpop.f32.mrf.mxu0  ;;  %v1265_v23 = vpop.f32.mrf.mxu1 }
 0x3dc   :  { %3085 = vpow2.f32 %v2768_v21 }
 0x3dd   :  { %3087 = vpow2.f32 %v2769_v28 }
 0x3e7   :  { %v3084_v29 = vpop.eup %3083 }
 0x3e8   :  { %v1274_v32 = vadd.f32 1.0, %v3084_v29 }
 0x3e9   :  { %v3086_v34 = vpop.eup %3085 }
 0x3ea   :  { %3089 = vrcp.f32 %v1274_v32  ;;  %v1280_v35 = vadd.f32 1.0, %v3086_v34  ;;  %v3088_v39 = vpop.eup %3087  ;;  %v2773_v34 = vld [vmem:[%s4004_s0 + $0x98] sm:$0xff] }
 0x3eb   :  { %3091 = vtanh.f32 %v1269_v31  ;;  %v1287_v59 = vadd.f32 1.0, %v3088_v39  ;;  %v2772_v39 = vld [vmem:[%s4004_s0 + $0x90] sm:$0xff] }
 0x3ec   :  { %3093 = vrcp.f32 %v1280_v35 }
 0x3ed   :  { %3095 = vrcp.f32 %v1287_v59 }
 0x3f7   :  { %v3090_v45 = vpop.eup %3089 }
 0x3f8   :  { %v3092_v26 = vpop.eup %3091 }
 0x3f9   :  { %v3094_v58 = vpop.eup %3093  ;;  %v1291_v61 = vmul.f32 %v3092_v26, %v3090_v45 }
 0x3fa   :  { %v1290_v10 = vmul.f32 %v3094_v58, %v3602_v57  ;;  %v3096_v14 = vpop.eup %3095 }
 0x3fc   :  { %v1292_v13 = vadd.f32 %v1291_v61, %v1290_v10 }
 0x3fe   :  { %3097 = vtanh.f32 %v1292_v13  ;;  %v3819_v12 = vsel %vm1301_vm12, %v1292_v13, %v3602_v57  ;;  %v2770_v57 = vld [vmem:[%s4004_s0 + $0x80] sm:$0xff] }
 0x40b   :  { %v3098_v15 = vpop.eup %3097 }
 0x40c   :  { %v1294_v16 = vmul.f32 %v3098_v15, %v3096_v14 }
 0x40e   :  { %v3822_v17 = vsel %vm1301_vm12, %v1294_v16, %v3605_v60 }
 0x40f   :  { %v1304_v18 = vpack.c.bf16 %v3822_v17, %v3822_v17 }
 0x411   :  { %1306 = vst [vmem:[#allocation4 + $0xc] sm:$0xf] %v1304_v18  ;;  %1538 = vmatmul.mubr.bf16.vlgmr.msra.gmra.mxu0 %v1304_v18  ;;  %1579 = vmatmul.mubr.bf16.vlgmr.msra.gmra.mxu1 %v1304_v18 }
 0x412   :  { %1826 = vmatpush1.bf16.msra.mxu0 %v3624_v30  ;;  %1867 = vmatpush1.bf16.msra.mxu1 %v3629_v33 }
 0x413   :  { %1827 = vmatprep.subr.bf16.mxu0 %v3638_v36  ;;  %1868 = vmatprep.subr.bf16.mxu1 %v3643_v37 }
 0x414   :  { %1857 = vmatprep.mubr.bf16.mxu0 %v3185_v2  ;;  %1898 = vmatprep.mubr.bf16.mxu1 %v3185_v2 }
 0x416   :  { %1828 = vmatpush1.bf16.msra.mxu0 %v3648_v38  ;;  %1869 = vmatpush1.bf16.msra.mxu1 %v3653_v41 }
 0x417   :  { %1829 = vmatprep.subr.bf16.mxu0 %v3662_v42  ;;  %1870 = vmatprep.subr.bf16.mxu1 %v3667_v43 }
 0x41a   :  { %1830 = vmatpush1.bf16.msra.mxu0 %v3672_v44  ;;  %1871 = vmatpush1.bf16.msra.mxu1 %v3677_v46 }
 0x41b   :  { %1831 = vmatprep.subr.bf16.mxu0 %v3686_v47  ;;  %1872 = vmatprep.subr.bf16.mxu1 %v3691_v48 }
 0x41e   :  { %1832 = vmatpush1.bf16.msra.mxu0 %v3696_v49  ;;  %1873 = vmatpush1.bf16.msra.mxu1 %v3701_v0 }
 0x41f   :  { %1833 = vmatprep.subr.bf16.mxu0 %v3708_v6  ;;  %1874 = vmatprep.subr.bf16.mxu1 %v3725_v52 }
 0x422   :  { %1834 = vmatpush1.bf16.msra.mxu0 %v3715_v50  ;;  %1875 = vmatpush1.bf16.msra.mxu1 %v3720_v51 }
 0x423   :  { %1835 = vmatprep.subr.bf16.mxu0 %v3731_v53  ;;  %1876 = vmatprep.subr.bf16.mxu1 %v3736_v54 }
 0x426   :  { %1836 = vmatpush1.bf16.msra.mxu0 %v3744_v55  ;;  %1877 = vmatpush1.bf16.msra.mxu1 %v3749_v56 }
 0x427   :  { %1837 = vmatprep.subr.bf16.mxu0 %v3756_v40  ;;  %1878 = vmatprep.subr.bf16.mxu1 %v3761_v1 }
 0x42a   :  { %1838 = vmatpush1.bf16.msra.mxu0 %v3768_v3  ;;  %1879 = vmatpush1.bf16.msra.mxu1 %v3773_v4 }
 0x42b   :  { %1839 = vmatprep.subr.bf16.mxu0 %v3780_v5  ;;  %1880 = vmatprep.subr.bf16.mxu1 %v3785_v7 }
 0x42e   :  { %1840 = vmatpush1.bf16.msra.mxu0 %v3792_v8  ;;  %1881 = vmatpush1.bf16.msra.mxu1 %v3797_v9 }
 0x42f   :  { %2145 = vmatprep.subr.bf16.mxu0 %v3614_v62  ;;  %2186 = vmatprep.subr.bf16.mxu1 %v3619_v63 }
 0x4d1   :  { %v1539_v60 = vpop.f32.mrf.mxu0  ;;  %v1580_v19 = vpop.f32.mrf.mxu1 }
 0x4d2   :  { %v1587_v21 = vadd.f32 %v2770_v57, %v1539_v60  ;;  %v1589_v58 = vadd.f32 %v2772_v39, %v1580_v19  ;;  %v1620_v60 = vpop.permute.xlu0 %1619 }
 0x4d3   :  { %v1541_v22 = vpop.f32.mrf.mxu0  ;;  %v1582_v23 = vpop.f32.mrf.mxu1  ;;  %vm1621_vm13 = vcmp.eq.s32.totalorder %v1620_v60, 1 }
 0x4d4   :  { %v2806_v24 = vmul.f32 -1.442695, %v1587_v21  ;;  %v1588_v25 = vadd.f32 %v2771_v20, %v1541_v22  ;;  %v1590_v35 = vadd.f32 %v2773_v34, %v1582_v23 }
 0x4d5   :  { %v1543_v27 = vpop.f32.mrf.mxu0  ;;  %v1584_v28 = vpop.f32.mrf.mxu1 }
 0x4d6   :  { %3099 = vpow2.f32 %v2806_v24  ;;  %v2807_v29 = vmul.f32 -1.442695, %v1588_v25  ;;  %v2808_v45 = vmul.f32 -1.442695, %v1590_v35  ;;  %v2810_v28 = vld [vmem:[%s4004_s0 + $0xa8] sm:$0xff] }
 0x4d7   :  { %v1544_v31 = vpop.f32.mrf.mxu0  ;;  %v1585_v32 = vpop.f32.mrf.mxu1 }
 0x4d8   :  { %3101 = vpow2.f32 %v2807_v29 }
 0x4d9   :  { %3103 = vpow2.f32 %v2808_v45 }
 0x4e3   :  { %v3100_v26 = vpop.eup %3099 }
 0x4e4   :  { %v1594_v59 = vadd.f32 1.0, %v3100_v26 }
 0x4e5   :  { %v3102_v61 = vpop.eup %3101 }
 0x4e6   :  { %3105 = vrcp.f32 %v1594_v59  ;;  %v1600_v10 = vadd.f32 1.0, %v3102_v61  ;;  %v3104_v11 = vpop.eup %3103  ;;  %v2811_v61 = vld [vmem:[%s4004_s0 + $0xb0] sm:$0xff] }
 0x4e7   :  { %3107 = vtanh.f32 %v1589_v58  ;;  %v1607_v16 = vadd.f32 1.0, %v3104_v11  ;;  %v2812_v58 = vld [vmem:[%s4004_s0 + $0xb8] sm:$0xff] }
 0x4e8   :  { %3109 = vrcp.f32 %v1600_v10 }
 0x4e9   :  { %3111 = vrcp.f32 %v1607_v16 }
 0x4f3   :  { %v3106_v13 = vpop.eup %3105 }
 0x4f4   :  { %v3108_v14 = vpop.eup %3107 }
 0x4f5   :  { %v3110_v15 = vpop.eup %3109  ;;  %v1611_v18 = vmul.f32 %v3108_v14, %v3106_v13 }
 0x4f6   :  { %v1610_v57 = vmul.f32 %v3110_v15, %v3819_v12  ;;  %v3112_v21 = vpop.eup %3111 }
 0x4f8   :  { %v1612_v20 = vadd.f32 %v1611_v18, %v1610_v57 }
 0x4fa   :  { %3113 = vtanh.f32 %v1612_v20  ;;  %v3874_v19 = vsel %vm1621_vm13, %v1612_v20, %v3819_v12  ;;  %v2809_v12 = vld [vmem:[%s4004_s0 + $0xa0] sm:$0xff] }
 0x507   :  { %v3114_v22 = vpop.eup %3113 }
 0x508   :  { %v1614_v23 = vmul.f32 %v3114_v22, %v3112_v21 }
 0x50a   :  { %v3877_v24 = vsel %vm1621_vm13, %v1614_v23, %v3822_v17 }
 0x50b   :  { %v1624_v25 = vpack.c.bf16 %v3877_v24, %v3877_v24 }
 0x50d   :  { %1626 = vst [vmem:[#allocation4 + $0x10] sm:$0xf] %v1624_v25  ;;  %1858 = vmatmul.mubr.bf16.vlgmr.msra.gmra.mxu0 %v1624_v25  ;;  %1899 = vmatmul.mubr.bf16.vlgmr.msra.gmra.mxu1 %v1624_v25  ;;  %v1940_v25 = vpop.permute.xlu1 %1939 }
 0x50e   :  { %2146 = vmatpush1.bf16.msra.mxu0 %v3624_v30  ;;  %2187 = vmatpush1.bf16.msra.mxu1 %v3629_v33  ;;  %vm1941_vm14 = vcmp.eq.s32.totalorder %v1940_v25, 1 }
 0x50f   :  { %2147 = vmatprep.subr.bf16.mxu0 %v3638_v36  ;;  %2188 = vmatprep.subr.bf16.mxu1 %v3643_v37 }
 0x510   :  { %2177 = vmatprep.mubr.bf16.mxu0 %v3185_v2  ;;  %2218 = vmatprep.mubr.bf16.mxu1 %v3185_v2 }
 0x512   :  { %2148 = vmatpush1.bf16.msra.mxu0 %v3648_v38  ;;  %2189 = vmatpush1.bf16.msra.mxu1 %v3653_v41 }
 0x513   :  { %2149 = vmatprep.subr.bf16.mxu0 %v3662_v42  ;;  %2190 = vmatprep.subr.bf16.mxu1 %v3667_v43 }
 0x516   :  { %2150 = vmatpush1.bf16.msra.mxu0 %v3672_v44  ;;  %2191 = vmatpush1.bf16.msra.mxu1 %v3677_v46 }
 0x517   :  { %2151 = vmatprep.subr.bf16.mxu0 %v3686_v47  ;;  %2192 = vmatprep.subr.bf16.mxu1 %v3691_v48 }
 0x51a   :  { %2152 = vmatpush1.bf16.msra.mxu0 %v3696_v49  ;;  %2193 = vmatpush1.bf16.msra.mxu1 %v3701_v0 }
 0x51b   :  { %2153 = vmatprep.subr.bf16.mxu0 %v3708_v6  ;;  %2194 = vmatprep.subr.bf16.mxu1 %v3725_v52 }
 0x51e   :  { %2154 = vmatpush1.bf16.msra.mxu0 %v3715_v50  ;;  %2195 = vmatpush1.bf16.msra.mxu1 %v3720_v51 }
 0x51f   :  { %2155 = vmatprep.subr.bf16.mxu0 %v3731_v53  ;;  %2196 = vmatprep.subr.bf16.mxu1 %v3736_v54 }
 0x522   :  { %2156 = vmatpush1.bf16.msra.mxu0 %v3744_v55  ;;  %2197 = vmatpush1.bf16.msra.mxu1 %v3749_v56 }
 0x523   :  { %2157 = vmatprep.subr.bf16.mxu0 %v3756_v40  ;;  %2198 = vmatprep.subr.bf16.mxu1 %v3761_v1 }
 0x526   :  { %2158 = vmatpush1.bf16.msra.mxu0 %v3768_v3  ;;  %2199 = vmatpush1.bf16.msra.mxu1 %v3773_v4 }
 0x527   :  { %2159 = vmatprep.subr.bf16.mxu0 %v3780_v5  ;;  %2200 = vmatprep.subr.bf16.mxu1 %v3785_v7 }
 0x52a   :  { %2160 = vmatpush1.bf16.msra.mxu0 %v3792_v8  ;;  %2201 = vmatpush1.bf16.msra.mxu1 %v3797_v9 }
 0x52b   :  { %2465 = vmatprep.subr.bf16.mxu0 %v3614_v62  ;;  %2506 = vmatprep.subr.bf16.mxu1 %v3619_v63 }
 0x5cd   :  { %v1859_v17 = vpop.f32.mrf.mxu0  ;;  %v1900_v27 = vpop.f32.mrf.mxu1 }
 0x5ce   :  { %v1907_v29 = vadd.f32 %v2809_v12, %v1859_v17  ;;  %v1909_v13 = vadd.f32 %v2811_v61, %v1900_v27 }
 0x5cf   :  { %v1861_v31 = vpop.f32.mrf.mxu0  ;;  %v1902_v32 = vpop.f32.mrf.mxu1 }
 0x5d0   :  { %v2845_v34 = vmul.f32 -1.442695, %v1907_v29  ;;  %v1908_v35 = vadd.f32 %v2810_v28, %v1861_v31  ;;  %v1910_v59 = vadd.f32 %v2812_v58, %v1902_v32 }
 0x5d1   :  { %v1863_v39 = vpop.f32.mrf.mxu0  ;;  %v1904_v45 = vpop.f32.mrf.mxu1 }
 0x5d2   :  { %3115 = vpow2.f32 %v2845_v34  ;;  %v2846_v62 = vmul.f32 -1.442695, %v1908_v35  ;;  %v2847_v10 = vmul.f32 -1.442695, %v1910_v59  ;;  %v2888_v59 = vld [vmem:[%s4004_s0 + $0xe8] sm:$0xff] }
 0x5d3   :  { %v1864_v63 = vpop.f32.mrf.mxu0  ;;  %v1905_v26 = vpop.f32.mrf.mxu1 }
 0x5d4   :  { %3117 = vpow2.f32 %v2846_v62  ;;  %v2887_v63 = vld [vmem:[%s4004_s0 + $0xe0] sm:$0xff] }
 0x5d5   :  { %3119 = vpow2.f32 %v2847_v10 }
 0x5df   :  { %v3116_v11 = vpop.eup %3115 }
 0x5e0   :  { %v1914_v14 = vadd.f32 1.0, %v3116_v11 }
 0x5e1   :  { %v3118_v15 = vpop.eup %3117 }
 0x5e2   :  { %3121 = vrcp.f32 %v1914_v14  ;;  %v1920_v16 = vadd.f32 1.0, %v3118_v15  ;;  %v3120_v18 = vpop.eup %3119 }
 0x5e3   :  { %3123 = vtanh.f32 %v1909_v13  ;;  %v1927_v21 = vadd.f32 1.0, %v3120_v18 }
 0x5e4   :  { %3125 = vrcp.f32 %v1920_v16 }
 0x5e5   :  { %3127 = vrcp.f32 %v1927_v21 }
 0x5ef   :  { %v3122_v57 = vpop.eup %3121 }
 0x5f0   :  { %v3124_v60 = vpop.eup %3123 }
 0x5f1   :  { %v3126_v20 = vpop.eup %3125  ;;  %v1931_v22 = vmul.f32 %v3124_v60, %v3122_v57 }
 0x5f2   :  { %v1930_v23 = vmul.f32 %v3126_v20, %v3874_v19  ;;  %v3128_v27 = vpop.eup %3127  ;;  %v2890_v20 = vld [vmem:[%s4004_s0 + $0xf8] sm:$0xff] }
 0x5f4   :  { %v1932_v12 = vadd.f32 %v1931_v22, %v1930_v23  ;;  %v2889_v22 = vld [vmem:[%s4004_s0 + $0xf0] sm:$0xff] }
 0x5f6   :  { %3129 = vtanh.f32 %v1932_v12  ;;  %v3929_v17 = vsel %vm1941_vm14, %v1932_v12, %v3874_v19 }
 0x603   :  { %v3130_v28 = vpop.eup %3129 }
 0x604   :  { %v1934_v29 = vmul.f32 %v3130_v28, %v3128_v27 }
 0x606   :  { %v3932_v31 = vsel %vm1941_vm14, %v1934_v29, %v3877_v24 }
 0x607   :  { %v1944_v32 = vpack.c.bf16 %v3932_v31, %v3932_v31 }
 0x609   :  { %1946 = vst [vmem:[#allocation4 + $0x14] sm:$0xf] %v1944_v32  ;;  %2178 = vmatmul.mubr.bf16.vlgmr.msra.gmra.mxu0 %v1944_v32  ;;  %2219 = vmatmul.mubr.bf16.vlgmr.msra.gmra.mxu1 %v1944_v32 }
 0x60a   :  { %2466 = vmatpush1.bf16.msra.mxu0 %v3624_v30  ;;  %2507 = vmatpush1.bf16.msra.mxu1 %v3629_v33 }
 0x60b   :  { %2467 = vmatprep.subr.bf16.mxu0 %v3638_v36  ;;  %2508 = vmatprep.subr.bf16.mxu1 %v3643_v37  ;;  %v2849_v36 = vld [vmem:[%s4004_s0 + $0xc8] sm:$0xff] }
 0x60c   :  { %2497 = vmatprep.mubr.bf16.mxu0 %v3185_v2  ;;  %2538 = vmatprep.mubr.bf16.mxu1 %v3185_v2  ;;  %v2848_v2 = vld [vmem:[%s4004_s0 + $0xc0] sm:$0xff] }
 0x60e   :  { %2468 = vmatpush1.bf16.msra.mxu0 %v3648_v38  ;;  %2509 = vmatpush1.bf16.msra.mxu1 %v3653_v41 }
 0x60f   :  { %2469 = vmatprep.subr.bf16.mxu0 %v3662_v42  ;;  %2510 = vmatprep.subr.bf16.mxu1 %v3667_v43 }
 0x612   :  { %2470 = vmatpush1.bf16.msra.mxu0 %v3672_v44  ;;  %2511 = vmatpush1.bf16.msra.mxu1 %v3677_v46 }
 0x613   :  { %2471 = vmatprep.subr.bf16.mxu0 %v3686_v47  ;;  %2512 = vmatprep.subr.bf16.mxu1 %v3691_v48 }
 0x616   :  { %2472 = vmatpush1.bf16.msra.mxu0 %v3696_v49  ;;  %2513 = vmatpush1.bf16.msra.mxu1 %v3701_v0  ;;  %v2851_v0 = vld [vmem:[%s4004_s0 + $0xd8] sm:$0xff] }
 0x617   :  { %2473 = vmatprep.subr.bf16.mxu0 %v3708_v6  ;;  %2514 = vmatprep.subr.bf16.mxu1 %v3725_v52 }
 0x61a   :  { %2474 = vmatpush1.bf16.msra.mxu0 %v3715_v50  ;;  %2515 = vmatpush1.bf16.msra.mxu1 %v3720_v51  ;;  %v2850_v50 = vld [vmem:[%s4004_s0 + $0xd0] sm:$0xff] }
 0x61b   :  { %2475 = vmatprep.subr.bf16.mxu0 %v3731_v53  ;;  %2516 = vmatprep.subr.bf16.mxu1 %v3736_v54 }
 0x61e   :  { %2476 = vmatpush1.bf16.msra.mxu0 %v3744_v55  ;;  %2517 = vmatpush1.bf16.msra.mxu1 %v3749_v56 }
 0x61f   :  { %2477 = vmatprep.subr.bf16.mxu0 %v3756_v40  ;;  %2518 = vmatprep.subr.bf16.mxu1 %v3761_v1 }
 0x622   :  { %2478 = vmatpush1.bf16.msra.mxu0 %v3768_v3  ;;  %2519 = vmatpush1.bf16.msra.mxu1 %v3773_v4 }
 0x623   :  { %2479 = vmatprep.subr.bf16.mxu0 %v3780_v5  ;;  %2520 = vmatprep.subr.bf16.mxu1 %v3785_v7  ;;  %v2260_v7 = vpop.permute.xlu0 %2259 }
 0x624   :  { %vm2261_vm15 = vcmp.eq.s32.totalorder %v2260_v7, 1 }
 0x626   :  { %2480 = vmatpush1.bf16.msra.mxu0 %v3792_v8  ;;  %2521 = vmatpush1.bf16.msra.mxu1 %v3797_v9 }
 0x6c9   :  { %v2179_v30 = vpop.f32.mrf.mxu0  ;;  %v2220_v33 = vpop.f32.mrf.mxu1 }
 0x6ca   :  { %v2227_v37 = vadd.f32 %v2848_v2, %v2179_v30  ;;  %v2229_v53 = vadd.f32 %v2850_v50, %v2220_v33  ;;  %v2580_v33 = vpop.permute.xlu1 %2579 }
 0x6cb   :  { %v2181_v38 = vpop.f32.mrf.mxu0  ;;  %v2222_v41 = vpop.f32.mrf.mxu1  ;;  %vm2581_vm0 = vcmp.eq.s32.totalorder %v2580_v33, 1 }
 0x6cc   :  { %v2884_v42 = vmul.f32 -1.442695, %v2227_v37  ;;  %v2228_v43 = vadd.f32 %v2849_v36, %v2181_v38  ;;  %v2230_v6 = vadd.f32 %v2851_v0, %v2222_v41 }
 0x6cd   :  { %v2183_v44 = vpop.f32.mrf.mxu0  ;;  %v2224_v46 = vpop.f32.mrf.mxu1 }
 0x6ce   :  { %3131 = vpow2.f32 %v2884_v42  ;;  %v2885_v47 = vmul.f32 -1.442695, %v2228_v43  ;;  %v2886_v51 = vmul.f32 -1.442695, %v2230_v6 }
 0x6cf   :  { %v2184_v48 = vpop.f32.mrf.mxu0  ;;  %v2225_v49 = vpop.f32.mrf.mxu1 }
 0x6d0   :  { %3133 = vpow2.f32 %v2885_v47 }
 0x6d1   :  { %3135 = vpow2.f32 %v2886_v51 }
 0x6db   :  { %v3132_v52 = vpop.eup %3131 }
 0x6dc   :  { %v2234_v54 = vadd.f32 1.0, %v3132_v52 }
 0x6dd   :  { %v3134_v55 = vpop.eup %3133 }
 0x6de   :  { %3137 = vrcp.f32 %v2234_v54  ;;  %v2240_v56 = vadd.f32 1.0, %v3134_v55  ;;  %v3136_v40 = vpop.eup %3135 }
 0x6df   :  { %3139 = vtanh.f32 %v2229_v53  ;;  %v2247_v5 = vadd.f32 1.0, %v3136_v40 }
 0x6e0   :  { %3141 = vrcp.f32 %v2240_v56 }
 0x6e1   :  { %3143 = vrcp.f32 %v2247_v5 }
 0x6eb   :  { %v3138_v1 = vpop.eup %3137 }
 0x6ec   :  { %v3140_v3 = vpop.eup %3139 }
 0x6ed   :  { %v3142_v4 = vpop.eup %3141  ;;  %v2251_v8 = vmul.f32 %v3140_v3, %v3138_v1 }
 0x6ee   :  { %v2250_v9 = vmul.f32 %v3142_v4, %v3929_v17  ;;  %v3144_v34 = vpop.eup %3143 }
 0x6f0   :  { %v2252_v19 = vadd.f32 %v2251_v8, %v2250_v9 }
 0x6f2   :  { %3145 = vtanh.f32 %v2252_v19  ;;  %v2263_v24 = vsel %vm2261_vm15, %v2252_v19, %v3929_v17 }
 0x6ff   :  { %v3146_v35 = vpop.eup %3145 }
 0x700   :  { %v2254_v39 = vmul.f32 %v3146_v35, %v3144_v34 }
 0x702   :  { %v2262_v45 = vsel %vm2261_vm15, %v2254_v39, %v3932_v31 }
 0x703   :  { %v2264_v62 = vpack.c.bf16 %v2262_v45, %v2262_v45 }
 0x705   :  { %2266 = vst [vmem:[#allocation4 + $0x18] sm:$0xf] %v2264_v62  ;;  %2498 = vmatmul.mubr.bf16.vlgmr.msra.gmra.mxu0 %v2264_v62  ;;  %2539 = vmatmul.mubr.bf16.vlgmr.msra.gmra.mxu1 %v2264_v62 }
 0x7c5   :  { %v2499_v26 = vpop.f32.mrf.mxu0  ;;  %v2540_v58 = vpop.f32.mrf.mxu1 }
 0x7c6   :  { %v2547_v61 = vadd.f32 %v2887_v63, %v2499_v26  ;;  %v2549_v12 = vadd.f32 %v2889_v22, %v2540_v58 }
 0x7c7   :  { %v2501_v10 = vpop.f32.mrf.mxu0  ;;  %v2542_v11 = vpop.f32.mrf.mxu1 }
 0x7c8   :  { %v2923_v13 = vmul.f32 -1.442695, %v2547_v61  ;;  %v2548_v14 = vadd.f32 %v2888_v59, %v2501_v10  ;;  %v2550_v21 = vadd.f32 %v2890_v20, %v2542_v11 }
 0x7c9   :  { %v2503_v15 = vpop.f32.mrf.mxu0  ;;  %v2544_v16 = vpop.f32.mrf.mxu1 }
 0x7ca   :  { %3147 = vpow2.f32 %v2923_v13  ;;  %v2924_v18 = vmul.f32 -1.442695, %v2548_v14  ;;  %v2925_v23 = vmul.f32 -1.442695, %v2550_v21 }
 0x7cb   :  { %v2504_v57 = vpop.f32.mrf.mxu0  ;;  %v2545_v60 = vpop.f32.mrf.mxu1 }
 0x7cc   :  { %3149 = vpow2.f32 %v2924_v18 }
 0x7cd   :  { %3151 = vpow2.f32 %v2925_v23 }
 0x7d7   :  { %v3148_v25 = vpop.eup %3147 }
 0x7d8   :  { %v2554_v17 = vadd.f32 1.0, %v3148_v25 }
 0x7d9   :  { %v3150_v27 = vpop.eup %3149 }
 0x7da   :  { %3153 = vrcp.f32 %v2554_v17  ;;  %v2560_v28 = vadd.f32 1.0, %v3150_v27  ;;  %v3152_v29 = vpop.eup %3151 }
 0x7db   :  { %3155 = vtanh.f32 %v2549_v12  ;;  %v2567_v30 = vadd.f32 1.0, %v3152_v29 }
 0x7dc   :  { %3157 = vrcp.f32 %v2560_v28 }
 0x7dd   :  { %3159 = vrcp.f32 %v2567_v30 }
 0x7e7   :  { %v3154_v31 = vpop.eup %3153 }
 0x7e8   :  { %v3156_v32 = vpop.eup %3155 }
 0x7e9   :  { %v3158_v2 = vpop.eup %3157  ;;  %v2571_v36 = vmul.f32 %v3156_v32, %v3154_v31 }
 0x7ea   :  { %v2570_v37 = vmul.f32 %v3158_v2, %v2263_v24  ;;  %v3160_v42 = vpop.eup %3159 }
 0x7ec   :  { %v2572_v38 = vadd.f32 %v2571_v36, %v2570_v37 }
 0x7ee   :  { %3161 = vtanh.f32 %v2572_v38  ;;  %v2583_v41 = vsel %vm2581_vm0, %v2572_v38, %v2263_v24 }
 0x7ef   :  { %2593 = vst [vmem:[%s4009_s5] sm:$0xff] %v2583_v41 }
 0x7fb   :  { %v3162_v43 = vpop.eup %3161 }
 0x7fc   :  { %v2574_v44 = vmul.f32 %v3162_v43, %v3160_v42 }
 0x7fe   :  { %v2582_v46 = vsel %vm2581_vm0, %v2574_v44, %v2262_v45 }
 0x7ff   :  { %v2584_v47 = vpack.c.bf16 %v2582_v46, %v2582_v46  ;;  %2592 = vst [vmem:[%s4008_s4] sm:$0xff] %v2582_v46 }
 0x801   :  { %2586 = vst [vmem:[#allocation4 + $0x1c] sm:$0xf] %v2584_v47 }
 0x802   :  { %3174 = shalt.err (!%p3171_p4)
}
 0x803   :  { %s3188_s5 = smov 64   ;;  %s3189_s10 = smov 4  }
 0x804   :  { %2605 = dma.vmem_to_hbm [thread:$0]  %s2600_s6, 512, %s4007_s3, [#allocation5], %s3188_s5, %s3188_s5, %s3189_s10  }
 0x805   :  { %3183 = dma.done.wait [#allocation5], 512  }
 0x806   :  { %3184 = vsyncadd [#allocation5], 4294966784 }
 0x807   :  { %2617 = vsyncpa [#allocation5], 1 }

// kernel: seq2seq_forward.6
= control target key start
LH: loop header
LB: loop body
LE: loop exit
PB: predicated region body
PF: predicated region fallthrough
CT: control target
= control target key end

     0   :  { %v3154_v1 = vmov 0   ;;  %v3155_v37 = vmov 0.0|0.0   ;;  %s3991_s1 = inlined_call_operand.vmem [shape: bf16[128,512], index: 1, kind: input, shape index: {}]   ;;  %s3992_s2 = inlined_call_operand.vmem [shape: s32[8,1], index: 2, kind: input, shape index: {}]   ;;  %s3993_s0 = inlined_call_operand.vmem [shape: f32[8,8,512], index: 0, kind: input, shape index: {}]   ;;  %s3994_s3 = inlined_call_operand.vmem [shape: bf16[8,8,128], index: 3, kind: output, shape index: {0}]   ;;  %s3995_s5 = inlined_call_operand.vmem [shape: f32[8,128], index: 5, kind: output, shape index: {2}]   ;;  %s3996_s4 = inlined_call_operand.vmem [shape: f32[8,128], index: 4, kind: output, shape index: {1}]  }
   0x1   :  { %v3189_v0 = vld [vmem:[%s3991_s1 + $0xe4] ss:$16 sps:$4 sm:$0xff]   ;;  %257 = vmatprep.mubr.bf16.mxu0 %v3154_v1  ;;  %298 = vmatprep.mubr.bf16.mxu1 %v3154_v1  ;;  %v3196_v2 = vld [vmem:[%s3991_s1 + $0xe0] ss:$16 sps:$4 sm:$0xff]   ;;  %v3221_v6 = vld [vmem:[%s3991_s1 + $0xec] ss:$16 sps:$4 sm:$0xff]  }
   0x2   :  { %2928 = vset.pattern.permute.xlu0 %v3154_v1  ;;  %2929 = vset.pattern.permute.xlu1 %v3154_v1  ;;  %v3204_v3 = vld [vmem:[%s3991_s1 + $0xc4] ss:$16 sps:$4 sm:$0xff]   ;;  %v3210_v4 = vld [vmem:[%s3991_s1 + $0xc0] ss:$16 sps:$4 sm:$0xff]   ;;  %v3226_v7 = vld [vmem:[%s3991_s1 + $0xe8] ss:$16 sps:$4 sm:$0xff]  }
   0x3   :  { %225 = vmatprep.subr.bf16.mxu0 %v3189_v0  ;;  %v3216_v5 = vld [vmem:[%s3991_s1 + $0xa4] ss:$16 sps:$4 sm:$0xff]   ;;  %v3232_v8 = vld [vmem:[%s3991_s1 + $0xa0] ss:$16 sps:$4 sm:$0xff]   ;;  %266 = vmatprep.subr.bf16.mxu1 %v3221_v6  ;;  %v3245_v10 = vld [vmem:[%s3991_s1 + $0xcc] ss:$16 sps:$4 sm:$0xff]  }
   0x4   :  { %226 = vmatpush1.bf16.msra.mxu0 %v3196_v2  ;;  %v3239_v9 = vld [vmem:[%s3991_s1 + $0x84] ss:$16 sps:$4 sm:$0xff]   ;;  %267 = vmatpush1.bf16.msra.mxu1 %v3226_v7  ;;  %v3250_v11 = vld [vmem:[%s3991_s1 + $0xc8] ss:$16 sps:$4 sm:$0xff]   ;;  %v3257_v12 = vld [vmem:[%s3991_s1 + $0x80] ss:$16 sps:$4 sm:$0xff]  }
   0x5   :  { %227 = vmatprep.subr.bf16.mxu0 %v3204_v3  ;;  %268 = vmatprep.subr.bf16.mxu1 %v3245_v10  ;;  %v3262_v13 = vld [vmem:[%s3991_s1 + $0x64] ss:$16 sps:$4 sm:$0xff]   ;;  %v3267_v14 = vld [vmem:[%s3991_s1 + $0xac] ss:$16 sps:$4 sm:$0xff]   ;;  %v3274_v15 = vld [vmem:[%s3991_s1 + $0xa8] ss:$16 sps:$4 sm:$0xff]  }
   0x6   :  { %v3280_v16 = vld [vmem:[%s3991_s1 + $0x8c] ss:$16 sps:$4 sm:$0xff]   ;;  %v3286_v17 = vld [vmem:[%s3991_s1 + $0x60] ss:$16 sps:$4 sm:$0xff]   ;;  %v3292_v18 = vld [vmem:[%s3991_s1 + $0x44] ss:$16 sps:$4 sm:$0xff]  }
   0x7   :  { %v3298_v19 = vld [vmem:[%s3991_s1 + $0x88] ss:$16 sps:$4 sm:$0xff]   ;;  %v3304_v20 = vld [vmem:[%s3991_s1 + $0x6c] ss:$16 sps:$4 sm:$0xff]   ;;  %v3310_v21 = vld [vmem:[%s3991_s1 + $0x40] ss:$16 sps:$4 sm:$0xff]  }
   0x8   :  { %228 = vmatpush1.bf16.msra.mxu0 %v3210_v4  ;;  %269 = vmatpush1.bf16.msra.mxu1 %v3250_v11  ;;  %v3315_v22 = vld [vmem:[%s3991_s1 + $0x24] ss:$16 sps:$4 sm:$0xff]   ;;  %v3322_v23 = vld [vmem:[%s3991_s1 + $0x68] ss:$16 sps:$4 sm:$0xff]   ;;  %v3327_v24 = vld [vmem:[%s3991_s1 + $0x20] ss:$16 sps:$4 sm:$0xff]  }
   0x9   :  { %229 = vmatprep.subr.bf16.mxu0 %v3216_v5  ;;  %270 = vmatprep.subr.bf16.mxu1 %v3267_v14  ;;  %v3333_v25 = vld [vmem:[%s3991_s1 + $0x4c] ss:$16 sps:$4 sm:$0xff]   ;;  %v3338_v26 = vld [vmem:[%s3992_s2] sm:$0xff]  ;;  %v3348_v28 = vld [vmem:[%s3991_s1 + $0x48] ss:$16 sps:$4 sm:$0xff]  }
   0xa   :  { %v3343_v27 = vld [vmem:[%s3991_s1 + $0x4] ss:$16 sps:$4 sm:$0xff]   ;;  %vm336_vm0 = vcmp.gt.s32.totalorder %v3338_v26, 0  ;;  %v3355_v29 = vld [vmem:[%s3991_s1 + $0x2c] ss:$16 sps:$4 sm:$0xff]   ;;  %vm655_vm1 = vcmp.gt.s32.totalorder %v3338_v26, 1 }
   0xb   :  { %v337_v30 = vsel %vm336_vm0, 1, %v3154_v1  ;;  %v3364_v31 = vld [vmem:[%s3991_s1] ss:$16 sps:$4 sm:$0xff]   ;;  %v3370_v32 = vld [vmem:[%s3991_s1 + $0x28] ss:$16 sps:$4 sm:$0xff]   ;;  %v656_v33 = vsel %vm655_vm1, 1, %v3154_v1 }
   0xc   :  { %230 = vmatpush1.bf16.msra.mxu0 %v3232_v8  ;;  %271 = vmatpush1.bf16.msra.mxu1 %v3274_v15  ;;  %v3377_v34 = vld [vmem:[%s3991_s1 + $0xc] ss:$16 sps:$4 sm:$0xff]   ;;  %vm1615_vm2 = vcmp.gt.s32.totalorder %v3338_v26, 4  ;;  %v3386_v35 = vld [vmem:[%s3991_s1 + $0x8] ss:$16 sps:$4 sm:$0xff]   ;;  %vm2255_vm3 = vcmp.gt.s32.totalorder %v3338_v26, 6 }
   0xd   :  { %231 = vmatprep.subr.bf16.mxu0 %v3239_v9  ;;  %272 = vmatprep.subr.bf16.mxu1 %v3280_v16  ;;  %v1616_v36 = vsel %vm1615_vm2, 1, %v3154_v1  ;;  %v2256_v38 = vsel %vm2255_vm3, 1, %v3154_v1  ;;  %v28_v39 = vld [vmem:[%s3993_s0] sm:$0xff]  ;;  %v29_v41 = vld [vmem:[%s3993_s0 + $0x8] sm:$0xff]  ;;  %v31_v51 = vld [vmem:[%s3993_s0 + $0x18] sm:$0xff]  ;;  %vm975_vm6 = vcmp.gt.s32.totalorder %v3338_v26, 2 }
   0xe   :  { %339 = vperm.xlu0 %2928, %v337_v30   ;;  %v30_v54 = vld [vmem:[%s3993_s0 + $0x10] sm:$0xff]  ;;  %vm1295_vm7 = vcmp.gt.s32.totalorder %v3338_v26, 3  ;;  %vm1935_vm8 = vcmp.gt.s32.totalorder %v3338_v26, 5  ;;  %vm2575_vm9 = vcmp.gt.s32.totalorder %v3338_v26, 7 }
  0x10   :  { %232 = vmatpush1.bf16.msra.mxu0 %v3257_v12  ;;  %273 = vmatpush1.bf16.msra.mxu1 %v3298_v19 }
  0x11   :  { %233 = vmatprep.subr.bf16.mxu0 %v3262_v13  ;;  %274 = vmatprep.subr.bf16.mxu1 %v3304_v20 }
  0x12   :  { %658 = vperm.xlu0 %2928, %v656_v33  }
  0x14   :  { %234 = vmatpush1.bf16.msra.mxu0 %v3286_v17  ;;  %275 = vmatpush1.bf16.msra.mxu1 %v3322_v23 }
  0x15   :  { %235 = vmatprep.subr.bf16.mxu0 %v3292_v18  ;;  %276 = vmatprep.subr.bf16.mxu1 %v3333_v25 }
  0x16   :  { %1618 = vperm.xlu0 %2928, %v1616_v36  }
  0x18   :  { %236 = vmatpush1.bf16.msra.mxu0 %v3310_v21  ;;  %277 = vmatpush1.bf16.msra.mxu1 %v3348_v28 }
  0x19   :  { %237 = vmatprep.subr.bf16.mxu0 %v3315_v22  ;;  %278 = vmatprep.subr.bf16.mxu1 %v3355_v29 }
  0x1a   :  { %2258 = vperm.xlu0 %2928, %v2256_v38  }
  0x1c   :  { %238 = vmatpush1.bf16.msra.mxu0 %v3327_v24  ;;  %279 = vmatpush1.bf16.msra.mxu1 %v3370_v32 }
  0x1d   :  { %239 = vmatprep.subr.bf16.mxu0 %v3343_v27  ;;  %280 = vmatprep.subr.bf16.mxu1 %v3377_v34 }
  0x20   :  { %240 = vmatpush1.bf16.msra.mxu0 %v3364_v31  ;;  %281 = vmatpush1.bf16.msra.mxu1 %v3386_v35 }
  0x21   :  { %544 = vmatprep.subr.bf16.mxu0 %v3189_v0  ;;  %585 = vmatprep.subr.bf16.mxu1 %v3221_v6 }
  0x23   :  { %258 = vmatmul.mubr.bf16.vlgmr.msra.gmra.mxu0 %v3155_v37  ;;  %299 = vmatmul.mubr.bf16.vlgmr.msra.gmra.mxu1 %v3155_v37 }
  0x24   :  { %545 = vmatpush1.bf16.msra.mxu0 %v3196_v2  ;;  %576 = vmatprep.mubr.bf16.mxu0 %v3154_v1 }
  0x25   :  { %546 = vmatprep.subr.bf16.mxu0 %v3204_v3  ;;  %586 = vmatpush1.bf16.msra.mxu1 %v3226_v7 }
  0x26   :  { %587 = vmatprep.subr.bf16.mxu1 %v3245_v10  ;;  %617 = vmatprep.mubr.bf16.mxu1 %v3154_v1 }
  0x28   :  { %547 = vmatpush1.bf16.msra.mxu0 %v3210_v4 }
  0x29   :  { %548 = vmatprep.subr.bf16.mxu0 %v3216_v5  ;;  %588 = vmatpush1.bf16.msra.mxu1 %v3250_v11 }
  0x2a   :  { %589 = vmatprep.subr.bf16.mxu1 %v3267_v14 }
  0x2c   :  { %549 = vmatpush1.bf16.msra.mxu0 %v3232_v8 }
  0x2d   :  { %550 = vmatprep.subr.bf16.mxu0 %v3239_v9  ;;  %590 = vmatpush1.bf16.msra.mxu1 %v3274_v15 }
  0x2e   :  { %591 = vmatprep.subr.bf16.mxu1 %v3280_v16 }
  0x30   :  { %551 = vmatpush1.bf16.msra.mxu0 %v3257_v12 }
  0x31   :  { %552 = vmatprep.subr.bf16.mxu0 %v3262_v13  ;;  %592 = vmatpush1.bf16.msra.mxu1 %v3298_v19 }
  0x32   :  { %593 = vmatprep.subr.bf16.mxu1 %v3304_v20 }
  0x34   :  { %553 = vmatpush1.bf16.msra.mxu0 %v3286_v17 }
  0x35   :  { %554 = vmatprep.subr.bf16.mxu0 %v3292_v18  ;;  %594 = vmatpush1.bf16.msra.mxu1 %v3322_v23 }
  0x36   :  { %595 = vmatprep.subr.bf16.mxu1 %v3333_v25 }
  0x38   :  { %555 = vmatpush1.bf16.msra.mxu0 %v3310_v21 }
  0x39   :  { %556 = vmatprep.subr.bf16.mxu0 %v3315_v22  ;;  %596 = vmatpush1.bf16.msra.mxu1 %v3348_v28 }
  0x3a   :  { %597 = vmatprep.subr.bf16.mxu1 %v3355_v29 }
  0x3c   :  { %557 = vmatpush1.bf16.msra.mxu0 %v3327_v24 }
  0x3d   :  { %558 = vmatprep.subr.bf16.mxu0 %v3343_v27  ;;  %598 = vmatpush1.bf16.msra.mxu1 %v3370_v32 }
  0x3e   :  { %599 = vmatprep.subr.bf16.mxu1 %v3377_v34 }
  0x40   :  { %559 = vmatpush1.bf16.msra.mxu0 %v3364_v31 }
  0x41   :  { %864 = vmatprep.subr.bf16.mxu0 %v3189_v0  ;;  %600 = vmatpush1.bf16.msra.mxu1 %v3386_v35 }
  0x42   :  { %905 = vmatprep.subr.bf16.mxu1 %v3221_v6 }
  0xe3   :  { %v259_v40 = vpop.f32.mrf.mxu0  ;;  %v300_v48 = vpop.f32.mrf.mxu1 }
  0xe4   :  { %v307_v42 = vadd.f32 %v259_v40, %v28_v39  ;;  %v309_v56 = vadd.f32 %v300_v48, %v30_v54  ;;  %v3446_v40 = vpop.permute.xlu0 %339  ;;  %v1296_v48 = vsel %vm1295_vm7, 1, %v3154_v1 }
  0xe5   :  { %v261_v43 = vpop.f32.mrf.mxu0  ;;  %v302_v50 = vpop.f32.mrf.mxu1  ;;  %vm341_vm4 = vcmp.eq.s32.totalorder %v3446_v40, 1 }
  0xe6   :  { %v2637_v44 = vmul.f32 -1.442695, %v307_v42  ;;  %v308_v45 = vadd.f32 %v261_v43, %v29_v41  ;;  %v310_v55 = vadd.f32 %v302_v50, %v31_v51  ;;  %vm2920_vm5 = vmpackc.low %vm341_vm4, %vm341_vm4 }
  0xe7   :  { %v263_v46 = vpop.f32.mrf.mxu0  ;;  %v304_v52 = vpop.f32.mrf.mxu1 }
  0xe8   :  { %3026 = vpow2.f32 %v2637_v44  ;;  %v2638_v47 = vmul.f32 -1.442695, %v308_v45  ;;  %v2639_v57 = vmul.f32 -1.442695, %v310_v55  ;;  %v2641_v52 = vld [vmem:[%s3993_s0 + $0x28] sm:$0xff] }
  0xe9   :  { %v264_v49 = vpop.f32.mrf.mxu0  ;;  %v305_v53 = vpop.f32.mrf.mxu1 }
  0xea   :  { %3028 = vpow2.f32 %v2638_v47  ;;  %v976_v47 = vsel %vm975_vm6, 1, %v3154_v1  ;;  %v1936_v49 = vsel %vm1935_vm8, 1, %v3154_v1 }
  0xeb   :  { %3030 = vtanh.f32 %v309_v56  ;;  %978 = vperm.xlu1 %2929, %v976_v47  }
  0xec   :  { %3032 = vpow2.f32 %v2639_v57 }
  0xef   :  { %1298 = vperm.xlu1 %2929, %v1296_v48  }
  0xf3   :  { %1938 = vperm.xlu1 %2929, %v1936_v49  }
  0xf5   :  { %v3027_v58 = vpop.eup %3026 }
  0xf6   :  { %v314_v59 = vadd.f32 1.0, %v3027_v58 }
  0xf7   :  { %v3029_v60 = vpop.eup %3028 }
  0xf8   :  { %3034 = vrcp.f32 %v314_v59  ;;  %v320_v61 = vadd.f32 1.0, %v3029_v60  ;;  %v3031_v62 = vpop.eup %3030 }
  0xf9   :  { %v3033_v63 = vpop.eup %3032 }
  0xfa   :  { %3036 = vrcp.f32 %v320_v61  ;;  %v327_v36 = vadd.f32 1.0, %v3033_v63 }
  0xfc   :  { %3038 = vrcp.f32 %v327_v36 }
 0x105   :  { %v3035_v30 = vpop.eup %3034 }
 0x106   :  { %v331_v38 = vmul.f32 %v3035_v30, %v3031_v62  ;;  %v2643_v62 = vld [vmem:[%s3993_s0 + $0x38] sm:$0xff]  ;;  %v2642_v30 = vld [vmem:[%s3993_s0 + $0x30] sm:$0xff] }
 0x107   :  { %v3037_v33 = vpop.eup %3036 }
 0x108   :  { %v330_v37 = vmul.f32 0.0, %v3037_v33 }
 0x109   :  { %v3039_v41 = vpop.eup %3038 }
 0x10a   :  { %v3443_v39 = vadd.f32 %v331_v38, %v330_v37 }
 0x10c   :  { %3040 = vtanh.f32 %v3443_v39  ;;  %v343_v48 = vsel %vm341_vm4, %v3443_v39, 0.0 }
 0x119   :  { %v3041_v42 = vpop.eup %3040 }
 0x11a   :  { %v334_v43 = vmul.f32 %v3041_v42, %v3039_v41 }
 0x11c   :  { %v3454_v44 = vsel %vm341_vm4, %v334_v43, 0.0  ;;  %v2921_v45 = vpack.c.bf16 %v334_v43, %v334_v43 }
 0x11d   :  { %v344_v46 = vpack.c.bf16 %v3454_v44, %v3454_v44 }
 0x11e   :  { %2922 = vmatmul.mubr.msk.bf16.vlgmr.msra.gmra.mxu0 %vm2920_vm5, %v2921_v45  ;;  %2925 = vmatmul.mubr.msk.bf16.vlgmr.msra.gmra.mxu1 %vm2920_vm5, %v2921_v45 }
 0x11f   :  { %345 = vst [vmem:[%s3994_s3] sm:$0xf] %v344_v46  ;;  %865 = vmatpush1.bf16.msra.mxu0 %v3196_v2  ;;  %906 = vmatpush1.bf16.msra.mxu1 %v3226_v7 }
 0x120   :  { %866 = vmatprep.subr.bf16.mxu0 %v3204_v3  ;;  %907 = vmatprep.subr.bf16.mxu1 %v3245_v10 }
 0x121   :  { %896 = vmatprep.mubr.bf16.mxu0 %v3154_v1  ;;  %937 = vmatprep.mubr.bf16.mxu1 %v3154_v1 }
 0x123   :  { %867 = vmatpush1.bf16.msra.mxu0 %v3210_v4  ;;  %908 = vmatpush1.bf16.msra.mxu1 %v3250_v11 }
 0x124   :  { %868 = vmatprep.subr.bf16.mxu0 %v3216_v5  ;;  %909 = vmatprep.subr.bf16.mxu1 %v3267_v14 }
 0x127   :  { %869 = vmatpush1.bf16.msra.mxu0 %v3232_v8  ;;  %910 = vmatpush1.bf16.msra.mxu1 %v3274_v15 }
 0x128   :  { %870 = vmatprep.subr.bf16.mxu0 %v3239_v9  ;;  %911 = vmatprep.subr.bf16.mxu1 %v3280_v16 }
 0x12b   :  { %871 = vmatpush1.bf16.msra.mxu0 %v3257_v12  ;;  %912 = vmatpush1.bf16.msra.mxu1 %v3298_v19 }
 0x12c   :  { %872 = vmatprep.subr.bf16.mxu0 %v3262_v13  ;;  %913 = vmatprep.subr.bf16.mxu1 %v3304_v20 }
 0x12f   :  { %873 = vmatpush1.bf16.msra.mxu0 %v3286_v17  ;;  %914 = vmatpush1.bf16.msra.mxu1 %v3322_v23 }
 0x130   :  { %874 = vmatprep.subr.bf16.mxu0 %v3292_v18  ;;  %915 = vmatprep.subr.bf16.mxu1 %v3333_v25 }
 0x133   :  { %875 = vmatpush1.bf16.msra.mxu0 %v3310_v21  ;;  %916 = vmatpush1.bf16.msra.mxu1 %v3348_v28 }
 0x134   :  { %876 = vmatprep.subr.bf16.mxu0 %v3315_v22  ;;  %917 = vmatprep.subr.bf16.mxu1 %v3355_v29 }
 0x137   :  { %877 = vmatpush1.bf16.msra.mxu0 %v3327_v24  ;;  %918 = vmatpush1.bf16.msra.mxu1 %v3370_v32 }
 0x138   :  { %878 = vmatprep.subr.bf16.mxu0 %v3343_v27  ;;  %919 = vmatprep.subr.bf16.mxu1 %v3377_v34 }
 0x13b   :  { %879 = vmatpush1.bf16.msra.mxu0 %v3364_v31  ;;  %920 = vmatpush1.bf16.msra.mxu1 %v3386_v35 }
 0x13c   :  { %1184 = vmatprep.subr.bf16.mxu0 %v3189_v0  ;;  %1225 = vmatprep.subr.bf16.mxu1 %v3221_v6  ;;  %v2576_v0 = vsel %vm2575_vm9, 1, %v3154_v1  ;;  %v2640_v6 = vld [vmem:[%s3993_s0 + $0x20] sm:$0xff] }
 0x13d   :  { %2578 = vperm.xlu1 %2929, %v2576_v0  }
 0x1de   :  { %v578_v50 = vpop.f32.mrf.mxu0  ;;  %v619_v51 = vpop.f32.mrf.mxu1 }
 0x1df   :  { %v626_v53 = vadd.f32 %v2640_v6, %v578_v50  ;;  %v628_v37 = vadd.f32 %v2642_v30, %v619_v51  ;;  %v659_v50 = vpop.permute.xlu0 %658  ;;  %v3599_v30 = vld [vmem:[%s3991_s1 + $0xe0] ss:$16 sps:$4 sm:$0xff]  }
 0x1e0   :  { %v580_v54 = vpop.f32.mrf.mxu0  ;;  %v621_v55 = vpop.f32.mrf.mxu1  ;;  %vm660_vm10 = vcmp.eq.s32.totalorder %v659_v50, 1  ;;  %v3690_v50 = vld [vmem:[%s3991_s1 + $0x60] ss:$16 sps:$4 sm:$0xff]  }
 0x1e1   :  { %v2676_v56 = vmul.f32 -1.442695, %v626_v53  ;;  %v627_v57 = vadd.f32 %v2641_v52, %v580_v54  ;;  %v629_v63 = vadd.f32 %v2643_v62, %v621_v55  ;;  %v3589_v62 = vld [vmem:[%s3991_s1 + $0xe4] ss:$16 sps:$4 sm:$0xff]  }
 0x1e2   :  { %v582_v26 = vpop.f32.mrf.mxu0  ;;  %v623_v58 = vpop.f32.mrf.mxu1 }
 0x1e3   :  { %3042 = vpow2.f32 %v2676_v56  ;;  %v2677_v59 = vmul.f32 -1.442695, %v627_v57  ;;  %v2678_v33 = vmul.f32 -1.442695, %v629_v63  ;;  %v3594_v63 = vld [vmem:[%s3991_s1 + $0xec] ss:$16 sps:$4 sm:$0xff]  }
 0x1e4   :  { %v583_v60 = vpop.f32.mrf.mxu0  ;;  %v624_v61 = vpop.f32.mrf.mxu1 }
 0x1e5   :  { %3044 = vpow2.f32 %v2677_v59 }
 0x1e6   :  { %3046 = vpow2.f32 %v2678_v33  ;;  %v3604_v33 = vld [vmem:[%s3991_s1 + $0xe8] ss:$16 sps:$4 sm:$0xff]  }
 0x1f0   :  { %v3043_v36 = vpop.eup %3042 }
 0x1f1   :  { %v633_v38 = vadd.f32 1.0, %v3043_v36  ;;  %v3613_v36 = vld [vmem:[%s3991_s1 + $0xc4] ss:$16 sps:$4 sm:$0xff]  }
 0x1f2   :  { %v3045_v41 = vpop.eup %3044 }
 0x1f3   :  { %3048 = vrcp.f32 %v633_v38  ;;  %v639_v42 = vadd.f32 1.0, %v3045_v41  ;;  %v3047_v43 = vpop.eup %3046  ;;  %v3623_v38 = vld [vmem:[%s3991_s1 + $0xc0] ss:$16 sps:$4 sm:$0xff]   ;;  %v3628_v41 = vld [vmem:[%s3991_s1 + $0xc8] ss:$16 sps:$4 sm:$0xff]  }
 0x1f4   :  { %3050 = vtanh.f32 %v628_v37  ;;  %v646_v49 = vadd.f32 1.0, %v3047_v43  ;;  %v3618_v37 = vld [vmem:[%s3991_s1 + $0xcc] ss:$16 sps:$4 sm:$0xff]  }
 0x1f5   :  { %3052 = vrcp.f32 %v639_v42  ;;  %v3637_v42 = vld [vmem:[%s3991_s1 + $0xa4] ss:$16 sps:$4 sm:$0xff]   ;;  %v3642_v43 = vld [vmem:[%s3991_s1 + $0xac] ss:$16 sps:$4 sm:$0xff]  }
 0x1f6   :  { %3054 = vrcp.f32 %v646_v49  ;;  %v3671_v49 = vld [vmem:[%s3991_s1 + $0x80] ss:$16 sps:$4 sm:$0xff]  }
 0x200   :  { %v3049_v45 = vpop.eup %3048 }
 0x201   :  { %v3051_v46 = vpop.eup %3050 }
 0x202   :  { %v3053_v47 = vpop.eup %3052  ;;  %v650_v0 = vmul.f32 %v3051_v46, %v3049_v45  ;;  %v3647_v45 = vld [vmem:[%s3991_s1 + $0xa0] ss:$16 sps:$4 sm:$0xff]   ;;  %v3652_v46 = vld [vmem:[%s3991_s1 + $0xa8] ss:$16 sps:$4 sm:$0xff]  }
 0x203   :  { %v649_v6 = vmul.f32 %v3053_v47, %v343_v48  ;;  %v3055_v53 = vpop.eup %3054  ;;  %v3661_v47 = vld [vmem:[%s3991_s1 + $0x84] ss:$16 sps:$4 sm:$0xff]  }
 0x205   :  { %v651_v51 = vadd.f32 %v650_v0, %v649_v6  ;;  %v3676_v0 = vld [vmem:[%s3991_s1 + $0x88] ss:$16 sps:$4 sm:$0xff]   ;;  %v3683_v6 = vld [vmem:[%s3991_s1 + $0x64] ss:$16 sps:$4 sm:$0xff]  }
 0x207   :  { %3056 = vtanh.f32 %v651_v51  ;;  %v3518_v52 = vsel %vm660_vm10, %v651_v51, %v343_v48  ;;  %v3666_v48 = vld [vmem:[%s3991_s1 + $0x8c] ss:$16 sps:$4 sm:$0xff]   ;;  %v3695_v51 = vld [vmem:[%s3991_s1 + $0x68] ss:$16 sps:$4 sm:$0xff]  }
 0x214   :  { %v3057_v54 = vpop.eup %3056 }
 0x215   :  { %v653_v55 = vmul.f32 %v3057_v54, %v3055_v53  ;;  %v3706_v53 = vld [vmem:[%s3991_s1 + $0x44] ss:$16 sps:$4 sm:$0xff]   ;;  %v3711_v54 = vld [vmem:[%s3991_s1 + $0x4c] ss:$16 sps:$4 sm:$0xff]  }
 0x217   :  { %v3521_v56 = vsel %vm660_vm10, %v653_v55, %v3454_v44  ;;  %v3719_v55 = vld [vmem:[%s3991_s1 + $0x40] ss:$16 sps:$4 sm:$0xff]  }
 0x218   :  { %v663_v40 = vpack.c.bf16 %v3521_v56, %v3521_v56 }
 0x21a   :  { %2679 = vst [vmem:[%s3994_s3 + $0x4] sm:$0xf] %v663_v40  ;;  %897 = vmatmul.mubr.bf16.vlgmr.msra.gmra.mxu0 %v663_v40  ;;  %938 = vmatmul.mubr.bf16.vlgmr.msra.gmra.mxu1 %v663_v40  ;;  %v3731_v40 = vld [vmem:[%s3991_s1 + $0x24] ss:$16 sps:$4 sm:$0xff]  }
 0x21b   :  { %1185 = vmatpush1.bf16.msra.mxu0 %v3196_v2  ;;  %1226 = vmatpush1.bf16.msra.mxu1 %v3226_v7  ;;  %v2680_v2 = vld [vmem:[%s3993_s0 + $0x40] sm:$0xff] }
 0x21c   :  { %1186 = vmatprep.subr.bf16.mxu0 %v3204_v3  ;;  %1227 = vmatprep.subr.bf16.mxu1 %v3245_v10 }
 0x21d   :  { %1216 = vmatprep.mubr.bf16.mxu0 %v3154_v1  ;;  %1257 = vmatprep.mubr.bf16.mxu1 %v3154_v1 }
 0x21f   :  { %1187 = vmatpush1.bf16.msra.mxu0 %v3210_v4  ;;  %1228 = vmatpush1.bf16.msra.mxu1 %v3250_v11 }
 0x220   :  { %1188 = vmatprep.subr.bf16.mxu0 %v3216_v5  ;;  %1229 = vmatprep.subr.bf16.mxu1 %v3267_v14  ;;  %v2681_v5 = vld [vmem:[%s3993_s0 + $0x48] sm:$0xff] }
 0x223   :  { %1189 = vmatpush1.bf16.msra.mxu0 %v3232_v8  ;;  %1230 = vmatpush1.bf16.msra.mxu1 %v3274_v15 }
 0x224   :  { %1190 = vmatprep.subr.bf16.mxu0 %v3239_v9  ;;  %1231 = vmatprep.subr.bf16.mxu1 %v3280_v16 }
 0x227   :  { %1191 = vmatpush1.bf16.msra.mxu0 %v3257_v12  ;;  %1232 = vmatpush1.bf16.msra.mxu1 %v3298_v19  ;;  %v2682_v19 = vld [vmem:[%s3993_s0 + $0x50] sm:$0xff] }
 0x228   :  { %1192 = vmatprep.subr.bf16.mxu0 %v3262_v13  ;;  %1233 = vmatprep.subr.bf16.mxu1 %v3304_v20 }
 0x22b   :  { %1193 = vmatpush1.bf16.msra.mxu0 %v3286_v17  ;;  %1234 = vmatpush1.bf16.msra.mxu1 %v3322_v23  ;;  %v2683_v17 = vld [vmem:[%s3993_s0 + $0x58] sm:$0xff] }
 0x22c   :  { %1194 = vmatprep.subr.bf16.mxu0 %v3292_v18  ;;  %1235 = vmatprep.subr.bf16.mxu1 %v3333_v25 }
 0x22f   :  { %1195 = vmatpush1.bf16.msra.mxu0 %v3310_v21  ;;  %1236 = vmatpush1.bf16.msra.mxu1 %v3348_v28 }
 0x230   :  { %1196 = vmatprep.subr.bf16.mxu0 %v3315_v22  ;;  %1237 = vmatprep.subr.bf16.mxu1 %v3355_v29 }
 0x233   :  { %1197 = vmatpush1.bf16.msra.mxu0 %v3327_v24  ;;  %1238 = vmatpush1.bf16.msra.mxu1 %v3370_v32 }
 0x234   :  { %1198 = vmatprep.subr.bf16.mxu0 %v3343_v27  ;;  %1239 = vmatprep.subr.bf16.mxu1 %v3377_v34 }
 0x237   :  { %1199 = vmatpush1.bf16.msra.mxu0 %v3364_v31  ;;  %1240 = vmatpush1.bf16.msra.mxu1 %v3386_v35  ;;  %v979_v31 = vpop.permute.xlu1 %978 }
 0x238   :  { %vm980_vm11 = vcmp.eq.s32.totalorder %v979_v31, 1  ;;  %1504 = vmatprep.subr.bf16.mxu0 %v3589_v62  ;;  %1545 = vmatprep.subr.bf16.mxu1 %v3594_v63 }
 0x2da   :  { %v898_v3 = vpop.f32.mrf.mxu0  ;;  %v939_v4 = vpop.f32.mrf.mxu1 }
 0x2db   :  { %v946_v7 = vadd.f32 %v2680_v2, %v898_v3  ;;  %v948_v22 = vadd.f32 %v2682_v19, %v939_v4  ;;  %v3736_v2 = vld [vmem:[%s3991_s1 + $0x2c] ss:$16 sps:$4 sm:$0xff]   ;;  %v3743_v3 = vld [vmem:[%s3991_s1 + $0x20] ss:$16 sps:$4 sm:$0xff]   ;;  %v3748_v4 = vld [vmem:[%s3991_s1 + $0x28] ss:$16 sps:$4 sm:$0xff]  }
 0x2dc   :  { %v900_v8 = vpop.f32.mrf.mxu0  ;;  %v941_v9 = vpop.f32.mrf.mxu1 }
 0x2dd   :  { %v2716_v10 = vmul.f32 -1.442695, %v946_v7  ;;  %v947_v11 = vadd.f32 %v2681_v5, %v900_v8  ;;  %v949_v18 = vadd.f32 %v2683_v17, %v941_v9  ;;  %v3755_v5 = vld [vmem:[%s3991_s1 + $0x4] ss:$16 sps:$4 sm:$0xff]   ;;  %v3760_v7 = vld [vmem:[%s3991_s1 + $0xc] ss:$16 sps:$4 sm:$0xff]  }
 0x2de   :  { %v902_v12 = vpop.f32.mrf.mxu0  ;;  %v943_v13 = vpop.f32.mrf.mxu1  ;;  %v3767_v8 = vld [vmem:[%s3991_s1] ss:$16 sps:$4 sm:$0xff]   ;;  %v3772_v9 = vld [vmem:[%s3991_s1 + $0x8] ss:$16 sps:$4 sm:$0xff]  }
 0x2df   :  { %3058 = vpow2.f32 %v2716_v10  ;;  %v2717_v14 = vmul.f32 -1.442695, %v947_v11  ;;  %v2718_v20 = vmul.f32 -1.442695, %v949_v18  ;;  %v2720_v10 = vld [vmem:[%s3993_s0 + $0x60] sm:$0xff]  ;;  %v2721_v13 = vld [vmem:[%s3993_s0 + $0x68] sm:$0xff] }
 0x2e0   :  { %v903_v15 = vpop.f32.mrf.mxu0  ;;  %v944_v16 = vpop.f32.mrf.mxu1 }
 0x2e1   :  { %3060 = vpow2.f32 %v2717_v14 }
 0x2e2   :  { %3062 = vpow2.f32 %v2718_v20 }
 0x2ec   :  { %v3059_v21 = vpop.eup %3058 }
 0x2ed   :  { %v953_v23 = vadd.f32 1.0, %v3059_v21 }
 0x2ee   :  { %v3061_v24 = vpop.eup %3060 }
 0x2ef   :  { %3064 = vrcp.f32 %v953_v23  ;;  %v959_v25 = vadd.f32 1.0, %v3061_v24  ;;  %v3063_v27 = vpop.eup %3062  ;;  %v2723_v24 = vld [vmem:[%s3993_s0 + $0x78] sm:$0xff] }
 0x2f0   :  { %3066 = vtanh.f32 %v948_v22  ;;  %v966_v34 = vadd.f32 1.0, %v3063_v27  ;;  %v2722_v27 = vld [vmem:[%s3993_s0 + $0x70] sm:$0xff] }
 0x2f1   :  { %3068 = vrcp.f32 %v959_v25 }
 0x2f2   :  { %3070 = vrcp.f32 %v966_v34 }
 0x2fc   :  { %v3065_v28 = vpop.eup %3064 }
 0x2fd   :  { %v3067_v29 = vpop.eup %3066 }
 0x2fe   :  { %v3069_v32 = vpop.eup %3068  ;;  %v970_v39 = vmul.f32 %v3067_v29, %v3065_v28 }
 0x2ff   :  { %v969_v35 = vmul.f32 %v3069_v32, %v3518_v52  ;;  %v3071_v26 = vpop.eup %3070 }
 0x301   :  { %v971_v44 = vadd.f32 %v970_v39, %v969_v35 }
 0x303   :  { %3072 = vtanh.f32 %v971_v44  ;;  %v3574_v57 = vsel %vm980_vm11, %v971_v44, %v3518_v52  ;;  %v3700_v52 = vld [vmem:[%s3991_s1 + $0x6c] ss:$16 sps:$4 sm:$0xff]  }
 0x310   :  { %v3073_v58 = vpop.eup %3072 }
 0x311   :  { %v973_v59 = vmul.f32 %v3073_v58, %v3071_v26 }
 0x313   :  { %v3577_v60 = vsel %vm980_vm11, %v973_v59, %v3521_v56  ;;  %v3724_v56 = vld [vmem:[%s3991_s1 + $0x48] ss:$16 sps:$4 sm:$0xff]  }
 0x314   :  { %v983_v61 = vpack.c.bf16 %v3577_v60, %v3577_v60 }
 0x316   :  { %2719 = vst [vmem:[%s3994_s3 + $0x8] sm:$0xf] %v983_v61  ;;  %1217 = vmatmul.mubr.bf16.vlgmr.msra.gmra.mxu0 %v983_v61  ;;  %1258 = vmatmul.mubr.bf16.vlgmr.msra.gmra.mxu1 %v983_v61 }
 0x317   :  { %1536 = vmatprep.mubr.bf16.mxu0 %v3154_v1  ;;  %1577 = vmatprep.mubr.bf16.mxu1 %v3154_v1 }
 0x318   :  { %1505 = vmatpush1.bf16.msra.mxu0 %v3599_v30  ;;  %1546 = vmatpush1.bf16.msra.mxu1 %v3604_v33 }
 0x319   :  { %1506 = vmatprep.subr.bf16.mxu0 %v3613_v36  ;;  %1547 = vmatprep.subr.bf16.mxu1 %v3618_v37 }
 0x31c   :  { %1507 = vmatpush1.bf16.msra.mxu0 %v3623_v38  ;;  %1548 = vmatpush1.bf16.msra.mxu1 %v3628_v41 }
 0x31d   :  { %1508 = vmatprep.subr.bf16.mxu0 %v3637_v42  ;;  %1549 = vmatprep.subr.bf16.mxu1 %v3642_v43 }
 0x320   :  { %1509 = vmatpush1.bf16.msra.mxu0 %v3647_v45  ;;  %1550 = vmatpush1.bf16.msra.mxu1 %v3652_v46 }
 0x321   :  { %1510 = vmatprep.subr.bf16.mxu0 %v3661_v47  ;;  %1551 = vmatprep.subr.bf16.mxu1 %v3666_v48 }
 0x324   :  { %1511 = vmatpush1.bf16.msra.mxu0 %v3671_v49  ;;  %1552 = vmatpush1.bf16.msra.mxu1 %v3676_v0 }
 0x325   :  { %1512 = vmatprep.subr.bf16.mxu0 %v3683_v6  ;;  %1553 = vmatprep.subr.bf16.mxu1 %v3700_v52 }
 0x328   :  { %1513 = vmatpush1.bf16.msra.mxu0 %v3690_v50  ;;  %1554 = vmatpush1.bf16.msra.mxu1 %v3695_v51 }
 0x329   :  { %1514 = vmatprep.subr.bf16.mxu0 %v3706_v53  ;;  %1555 = vmatprep.subr.bf16.mxu1 %v3711_v54 }
 0x32c   :  { %1515 = vmatpush1.bf16.msra.mxu0 %v3719_v55  ;;  %1556 = vmatpush1.bf16.msra.mxu1 %v3724_v56 }
 0x32d   :  { %1516 = vmatprep.subr.bf16.mxu0 %v3731_v40  ;;  %1557 = vmatprep.subr.bf16.mxu1 %v3736_v2 }
 0x330   :  { %1517 = vmatpush1.bf16.msra.mxu0 %v3743_v3  ;;  %1558 = vmatpush1.bf16.msra.mxu1 %v3748_v4 }
 0x331   :  { %1518 = vmatprep.subr.bf16.mxu0 %v3755_v5  ;;  %1559 = vmatprep.subr.bf16.mxu1 %v3760_v7 }
 0x334   :  { %1519 = vmatpush1.bf16.msra.mxu0 %v3767_v8  ;;  %1560 = vmatpush1.bf16.msra.mxu1 %v3772_v9 }
 0x335   :  { %1824 = vmatprep.subr.bf16.mxu0 %v3589_v62  ;;  %1865 = vmatprep.subr.bf16.mxu1 %v3594_v63 }
 0x3d6   :  { %v1218_v11 = vpop.f32.mrf.mxu0  ;;  %v1259_v12 = vpop.f32.mrf.mxu1 }
 0x3d7   :  { %v1266_v14 = vadd.f32 %v2720_v10, %v1218_v11  ;;  %v1268_v31 = vadd.f32 %v2722_v27, %v1259_v12  ;;  %v1299_v11 = vpop.permute.xlu1 %1298 }
 0x3d8   :  { %v1220_v15 = vpop.f32.mrf.mxu0  ;;  %v1261_v16 = vpop.f32.mrf.mxu1  ;;  %vm1300_vm12 = vcmp.eq.s32.totalorder %v1299_v11, 1 }
 0x3d9   :  { %v2756_v17 = vmul.f32 -1.442695, %v1266_v14  ;;  %v1267_v18 = vadd.f32 %v2721_v13, %v1220_v15  ;;  %v1269_v25 = vadd.f32 %v2723_v24, %v1261_v16 }
 0x3da   :  { %v1222_v19 = vpop.f32.mrf.mxu0  ;;  %v1263_v20 = vpop.f32.mrf.mxu1 }
 0x3db   :  { %3074 = vpow2.f32 %v2756_v17  ;;  %v2757_v21 = vmul.f32 -1.442695, %v1267_v18  ;;  %v2758_v28 = vmul.f32 -1.442695, %v1269_v25  ;;  %v2761_v20 = vld [vmem:[%s3993_s0 + $0x88] sm:$0xff] }
 0x3dc   :  { %v1223_v22 = vpop.f32.mrf.mxu0  ;;  %v1264_v23 = vpop.f32.mrf.mxu1 }
 0x3dd   :  { %3076 = vpow2.f32 %v2757_v21 }
 0x3de   :  { %3078 = vpow2.f32 %v2758_v28 }
 0x3e8   :  { %v3075_v29 = vpop.eup %3074 }
 0x3e9   :  { %v1273_v32 = vadd.f32 1.0, %v3075_v29 }
 0x3ea   :  { %v3077_v34 = vpop.eup %3076 }
 0x3eb   :  { %3080 = vrcp.f32 %v1273_v32  ;;  %v1279_v35 = vadd.f32 1.0, %v3077_v34  ;;  %v3079_v39 = vpop.eup %3078  ;;  %v2763_v34 = vld [vmem:[%s3993_s0 + $0x98] sm:$0xff] }
 0x3ec   :  { %3082 = vtanh.f32 %v1268_v31  ;;  %v1286_v59 = vadd.f32 1.0, %v3079_v39  ;;  %v2762_v39 = vld [vmem:[%s3993_s0 + $0x90] sm:$0xff] }
 0x3ed   :  { %3084 = vrcp.f32 %v1279_v35 }
 0x3ee   :  { %3086 = vrcp.f32 %v1286_v59 }
 0x3f8   :  { %v3081_v44 = vpop.eup %3080 }
 0x3f9   :  { %v3083_v26 = vpop.eup %3082 }
 0x3fa   :  { %v3085_v58 = vpop.eup %3084  ;;  %v1290_v61 = vmul.f32 %v3083_v26, %v3081_v44 }
 0x3fb   :  { %v1289_v10 = vmul.f32 %v3085_v58, %v3574_v57  ;;  %v3087_v14 = vpop.eup %3086 }
 0x3fd   :  { %v1291_v13 = vadd.f32 %v1290_v61, %v1289_v10 }
 0x3ff   :  { %3088 = vtanh.f32 %v1291_v13  ;;  %v3794_v12 = vsel %vm1300_vm12, %v1291_v13, %v3574_v57  ;;  %v2760_v57 = vld [vmem:[%s3993_s0 + $0x80] sm:$0xff] }
 0x40c   :  { %v3089_v15 = vpop.eup %3088 }
 0x40d   :  { %v1293_v16 = vmul.f32 %v3089_v15, %v3087_v14 }
 0x40f   :  { %v3797_v17 = vsel %vm1300_vm12, %v1293_v16, %v3577_v60 }
 0x410   :  { %v1303_v18 = vpack.c.bf16 %v3797_v17, %v3797_v17 }
 0x412   :  { %2759 = vst [vmem:[%s3994_s3 + $0xc] sm:$0xf] %v1303_v18  ;;  %1537 = vmatmul.mubr.bf16.vlgmr.msra.gmra.mxu0 %v1303_v18  ;;  %1578 = vmatmul.mubr.bf16.vlgmr.msra.gmra.mxu1 %v1303_v18 }
 0x413   :  { %1825 = vmatpush1.bf16.msra.mxu0 %v3599_v30  ;;  %1866 = vmatpush1.bf16.msra.mxu1 %v3604_v33 }
 0x414   :  { %1826 = vmatprep.subr.bf16.mxu0 %v3613_v36  ;;  %1867 = vmatprep.subr.bf16.mxu1 %v3618_v37 }
 0x415   :  { %1856 = vmatprep.mubr.bf16.mxu0 %v3154_v1  ;;  %1897 = vmatprep.mubr.bf16.mxu1 %v3154_v1 }
 0x417   :  { %1827 = vmatpush1.bf16.msra.mxu0 %v3623_v38  ;;  %1868 = vmatpush1.bf16.msra.mxu1 %v3628_v41 }
 0x418   :  { %1828 = vmatprep.subr.bf16.mxu0 %v3637_v42  ;;  %1869 = vmatprep.subr.bf16.mxu1 %v3642_v43 }
 0x41b   :  { %1829 = vmatpush1.bf16.msra.mxu0 %v3647_v45  ;;  %1870 = vmatpush1.bf16.msra.mxu1 %v3652_v46 }
 0x41c   :  { %1830 = vmatprep.subr.bf16.mxu0 %v3661_v47  ;;  %1871 = vmatprep.subr.bf16.mxu1 %v3666_v48 }
 0x41f   :  { %1831 = vmatpush1.bf16.msra.mxu0 %v3671_v49  ;;  %1872 = vmatpush1.bf16.msra.mxu1 %v3676_v0 }
 0x420   :  { %1832 = vmatprep.subr.bf16.mxu0 %v3683_v6  ;;  %1873 = vmatprep.subr.bf16.mxu1 %v3700_v52 }
 0x423   :  { %1833 = vmatpush1.bf16.msra.mxu0 %v3690_v50  ;;  %1874 = vmatpush1.bf16.msra.mxu1 %v3695_v51 }
 0x424   :  { %1834 = vmatprep.subr.bf16.mxu0 %v3706_v53  ;;  %1875 = vmatprep.subr.bf16.mxu1 %v3711_v54 }
 0x427   :  { %1835 = vmatpush1.bf16.msra.mxu0 %v3719_v55  ;;  %1876 = vmatpush1.bf16.msra.mxu1 %v3724_v56 }
 0x428   :  { %1836 = vmatprep.subr.bf16.mxu0 %v3731_v40  ;;  %1877 = vmatprep.subr.bf16.mxu1 %v3736_v2 }
 0x42b   :  { %1837 = vmatpush1.bf16.msra.mxu0 %v3743_v3  ;;  %1878 = vmatpush1.bf16.msra.mxu1 %v3748_v4 }
 0x42c   :  { %1838 = vmatprep.subr.bf16.mxu0 %v3755_v5  ;;  %1879 = vmatprep.subr.bf16.mxu1 %v3760_v7 }
 0x42f   :  { %1839 = vmatpush1.bf16.msra.mxu0 %v3767_v8  ;;  %1880 = vmatpush1.bf16.msra.mxu1 %v3772_v9 }
 0x430   :  { %2144 = vmatprep.subr.bf16.mxu0 %v3589_v62  ;;  %2185 = vmatprep.subr.bf16.mxu1 %v3594_v63 }
 0x4d2   :  { %v1538_v60 = vpop.f32.mrf.mxu0  ;;  %v1579_v19 = vpop.f32.mrf.mxu1 }
 0x4d3   :  { %v1586_v21 = vadd.f32 %v2760_v57, %v1538_v60  ;;  %v1588_v58 = vadd.f32 %v2762_v39, %v1579_v19  ;;  %v1619_v60 = vpop.permute.xlu0 %1618 }
 0x4d4   :  { %v1540_v22 = vpop.f32.mrf.mxu0  ;;  %v1581_v23 = vpop.f32.mrf.mxu1  ;;  %vm1620_vm13 = vcmp.eq.s32.totalorder %v1619_v60, 1 }
 0x4d5   :  { %v2796_v24 = vmul.f32 -1.442695, %v1586_v21  ;;  %v1587_v25 = vadd.f32 %v2761_v20, %v1540_v22  ;;  %v1589_v35 = vadd.f32 %v2763_v34, %v1581_v23 }
 0x4d6   :  { %v1542_v27 = vpop.f32.mrf.mxu0  ;;  %v1583_v28 = vpop.f32.mrf.mxu1 }
 0x4d7   :  { %3090 = vpow2.f32 %v2796_v24  ;;  %v2797_v29 = vmul.f32 -1.442695, %v1587_v25  ;;  %v2798_v44 = vmul.f32 -1.442695, %v1589_v35  ;;  %v2801_v28 = vld [vmem:[%s3993_s0 + $0xa8] sm:$0xff] }
 0x4d8   :  { %v1543_v31 = vpop.f32.mrf.mxu0  ;;  %v1584_v32 = vpop.f32.mrf.mxu1 }
 0x4d9   :  { %3092 = vpow2.f32 %v2797_v29 }
 0x4da   :  { %3094 = vpow2.f32 %v2798_v44 }
 0x4e4   :  { %v3091_v26 = vpop.eup %3090 }
 0x4e5   :  { %v1593_v59 = vadd.f32 1.0, %v3091_v26 }
 0x4e6   :  { %v3093_v61 = vpop.eup %3092 }
 0x4e7   :  { %3096 = vrcp.f32 %v1593_v59  ;;  %v1599_v10 = vadd.f32 1.0, %v3093_v61  ;;  %v3095_v11 = vpop.eup %3094  ;;  %v2802_v61 = vld [vmem:[%s3993_s0 + $0xb0] sm:$0xff] }
 0x4e8   :  { %3098 = vtanh.f32 %v1588_v58  ;;  %v1606_v16 = vadd.f32 1.0, %v3095_v11  ;;  %v2803_v58 = vld [vmem:[%s3993_s0 + $0xb8] sm:$0xff] }
 0x4e9   :  { %3100 = vrcp.f32 %v1599_v10 }
 0x4ea   :  { %3102 = vrcp.f32 %v1606_v16 }
 0x4f4   :  { %v3097_v13 = vpop.eup %3096 }
 0x4f5   :  { %v3099_v14 = vpop.eup %3098 }
 0x4f6   :  { %v3101_v15 = vpop.eup %3100  ;;  %v1610_v18 = vmul.f32 %v3099_v14, %v3097_v13 }
 0x4f7   :  { %v1609_v57 = vmul.f32 %v3101_v15, %v3794_v12  ;;  %v3103_v21 = vpop.eup %3102 }
 0x4f9   :  { %v1611_v20 = vadd.f32 %v1610_v18, %v1609_v57 }
 0x4fb   :  { %3104 = vtanh.f32 %v1611_v20  ;;  %v3852_v19 = vsel %vm1620_vm13, %v1611_v20, %v3794_v12  ;;  %v2800_v12 = vld [vmem:[%s3993_s0 + $0xa0] sm:$0xff] }
 0x508   :  { %v3105_v22 = vpop.eup %3104 }
 0x509   :  { %v1613_v23 = vmul.f32 %v3105_v22, %v3103_v21 }
 0x50b   :  { %v3855_v24 = vsel %vm1620_vm13, %v1613_v23, %v3797_v17 }
 0x50c   :  { %v1623_v25 = vpack.c.bf16 %v3855_v24, %v3855_v24 }
 0x50e   :  { %2799 = vst [vmem:[%s3994_s3 + $0x10] sm:$0xf] %v1623_v25  ;;  %1857 = vmatmul.mubr.bf16.vlgmr.msra.gmra.mxu0 %v1623_v25  ;;  %1898 = vmatmul.mubr.bf16.vlgmr.msra.gmra.mxu1 %v1623_v25  ;;  %v1939_v25 = vpop.permute.xlu1 %1938 }
 0x50f   :  { %2145 = vmatpush1.bf16.msra.mxu0 %v3599_v30  ;;  %2186 = vmatpush1.bf16.msra.mxu1 %v3604_v33  ;;  %vm1940_vm14 = vcmp.eq.s32.totalorder %v1939_v25, 1 }
 0x510   :  { %2146 = vmatprep.subr.bf16.mxu0 %v3613_v36  ;;  %2187 = vmatprep.subr.bf16.mxu1 %v3618_v37 }
 0x511   :  { %2176 = vmatprep.mubr.bf16.mxu0 %v3154_v1  ;;  %2217 = vmatprep.mubr.bf16.mxu1 %v3154_v1 }
 0x513   :  { %2147 = vmatpush1.bf16.msra.mxu0 %v3623_v38  ;;  %2188 = vmatpush1.bf16.msra.mxu1 %v3628_v41 }
 0x514   :  { %2148 = vmatprep.subr.bf16.mxu0 %v3637_v42  ;;  %2189 = vmatprep.subr.bf16.mxu1 %v3642_v43 }
 0x517   :  { %2149 = vmatpush1.bf16.msra.mxu0 %v3647_v45  ;;  %2190 = vmatpush1.bf16.msra.mxu1 %v3652_v46 }
 0x518   :  { %2150 = vmatprep.subr.bf16.mxu0 %v3661_v47  ;;  %2191 = vmatprep.subr.bf16.mxu1 %v3666_v48 }
 0x51b   :  { %2151 = vmatpush1.bf16.msra.mxu0 %v3671_v49  ;;  %2192 = vmatpush1.bf16.msra.mxu1 %v3676_v0 }
 0x51c   :  { %2152 = vmatprep.subr.bf16.mxu0 %v3683_v6  ;;  %2193 = vmatprep.subr.bf16.mxu1 %v3700_v52 }
 0x51f   :  { %2153 = vmatpush1.bf16.msra.mxu0 %v3690_v50  ;;  %2194 = vmatpush1.bf16.msra.mxu1 %v3695_v51 }
 0x520   :  { %2154 = vmatprep.subr.bf16.mxu0 %v3706_v53  ;;  %2195 = vmatprep.subr.bf16.mxu1 %v3711_v54 }
 0x523   :  { %2155 = vmatpush1.bf16.msra.mxu0 %v3719_v55  ;;  %2196 = vmatpush1.bf16.msra.mxu1 %v3724_v56 }
 0x524   :  { %2156 = vmatprep.subr.bf16.mxu0 %v3731_v40  ;;  %2197 = vmatprep.subr.bf16.mxu1 %v3736_v2 }
 0x527   :  { %2157 = vmatpush1.bf16.msra.mxu0 %v3743_v3  ;;  %2198 = vmatpush1.bf16.msra.mxu1 %v3748_v4 }
 0x528   :  { %2158 = vmatprep.subr.bf16.mxu0 %v3755_v5  ;;  %2199 = vmatprep.subr.bf16.mxu1 %v3760_v7 }
 0x52b   :  { %2159 = vmatpush1.bf16.msra.mxu0 %v3767_v8  ;;  %2200 = vmatpush1.bf16.msra.mxu1 %v3772_v9 }
 0x52c   :  { %2464 = vmatprep.subr.bf16.mxu0 %v3589_v62  ;;  %2505 = vmatprep.subr.bf16.mxu1 %v3594_v63 }
 0x5ce   :  { %v1858_v17 = vpop.f32.mrf.mxu0  ;;  %v1899_v27 = vpop.f32.mrf.mxu1 }
 0x5cf   :  { %v1906_v29 = vadd.f32 %v2800_v12, %v1858_v17  ;;  %v1908_v13 = vadd.f32 %v2802_v61, %v1899_v27 }
 0x5d0   :  { %v1860_v31 = vpop.f32.mrf.mxu0  ;;  %v1901_v32 = vpop.f32.mrf.mxu1 }
 0x5d1   :  { %v2836_v34 = vmul.f32 -1.442695, %v1906_v29  ;;  %v1907_v35 = vadd.f32 %v2801_v28, %v1860_v31  ;;  %v1909_v59 = vadd.f32 %v2803_v58, %v1901_v32 }
 0x5d2   :  { %v1862_v39 = vpop.f32.mrf.mxu0  ;;  %v1903_v44 = vpop.f32.mrf.mxu1 }
 0x5d3   :  { %3106 = vpow2.f32 %v2836_v34  ;;  %v2837_v62 = vmul.f32 -1.442695, %v1907_v35  ;;  %v2838_v10 = vmul.f32 -1.442695, %v1909_v59  ;;  %v2881_v59 = vld [vmem:[%s3993_s0 + $0xe8] sm:$0xff] }
 0x5d4   :  { %v1863_v63 = vpop.f32.mrf.mxu0  ;;  %v1904_v26 = vpop.f32.mrf.mxu1 }
 0x5d5   :  { %3108 = vpow2.f32 %v2837_v62  ;;  %v2880_v63 = vld [vmem:[%s3993_s0 + $0xe0] sm:$0xff] }
 0x5d6   :  { %3110 = vpow2.f32 %v2838_v10 }
 0x5e0   :  { %v3107_v11 = vpop.eup %3106 }
 0x5e1   :  { %v1913_v14 = vadd.f32 1.0, %v3107_v11 }
 0x5e2   :  { %v3109_v15 = vpop.eup %3108 }
 0x5e3   :  { %3112 = vrcp.f32 %v1913_v14  ;;  %v1919_v16 = vadd.f32 1.0, %v3109_v15  ;;  %v3111_v18 = vpop.eup %3110 }
 0x5e4   :  { %3114 = vtanh.f32 %v1908_v13  ;;  %v1926_v21 = vadd.f32 1.0, %v3111_v18 }
 0x5e5   :  { %3116 = vrcp.f32 %v1919_v16 }
 0x5e6   :  { %3118 = vrcp.f32 %v1926_v21 }
 0x5f0   :  { %v3113_v57 = vpop.eup %3112 }
 0x5f1   :  { %v3115_v60 = vpop.eup %3114 }
 0x5f2   :  { %v3117_v20 = vpop.eup %3116  ;;  %v1930_v22 = vmul.f32 %v3115_v60, %v3113_v57 }
 0x5f3   :  { %v1929_v23 = vmul.f32 %v3117_v20, %v3852_v19  ;;  %v3119_v27 = vpop.eup %3118  ;;  %v2883_v20 = vld [vmem:[%s3993_s0 + $0xf8] sm:$0xff] }
 0x5f5   :  { %v1931_v12 = vadd.f32 %v1930_v22, %v1929_v23  ;;  %v2882_v22 = vld [vmem:[%s3993_s0 + $0xf0] sm:$0xff] }
 0x5f7   :  { %3120 = vtanh.f32 %v1931_v12  ;;  %v3910_v17 = vsel %vm1940_vm14, %v1931_v12, %v3852_v19 }
 0x604   :  { %v3121_v28 = vpop.eup %3120 }
 0x605   :  { %v1933_v29 = vmul.f32 %v3121_v28, %v3119_v27 }
 0x607   :  { %v3913_v31 = vsel %vm1940_vm14, %v1933_v29, %v3855_v24 }
 0x608   :  { %v1943_v32 = vpack.c.bf16 %v3913_v31, %v3913_v31 }
 0x60a   :  { %2839 = vst [vmem:[%s3994_s3 + $0x14] sm:$0xf] %v1943_v32  ;;  %2177 = vmatmul.mubr.bf16.vlgmr.msra.gmra.mxu0 %v1943_v32  ;;  %2218 = vmatmul.mubr.bf16.vlgmr.msra.gmra.mxu1 %v1943_v32 }
 0x60b   :  { %2465 = vmatpush1.bf16.msra.mxu0 %v3599_v30  ;;  %2506 = vmatpush1.bf16.msra.mxu1 %v3604_v33 }
 0x60c   :  { %2466 = vmatprep.subr.bf16.mxu0 %v3613_v36  ;;  %2507 = vmatprep.subr.bf16.mxu1 %v3618_v37  ;;  %v2841_v36 = vld [vmem:[%s3993_s0 + $0xc8] sm:$0xff] }
 0x60d   :  { %2496 = vmatprep.mubr.bf16.mxu0 %v3154_v1  ;;  %2537 = vmatprep.mubr.bf16.mxu1 %v3154_v1  ;;  %v2840_v1 = vld [vmem:[%s3993_s0 + $0xc0] sm:$0xff] }
 0x60f   :  { %2467 = vmatpush1.bf16.msra.mxu0 %v3623_v38  ;;  %2508 = vmatpush1.bf16.msra.mxu1 %v3628_v41 }
 0x610   :  { %2468 = vmatprep.subr.bf16.mxu0 %v3637_v42  ;;  %2509 = vmatprep.subr.bf16.mxu1 %v3642_v43 }
 0x613   :  { %2469 = vmatpush1.bf16.msra.mxu0 %v3647_v45  ;;  %2510 = vmatpush1.bf16.msra.mxu1 %v3652_v46 }
 0x614   :  { %2470 = vmatprep.subr.bf16.mxu0 %v3661_v47  ;;  %2511 = vmatprep.subr.bf16.mxu1 %v3666_v48 }
 0x617   :  { %2471 = vmatpush1.bf16.msra.mxu0 %v3671_v49  ;;  %2512 = vmatpush1.bf16.msra.mxu1 %v3676_v0  ;;  %v2843_v0 = vld [vmem:[%s3993_s0 + $0xd8] sm:$0xff] }
 0x618   :  { %2472 = vmatprep.subr.bf16.mxu0 %v3683_v6  ;;  %2513 = vmatprep.subr.bf16.mxu1 %v3700_v52 }
 0x61b   :  { %2473 = vmatpush1.bf16.msra.mxu0 %v3690_v50  ;;  %2514 = vmatpush1.bf16.msra.mxu1 %v3695_v51  ;;  %v2842_v50 = vld [vmem:[%s3993_s0 + $0xd0] sm:$0xff] }
 0x61c   :  { %2474 = vmatprep.subr.bf16.mxu0 %v3706_v53  ;;  %2515 = vmatprep.subr.bf16.mxu1 %v3711_v54 }
 0x61f   :  { %2475 = vmatpush1.bf16.msra.mxu0 %v3719_v55  ;;  %2516 = vmatpush1.bf16.msra.mxu1 %v3724_v56 }
 0x620   :  { %2476 = vmatprep.subr.bf16.mxu0 %v3731_v40  ;;  %2517 = vmatprep.subr.bf16.mxu1 %v3736_v2 }
 0x623   :  { %2477 = vmatpush1.bf16.msra.mxu0 %v3743_v3  ;;  %2518 = vmatpush1.bf16.msra.mxu1 %v3748_v4 }
 0x624   :  { %2478 = vmatprep.subr.bf16.mxu0 %v3755_v5  ;;  %2519 = vmatprep.subr.bf16.mxu1 %v3760_v7  ;;  %v2259_v7 = vpop.permute.xlu0 %2258 }
 0x625   :  { %vm2260_vm15 = vcmp.eq.s32.totalorder %v2259_v7, 1 }
 0x627   :  { %2479 = vmatpush1.bf16.msra.mxu0 %v3767_v8  ;;  %2520 = vmatpush1.bf16.msra.mxu1 %v3772_v9 }
 0x6ca   :  { %v2178_v30 = vpop.f32.mrf.mxu0  ;;  %v2219_v33 = vpop.f32.mrf.mxu1 }
 0x6cb   :  { %v2226_v37 = vadd.f32 %v2840_v1, %v2178_v30  ;;  %v2228_v53 = vadd.f32 %v2842_v50, %v2219_v33  ;;  %v2579_v33 = vpop.permute.xlu1 %2578 }
 0x6cc   :  { %v2180_v38 = vpop.f32.mrf.mxu0  ;;  %v2221_v41 = vpop.f32.mrf.mxu1  ;;  %vm2580_vm0 = vcmp.eq.s32.totalorder %v2579_v33, 1 }
 0x6cd   :  { %v2876_v42 = vmul.f32 -1.442695, %v2226_v37  ;;  %v2227_v43 = vadd.f32 %v2841_v36, %v2180_v38  ;;  %v2229_v6 = vadd.f32 %v2843_v0, %v2221_v41 }
 0x6ce   :  { %v2182_v45 = vpop.f32.mrf.mxu0  ;;  %v2223_v46 = vpop.f32.mrf.mxu1 }
 0x6cf   :  { %3122 = vpow2.f32 %v2876_v42  ;;  %v2877_v47 = vmul.f32 -1.442695, %v2227_v43  ;;  %v2878_v51 = vmul.f32 -1.442695, %v2229_v6 }
 0x6d0   :  { %v2183_v48 = vpop.f32.mrf.mxu0  ;;  %v2224_v49 = vpop.f32.mrf.mxu1 }
 0x6d1   :  { %3124 = vpow2.f32 %v2877_v47 }
 0x6d2   :  { %3126 = vpow2.f32 %v2878_v51 }
 0x6dc   :  { %v3123_v52 = vpop.eup %3122 }
 0x6dd   :  { %v2233_v54 = vadd.f32 1.0, %v3123_v52 }
 0x6de   :  { %v3125_v55 = vpop.eup %3124 }
 0x6df   :  { %3128 = vrcp.f32 %v2233_v54  ;;  %v2239_v56 = vadd.f32 1.0, %v3125_v55  ;;  %v3127_v40 = vpop.eup %3126 }
 0x6e0   :  { %3130 = vtanh.f32 %v2228_v53  ;;  %v2246_v5 = vadd.f32 1.0, %v3127_v40 }
 0x6e1   :  { %3132 = vrcp.f32 %v2239_v56 }
 0x6e2   :  { %3134 = vrcp.f32 %v2246_v5 }
 0x6ec   :  { %v3129_v2 = vpop.eup %3128 }
 0x6ed   :  { %v3131_v3 = vpop.eup %3130 }
 0x6ee   :  { %v3133_v4 = vpop.eup %3132  ;;  %v2250_v8 = vmul.f32 %v3131_v3, %v3129_v2 }
 0x6ef   :  { %v2249_v9 = vmul.f32 %v3133_v4, %v3910_v17  ;;  %v3135_v34 = vpop.eup %3134 }
 0x6f1   :  { %v2251_v19 = vadd.f32 %v2250_v8, %v2249_v9 }
 0x6f3   :  { %3136 = vtanh.f32 %v2251_v19  ;;  %v2262_v24 = vsel %vm2260_vm15, %v2251_v19, %v3910_v17 }
 0x700   :  { %v3137_v35 = vpop.eup %3136 }
 0x701   :  { %v2253_v39 = vmul.f32 %v3137_v35, %v3135_v34 }
 0x703   :  { %v2261_v44 = vsel %vm2260_vm15, %v2253_v39, %v3913_v31 }
 0x704   :  { %v2263_v62 = vpack.c.bf16 %v2261_v44, %v2261_v44 }
 0x706   :  { %2879 = vst [vmem:[%s3994_s3 + $0x18] sm:$0xf] %v2263_v62  ;;  %2497 = vmatmul.mubr.bf16.vlgmr.msra.gmra.mxu0 %v2263_v62  ;;  %2538 = vmatmul.mubr.bf16.vlgmr.msra.gmra.mxu1 %v2263_v62 }
 0x7c6   :  { %v2498_v26 = vpop.f32.mrf.mxu0  ;;  %v2539_v58 = vpop.f32.mrf.mxu1 }
 0x7c7   :  { %v2546_v61 = vadd.f32 %v2880_v63, %v2498_v26  ;;  %v2548_v12 = vadd.f32 %v2882_v22, %v2539_v58 }
 0x7c8   :  { %v2500_v10 = vpop.f32.mrf.mxu0  ;;  %v2541_v11 = vpop.f32.mrf.mxu1 }
 0x7c9   :  { %v2916_v13 = vmul.f32 -1.442695, %v2546_v61  ;;  %v2547_v14 = vadd.f32 %v2881_v59, %v2500_v10  ;;  %v2549_v21 = vadd.f32 %v2883_v20, %v2541_v11 }
 0x7ca   :  { %v2502_v15 = vpop.f32.mrf.mxu0  ;;  %v2543_v16 = vpop.f32.mrf.mxu1 }
 0x7cb   :  { %3138 = vpow2.f32 %v2916_v13  ;;  %v2917_v18 = vmul.f32 -1.442695, %v2547_v14  ;;  %v2918_v23 = vmul.f32 -1.442695, %v2549_v21 }
 0x7cc   :  { %v2503_v57 = vpop.f32.mrf.mxu0  ;;  %v2544_v60 = vpop.f32.mrf.mxu1 }
 0x7cd   :  { %3140 = vpow2.f32 %v2917_v18 }
 0x7ce   :  { %3142 = vpow2.f32 %v2918_v23 }
 0x7d8   :  { %v3139_v25 = vpop.eup %3138 }
 0x7d9   :  { %v2553_v17 = vadd.f32 1.0, %v3139_v25 }
 0x7da   :  { %v3141_v27 = vpop.eup %3140 }
 0x7db   :  { %3144 = vrcp.f32 %v2553_v17  ;;  %v2559_v28 = vadd.f32 1.0, %v3141_v27  ;;  %v3143_v29 = vpop.eup %3142 }
 0x7dc   :  { %3146 = vtanh.f32 %v2548_v12  ;;  %v2566_v30 = vadd.f32 1.0, %v3143_v29 }
 0x7dd   :  { %3148 = vrcp.f32 %v2559_v28 }
 0x7de   :  { %3150 = vrcp.f32 %v2566_v30 }
 0x7e8   :  { %v3145_v31 = vpop.eup %3144 }
 0x7e9   :  { %v3147_v32 = vpop.eup %3146 }
 0x7ea   :  { %v3149_v1 = vpop.eup %3148  ;;  %v2570_v36 = vmul.f32 %v3147_v32, %v3145_v31 }
 0x7eb   :  { %v2569_v37 = vmul.f32 %v3149_v1, %v2262_v24  ;;  %v3151_v42 = vpop.eup %3150 }
 0x7ed   :  { %v2571_v38 = vadd.f32 %v2570_v36, %v2569_v37 }
 0x7ef   :  { %3152 = vtanh.f32 %v2571_v38  ;;  %v2582_v41 = vsel %vm2580_vm0, %v2571_v38, %v2262_v24 }
 0x7f0   :  { %2592 = vst [vmem:[%s3995_s5] sm:$0xff] %v2582_v41 }
 0x7fc   :  { %v3153_v43 = vpop.eup %3152 }
 0x7fd   :  { %v2573_v45 = vmul.f32 %v3153_v43, %v3151_v42 }
 0x7ff   :  { %v2581_v46 = vsel %vm2580_vm0, %v2573_v45, %v2261_v44 }
 0x800   :  { %v2583_v47 = vpack.c.bf16 %v2581_v46, %v2581_v46  ;;  %2591 = vst [vmem:[%s3996_s4] sm:$0xff] %v2581_v46 }
 0x802   :  { %2919 = vst [vmem:[%s3994_s3 + $0x1c] sm:$0xf] %v2583_v47 }

// kernel: seq2seq_forward.9
= control target key start
LH: loop header
LB: loop body
LE: loop exit
PB: predicated region body
PF: predicated region fallthrough
CT: control target
= control target key end

     0   :  { %s3074_s0 = inlined_call_operand.vmem [shape: s32[5], index: 0, kind: input, shape index: {}]   ;;  %s3075_s1 = inlined_call_operand.vmem [shape: f32[8,128], index: 1, kind: input, shape index: {}]   ;;  %s3076_s2 = inlined_call_operand.vmem [shape: f32[5,8,128], index: 2, kind: input, shape index: {}]   ;;  %s3077_s3 = inlined_call_operand.vmem [shape: f32[2,8,128], index: 3, kind: input, shape index: {}]   ;;  %s3078_s4 = inlined_call_operand.vmem [shape: f32[2,8,128], index: 4, kind: input, shape index: {}]   ;;  %s3079_s5 = inlined_call_operand.vmem [shape: bf16[2,128,512], index: 5, kind: input, shape index: {}]   ;;  %s3080_s6 = inlined_call_operand.vmem [shape: bf16[2,128,512], index: 6, kind: input, shape index: {}]   ;;  %s3081_s7 = inlined_call_operand.vmem [shape: f32[2,1,512], index: 7, kind: input, shape index: {}]   ;;  %s3082_s8 = inlined_call_operand.vmem [shape: bf16[128,128], index: 8, kind: input, shape index: {}]   ;;  %s3083_s9 = inlined_call_operand.vmem [shape: f32[1,128], index: 9, kind: input, shape index: {}]   ;;  %s3084_s10 = inlined_call_operand.vmem [shape: f32[128,128], index: 10, kind: input, shape index: {}]   ;;  %s3085_s11 = inlined_call_operand.vmem [shape: f32[5,8,128], index: 11, kind: output, shape index: {}]  }
   0x1   :  { %s16_s19 = sshll.u32 %s3074_s0, 4  ;;  %s17_s19 = int_to_ptr.vmem [resolvable:$true] %s16_s19 }
   0x2   :  { %s2413_s20 = scalar_lea.vmem %s17_s19, 16  ;;  %p2418_p1 = scmp.lt.s32.totalorder %s17_s19, %s17_s19 }
   0x3   :  { %p2414_p0 = scmp.ne.s32.totalorder %s17_s19, %s2413_s20  ;;  %p2419_p2 = scmp.lt.s32.totalorder %s2413_s20, %s2413_s20 }
   0x5   :  { %p2420_p3 = por %p2419_p2, %p2418_p1 }
   0x7   :  { %p2421_p4 = pnand %p2420_p3, %p2414_p0 }
   0x9   :  { %2424 = shalt.err (!%p2421_p4)  }
   0xa   :  { %s2435_s21 = smov [#allocation6]  }
   0xb   :  { %19 = dma.vmem_to_smem %s17_s19, 16, %s2435_s21, [#allocation5] }
   0xc   :  { %2429 = dma.done.wait [#allocation5], 16 }
   0xd   :  { %2430 = vsyncadd [#allocation5], 4294967280 }
   0xe   :  { %21 = sfence }
   0xf   :  { %s2503_s22 = smov 0  }
  0x10 LB: > { %s2509_s0 = sadd.s32 4294967295, %s2433_s22   ;;  %p1871_p5 = scmp.ge.s32.totalorder %s2433_s22, 1  ;;  %s2433_s22 = sphi %s2503_s22, %s27_s22  }
  0x11   : > { %p318_p6 = scmp.lt.s32.totalorder %s2433_s22, 6 }
  0x13   : > { %p319_p7 = pnand %p1871_p5, %p318_p6 }
  0x14   : > { %p354_p8 = scmp.lt.s32.totalorder (!%p319_p7), %s2509_s0, 4  ;;  %p1874_p9 = scmp.ne.s32.totalorder (!%p319_p7), %s2509_s0, 0 }
  0x15   : > { %322 = sbr.rel (%p319_p7) target bundleno = 1281 (0x501), region = 60 }
  0x1a   : > { %s355_s23 = scalar_select %p354_p8, %s2509_s0, 4 }
  0x1b   : > { %366 = sbr.rel (%p1874_p9) target bundleno = 36 (0x24), region = 64 }
  0x1c   : > { %s1872_s24 = sshll.u32 %s355_s23, 3 }
  0x1d   : > { %s2518_s27 = scalar_lea.vmem %s3076_s2, %s1872_s24  ;;  %s2523_s30 = scalar_lea.vmem %s3085_s11, %s1872_s24 }
  0x20   : > { %v367_v0 = vld [vmem:[%s3077_s3] sm:$0xff]  ;;  %v368_v1 = vld [vmem:[%s3077_s3 + $0x8] sm:$0xff] }
  0x21   : > { %v371_v2 = vld [vmem:[%s3078_s4] sm:$0xff]  ;;  %369 = vst [vmem:[#allocation2] sm:$0xff] %v367_v0  ;;  %370 = vst [vmem:[#allocation2 + $0x8] sm:$0xff] %v368_v1  ;;  %v372_v3 = vld [vmem:[%s3078_s4 + $0x8] sm:$0xff] }
  0x22   : > { %373 = vst [vmem:[#allocation3 + $0x8] sm:$0xff] %v371_v2  ;;  %v375_v4 = vld [vmem:[%s3075_s1] sm:$0xff]  ;;  %374 = vst [vmem:[#allocation3] sm:$0xff] %v372_v3 }
  0x23   : > { %376 = vst [vmem:[#allocation4] sm:$0xff] %v375_v4 }
  0x24 PF: > { %v2181_v5 = vld [vmem:[%s3080_s6 + $0xe4] ss:$16 sps:$4 sm:$0xff]   ;;  %v2183_v6 = vld [vmem:[%s3080_s6 + $0xec] ss:$16 sps:$4 sm:$0xff]   ;;  %v2436_v7 = vmov 0   ;;  %vm2438_vm0 = vmmov 0  }
  0x25   : > { %638 = vmatprep.mubr.bf16.mxu0 %v2436_v7  ;;  %679 = vmatprep.mubr.bf16.mxu1 %v2436_v7  ;;  %v2185_v8 = vld [vmem:[%s3080_s6 + $0xe0] ss:$16 sps:$4 sm:$0xff]   ;;  %v2186_v9 = vld [vmem:[%s3080_s6 + $0xe8] ss:$16 sps:$4 sm:$0xff]   ;;  %v2187_v10 = vld [vmem:[%s3080_s6 + $0xc4] ss:$16 sps:$4 sm:$0xff]  }
  0x26   : > { %606 = vmatprep.subr.bf16.mxu0 %v2181_v5  ;;  %647 = vmatprep.subr.bf16.mxu1 %v2183_v6  ;;  %v2189_v11 = vld [vmem:[%s3080_s6 + $0xcc] ss:$16 sps:$4 sm:$0xff]   ;;  %v2191_v12 = vld [vmem:[%s3080_s6 + $0xc0] ss:$16 sps:$4 sm:$0xff]   ;;  %v2192_v13 = vld [vmem:[%s3080_s6 + $0xc8] ss:$16 sps:$4 sm:$0xff]  }
  0x27   : > { %607 = vmatpush1.bf16.msra.mxu0 %v2185_v8  ;;  %648 = vmatpush1.bf16.msra.mxu1 %v2186_v9  ;;  %v2193_v14 = vld [vmem:[%s3080_s6 + $0xa4] ss:$16 sps:$4 sm:$0xff]   ;;  %v2195_v15 = vld [vmem:[%s3080_s6 + $0xac] ss:$16 sps:$4 sm:$0xff]   ;;  %v2197_v16 = vld [vmem:[%s3080_s6 + $0xa0] ss:$16 sps:$4 sm:$0xff]  }
  0x28   : > { %608 = vmatprep.subr.bf16.mxu0 %v2187_v10  ;;  %649 = vmatprep.subr.bf16.mxu1 %v2189_v11  ;;  %v2198_v17 = vld [vmem:[%s3080_s6 + $0xa8] ss:$16 sps:$4 sm:$0xff]   ;;  %v2199_v18 = vld [vmem:[%s3080_s6 + $0x84] ss:$16 sps:$4 sm:$0xff]   ;;  %v2201_v19 = vld [vmem:[%s3080_s6 + $0x8c] ss:$16 sps:$4 sm:$0xff]  }
  0x29   : > { %v2203_v20 = vld [vmem:[%s3080_s6 + $0x80] ss:$16 sps:$4 sm:$0xff]   ;;  %v2204_v21 = vld [vmem:[%s3080_s6 + $0x88] ss:$16 sps:$4 sm:$0xff]   ;;  %v2205_v22 = vld [vmem:[%s3080_s6 + $0x64] ss:$16 sps:$4 sm:$0xff]  }
  0x2a   : > { %v2207_v23 = vld [vmem:[%s3080_s6 + $0x6c] ss:$16 sps:$4 sm:$0xff]   ;;  %v2209_v24 = vld [vmem:[%s3080_s6 + $0x60] ss:$16 sps:$4 sm:$0xff]   ;;  %v2210_v25 = vld [vmem:[%s3080_s6 + $0x68] ss:$16 sps:$4 sm:$0xff]  }
  0x2b   : > { %609 = vmatpush1.bf16.msra.mxu0 %v2191_v12  ;;  %650 = vmatpush1.bf16.msra.mxu1 %v2192_v13  ;;  %v2211_v26 = vld [vmem:[%s3080_s6 + $0x44] ss:$16 sps:$4 sm:$0xff]   ;;  %v2213_v27 = vld [vmem:[%s3080_s6 + $0x4c] ss:$16 sps:$4 sm:$0xff]   ;;  %v2215_v28 = vld [vmem:[%s3080_s6 + $0x40] ss:$16 sps:$4 sm:$0xff]  }
  0x2c   : > { %610 = vmatprep.subr.bf16.mxu0 %v2193_v14  ;;  %651 = vmatprep.subr.bf16.mxu1 %v2195_v15  ;;  %v2216_v29 = vld [vmem:[%s3080_s6 + $0x48] ss:$16 sps:$4 sm:$0xff]   ;;  %v2217_v30 = vld [vmem:[%s3080_s6 + $0x24] ss:$16 sps:$4 sm:$0xff]   ;;  %v2219_v31 = vld [vmem:[%s3080_s6 + $0x2c] ss:$16 sps:$4 sm:$0xff]  }
  0x2d   : > { %v2221_v32 = vld [vmem:[%s3080_s6 + $0x20] ss:$16 sps:$4 sm:$0xff]   ;;  %v2222_v33 = vld [vmem:[%s3080_s6 + $0x28] ss:$16 sps:$4 sm:$0xff]   ;;  %v2223_v34 = vld [vmem:[%s3080_s6 + $0x4] ss:$16 sps:$4 sm:$0xff]  }
  0x2e   : > { %v2225_v35 = vld [vmem:[%s3080_s6 + $0xc] ss:$16 sps:$4 sm:$0xff]   ;;  %v2227_v36 = vld [vmem:[%s3080_s6] ss:$16 sps:$4 sm:$0xff]   ;;  %v2228_v37 = vld [vmem:[%s3080_s6 + $0x8] ss:$16 sps:$4 sm:$0xff]  }
  0x2f   : > { %611 = vmatpush1.bf16.msra.mxu0 %v2197_v16  ;;  %652 = vmatpush1.bf16.msra.mxu1 %v2198_v17  ;;  %v378_v38 = vld [vmem:[#allocation2] sm:$0xff]  ;;  %v2234_v40 = vld [vmem:[%s3079_s5 + $0xec] ss:$16 sps:$4 sm:$0xff]   ;;  %v2232_v43 = vld [vmem:[%s3079_s5 + $0xe8] ss:$16 sps:$4 sm:$0xff]   ;;  %s1804_s28 = sld [smem:[#allocation6 + %s2509_s0]] }
  0x30   : > { %612 = vmatprep.subr.bf16.mxu0 %v2199_v18  ;;  %653 = vmatprep.subr.bf16.mxu1 %v2201_v19  ;;  %v2231_v39 = vld [vmem:[%s3079_s5 + $0xe4] ss:$16 sps:$4 sm:$0xff]   ;;  %v413_v41 = vpack.c.bf16 %v378_v38, %v378_v38  ;;  %v2229_v42 = vld [vmem:[%s3079_s5 + $0xe0] ss:$16 sps:$4 sm:$0xff]   ;;  %v2240_v45 = vld [vmem:[%s3079_s5 + $0xcc] ss:$16 sps:$4 sm:$0xff]  }
  0x31   : > { %v2237_v44 = vld [vmem:[%s3079_s5 + $0xc4] ss:$16 sps:$4 sm:$0xff]   ;;  %v2235_v46 = vld [vmem:[%s3079_s5 + $0xc0] ss:$16 sps:$4 sm:$0xff]   ;;  %v2238_v47 = vld [vmem:[%s3079_s5 + $0xc8] ss:$16 sps:$4 sm:$0xff]  }
  0x32   : > { %v2243_v48 = vld [vmem:[%s3079_s5 + $0xa4] ss:$16 sps:$4 sm:$0xff]   ;;  %v2246_v49 = vld [vmem:[%s3079_s5 + $0xac] ss:$16 sps:$4 sm:$0xff]   ;;  %v2241_v50 = vld [vmem:[%s3079_s5 + $0xa0] ss:$16 sps:$4 sm:$0xff]  }
  0x33   : > { %613 = vmatpush1.bf16.msra.mxu0 %v2203_v20  ;;  %654 = vmatpush1.bf16.msra.mxu1 %v2204_v21  ;;  %v2244_v51 = vld [vmem:[%s3079_s5 + $0xa8] ss:$16 sps:$4 sm:$0xff]   ;;  %v2249_v52 = vld [vmem:[%s3079_s5 + $0x84] ss:$16 sps:$4 sm:$0xff]   ;;  %v2252_v53 = vld [vmem:[%s3079_s5 + $0x8c] ss:$16 sps:$4 sm:$0xff]  }
  0x34   : > { %614 = vmatprep.subr.bf16.mxu0 %v2205_v22  ;;  %655 = vmatprep.subr.bf16.mxu1 %v2207_v23  ;;  %v2247_v54 = vld [vmem:[%s3079_s5 + $0x80] ss:$16 sps:$4 sm:$0xff]   ;;  %v2250_v55 = vld [vmem:[%s3079_s5 + $0x88] ss:$16 sps:$4 sm:$0xff]   ;;  %v2255_v56 = vld [vmem:[%s3079_s5 + $0x64] ss:$16 sps:$4 sm:$0xff]  }
  0x35   : > { %v2258_v57 = vld [vmem:[%s3079_s5 + $0x6c] ss:$16 sps:$4 sm:$0xff]   ;;  %v2253_v58 = vld [vmem:[%s3079_s5 + $0x60] ss:$16 sps:$4 sm:$0xff]   ;;  %v2256_v59 = vld [vmem:[%s3079_s5 + $0x68] ss:$16 sps:$4 sm:$0xff]   ;;  %s1805_s29 = scvt.s32.f32 %s1804_s28 }
  0x36   : > { %v2261_v60 = vld [vmem:[%s3079_s5 + $0x44] ss:$16 sps:$4 sm:$0xff]   ;;  %v2264_v61 = vld [vmem:[%s3079_s5 + $0x4c] ss:$16 sps:$4 sm:$0xff]   ;;  %v2259_v62 = vld [vmem:[%s3079_s5 + $0x40] ss:$16 sps:$4 sm:$0xff]  }
  0x37   : > { %615 = vmatpush1.bf16.msra.mxu0 %v2209_v24  ;;  %656 = vmatpush1.bf16.msra.mxu1 %v2210_v25  ;;  %v2262_v63 = vld [vmem:[%s3079_s5 + $0x48] ss:$16 sps:$4 sm:$0xff]   ;;  %v2267_v0 = vld [vmem:[%s3079_s5 + $0x24] ss:$16 sps:$4 sm:$0xff]   ;;  %v2270_v1 = vld [vmem:[%s3079_s5 + $0x2c] ss:$16 sps:$4 sm:$0xff]  }
  0x38   : > { %616 = vmatprep.subr.bf16.mxu0 %v2211_v26  ;;  %657 = vmatprep.subr.bf16.mxu1 %v2213_v27  ;;  %v2265_v2 = vld [vmem:[%s3079_s5 + $0x20] ss:$16 sps:$4 sm:$0xff]   ;;  %v2268_v3 = vld [vmem:[%s3079_s5 + $0x28] ss:$16 sps:$4 sm:$0xff]   ;;  %v2273_v4 = vld [vmem:[%s3079_s5 + $0x4] ss:$16 sps:$4 sm:$0xff]  }
  0x39   : > { %v2276_v5 = vld [vmem:[%s3079_s5 + $0xc] ss:$16 sps:$4 sm:$0xff]   ;;  %v2271_v6 = vld [vmem:[%s3079_s5] ss:$16 sps:$4 sm:$0xff]   ;;  %v2274_v8 = vld [vmem:[%s3079_s5 + $0x8] ss:$16 sps:$4 sm:$0xff]  }
  0x3a   : > { %v377_v9 = vld [vmem:[#allocation4] sm:$0xff]  ;;  %v2283_v14 = vld [vmem:[%s3080_s6 + $0x1e8] ss:$16 sps:$4 sm:$0xff]   ;;  %v2285_v15 = vld [vmem:[%s3080_s6 + $0x1ec] ss:$16 sps:$4 sm:$0xff]   ;;  %s1809_s12 = ssub.f32 1.0, %s1805_s29 }
  0x3b   : > { %617 = vmatpush1.bf16.msra.mxu0 %v2215_v28  ;;  %658 = vmatpush1.bf16.msra.mxu1 %v2216_v29  ;;  %v380_v10 = vpack.c.bf16 %v377_v9, %v377_v9  ;;  %v2277_v11 = vld [vmem:[%s3080_s6 + $0x1e0] ss:$16 sps:$4 sm:$0xff]   ;;  %v2279_v12 = vld [vmem:[%s3080_s6 + $0x1e4] ss:$16 sps:$4 sm:$0xff]   ;;  %v2291_v19 = vld [vmem:[%s3080_s6 + $0x1cc] ss:$16 sps:$4 sm:$0xff]  }
  0x3c   : > { %618 = vmatprep.subr.bf16.mxu0 %v2217_v30  ;;  %659 = vmatprep.subr.bf16.mxu1 %v2219_v31  ;;  %v2282_v13 = vld [vmem:[%s3080_s6 + $0x1c4] ss:$16 sps:$4 sm:$0xff]   ;;  %v2280_v16 = vld [vmem:[%s3080_s6 + $0x1c0] ss:$16 sps:$4 sm:$0xff]   ;;  %v2289_v20 = vld [vmem:[%s3080_s6 + $0x1c8] ss:$16 sps:$4 sm:$0xff]  }
  0x3d   : > { %v2288_v17 = vld [vmem:[%s3080_s6 + $0x1a4] ss:$16 sps:$4 sm:$0xff]   ;;  %v2286_v18 = vld [vmem:[%s3080_s6 + $0x1a0] ss:$16 sps:$4 sm:$0xff]   ;;  %v2297_v23 = vld [vmem:[%s3080_s6 + $0x1ac] ss:$16 sps:$4 sm:$0xff]  }
  0x3e   : > { %v2294_v21 = vld [vmem:[%s3080_s6 + $0x184] ss:$16 sps:$4 sm:$0xff]   ;;  %v2292_v22 = vld [vmem:[%s3080_s6 + $0x180] ss:$16 sps:$4 sm:$0xff]   ;;  %v2295_v24 = vld [vmem:[%s3080_s6 + $0x1a8] ss:$16 sps:$4 sm:$0xff]  }
  0x3f   : > { %619 = vmatpush1.bf16.msra.mxu0 %v2221_v32  ;;  %660 = vmatpush1.bf16.msra.mxu1 %v2222_v33  ;;  %v2300_v25 = vld [vmem:[%s3080_s6 + $0x164] ss:$16 sps:$4 sm:$0xff]   ;;  %v2298_v26 = vld [vmem:[%s3080_s6 + $0x160] ss:$16 sps:$4 sm:$0xff]   ;;  %v2303_v27 = vld [vmem:[%s3080_s6 + $0x18c] ss:$16 sps:$4 sm:$0xff]  }
  0x40   : > { %620 = vmatprep.subr.bf16.mxu0 %v2223_v34  ;;  %661 = vmatprep.subr.bf16.mxu1 %v2225_v35  ;;  %v2301_v28 = vld [vmem:[%s3080_s6 + $0x188] ss:$16 sps:$4 sm:$0xff]   ;;  %v2306_v29 = vld [vmem:[%s3080_s6 + $0x144] ss:$16 sps:$4 sm:$0xff]   ;;  %v2304_v30 = vld [vmem:[%s3080_s6 + $0x140] ss:$16 sps:$4 sm:$0xff]  }
  0x41   : > { %v2309_v31 = vld [vmem:[%s3080_s6 + $0x16c] ss:$16 sps:$4 sm:$0xff]   ;;  %v2307_v32 = vld [vmem:[%s3080_s6 + $0x168] ss:$16 sps:$4 sm:$0xff]   ;;  %v2312_v33 = vld [vmem:[%s3080_s6 + $0x124] ss:$16 sps:$4 sm:$0xff]  }
  0x42   : > { %v2310_v34 = vld [vmem:[%s3080_s6 + $0x120] ss:$16 sps:$4 sm:$0xff]   ;;  %v2315_v35 = vld [vmem:[%s3080_s6 + $0x14c] ss:$16 sps:$4 sm:$0xff]   ;;  %v2369_v9 = vld [vmem:[%s3079_s5 + $0x104] ss:$16 sps:$4 sm:$0xff]  }
  0x43   : > { %621 = vmatpush1.bf16.msra.mxu0 %v2227_v36  ;;  %662 = vmatpush1.bf16.msra.mxu1 %v2228_v37  ;;  %v2313_v36 = vld [vmem:[%s3080_s6 + $0x148] ss:$16 sps:$4 sm:$0xff]   ;;  %v2318_v37 = vld [vmem:[%s3080_s6 + $0x104] ss:$16 sps:$4 sm:$0xff]   ;;  %v2316_v38 = vld [vmem:[%s3080_s6 + $0x100] ss:$16 sps:$4 sm:$0xff]  }
  0x44   : > { %848 = vmatprep.subr.bf16.mxu0 %v2231_v39  ;;  %889 = vmatprep.subr.bf16.mxu1 %v2234_v40  ;;  %v2321_v39 = vld [vmem:[%s3080_s6 + $0x12c] ss:$16 sps:$4 sm:$0xff]   ;;  %v2319_v40 = vld [vmem:[%s3080_s6 + $0x128] ss:$16 sps:$4 sm:$0xff]  }
  0x46   : > { %639 = vmatmul.mubr.bf16.vlgmr.msra.gmra.mxu0 %v413_v41  ;;  %680 = vmatmul.mubr.bf16.vlgmr.msra.gmra.mxu1 %v413_v41  ;;  %v983_v41 = vld [vmem:[#allocation2 + $0x8] sm:$0xff] }
  0x47   : > { %849 = vmatpush1.bf16.msra.mxu0 %v2229_v42  ;;  %890 = vmatpush1.bf16.msra.mxu1 %v2232_v43  ;;  %v1020_v42 = vpack.c.bf16 %v983_v41, %v983_v41  ;;  %v2324_v43 = vld [vmem:[%s3080_s6 + $0x10c] ss:$16 sps:$4 sm:$0xff]  }
  0x48   : > { %850 = vmatprep.subr.bf16.mxu0 %v2237_v44  ;;  %891 = vmatprep.subr.bf16.mxu1 %v2240_v45  ;;  %v2322_v44 = vld [vmem:[%s3080_s6 + $0x108] ss:$16 sps:$4 sm:$0xff]   ;;  %v2327_v45 = vld [vmem:[%s3079_s5 + $0x1e4] ss:$16 sps:$4 sm:$0xff]  }
  0x49   : > { %880 = vmatprep.mubr.bf16.mxu0 %v2436_v7  ;;  %921 = vmatprep.mubr.bf16.mxu1 %v2436_v7 }
  0x4b   : > { %851 = vmatpush1.bf16.msra.mxu0 %v2235_v46  ;;  %892 = vmatpush1.bf16.msra.mxu1 %v2238_v47  ;;  %v2330_v46 = vld [vmem:[%s3079_s5 + $0x1ec] ss:$16 sps:$4 sm:$0xff]   ;;  %v2325_v47 = vld [vmem:[%s3079_s5 + $0x1e0] ss:$16 sps:$4 sm:$0xff]  }
  0x4c   : > { %852 = vmatprep.subr.bf16.mxu0 %v2243_v48  ;;  %893 = vmatprep.subr.bf16.mxu1 %v2246_v49  ;;  %v2328_v48 = vld [vmem:[%s3079_s5 + $0x1e8] ss:$16 sps:$4 sm:$0xff]   ;;  %v2333_v49 = vld [vmem:[%s3079_s5 + $0x1c4] ss:$16 sps:$4 sm:$0xff]  }
  0x4f   : > { %853 = vmatpush1.bf16.msra.mxu0 %v2241_v50  ;;  %894 = vmatpush1.bf16.msra.mxu1 %v2244_v51  ;;  %v2336_v50 = vld [vmem:[%s3079_s5 + $0x1cc] ss:$16 sps:$4 sm:$0xff]   ;;  %v2331_v51 = vld [vmem:[%s3079_s5 + $0x1c0] ss:$16 sps:$4 sm:$0xff]  }
  0x50   : > { %854 = vmatprep.subr.bf16.mxu0 %v2249_v52  ;;  %895 = vmatprep.subr.bf16.mxu1 %v2252_v53  ;;  %v2334_v52 = vld [vmem:[%s3079_s5 + $0x1c8] ss:$16 sps:$4 sm:$0xff]   ;;  %v2339_v53 = vld [vmem:[%s3079_s5 + $0x1a4] ss:$16 sps:$4 sm:$0xff]  }
  0x53   : > { %855 = vmatpush1.bf16.msra.mxu0 %v2247_v54  ;;  %896 = vmatpush1.bf16.msra.mxu1 %v2250_v55  ;;  %v2337_v54 = vld [vmem:[%s3079_s5 + $0x1a0] ss:$16 sps:$4 sm:$0xff]   ;;  %v2340_v55 = vld [vmem:[%s3079_s5 + $0x1a8] ss:$16 sps:$4 sm:$0xff]  }
  0x54   : > { %856 = vmatprep.subr.bf16.mxu0 %v2255_v56  ;;  %897 = vmatprep.subr.bf16.mxu1 %v2258_v57  ;;  %v2345_v56 = vld [vmem:[%s3079_s5 + $0x184] ss:$16 sps:$4 sm:$0xff]   ;;  %v2348_v57 = vld [vmem:[%s3079_s5 + $0x18c] ss:$16 sps:$4 sm:$0xff]  }
  0x57   : > { %857 = vmatpush1.bf16.msra.mxu0 %v2253_v58  ;;  %898 = vmatpush1.bf16.msra.mxu1 %v2256_v59  ;;  %v2343_v58 = vld [vmem:[%s3079_s5 + $0x180] ss:$16 sps:$4 sm:$0xff]   ;;  %v2346_v59 = vld [vmem:[%s3079_s5 + $0x188] ss:$16 sps:$4 sm:$0xff]  }
  0x58   : > { %858 = vmatprep.subr.bf16.mxu0 %v2261_v60  ;;  %899 = vmatprep.subr.bf16.mxu1 %v2264_v61  ;;  %v2349_v60 = vld [vmem:[%s3079_s5 + $0x160] ss:$16 sps:$4 sm:$0xff]   ;;  %v2351_v61 = vld [vmem:[%s3079_s5 + $0x164] ss:$16 sps:$4 sm:$0xff]  }
  0x5b   : > { %859 = vmatpush1.bf16.msra.mxu0 %v2259_v62  ;;  %900 = vmatpush1.bf16.msra.mxu1 %v2262_v63  ;;  %v2352_v62 = vld [vmem:[%s3079_s5 + $0x168] ss:$16 sps:$4 sm:$0xff]   ;;  %v2354_v63 = vld [vmem:[%s3079_s5 + $0x16c] ss:$16 sps:$4 sm:$0xff]  }
  0x5c   : > { %860 = vmatprep.subr.bf16.mxu0 %v2267_v0  ;;  %901 = vmatprep.subr.bf16.mxu1 %v2270_v1  ;;  %v2357_v0 = vld [vmem:[%s3079_s5 + $0x144] ss:$16 sps:$4 sm:$0xff]   ;;  %v2360_v1 = vld [vmem:[%s3079_s5 + $0x14c] ss:$16 sps:$4 sm:$0xff]  }
  0x5f   : > { %861 = vmatpush1.bf16.msra.mxu0 %v2265_v2  ;;  %902 = vmatpush1.bf16.msra.mxu1 %v2268_v3  ;;  %v2355_v2 = vld [vmem:[%s3079_s5 + $0x140] ss:$16 sps:$4 sm:$0xff]   ;;  %v2358_v3 = vld [vmem:[%s3079_s5 + $0x148] ss:$16 sps:$4 sm:$0xff]  }
  0x60   : > { %862 = vmatprep.subr.bf16.mxu0 %v2273_v4  ;;  %903 = vmatprep.subr.bf16.mxu1 %v2276_v5  ;;  %v2363_v4 = vld [vmem:[%s3079_s5 + $0x124] ss:$16 sps:$4 sm:$0xff]   ;;  %v2366_v5 = vld [vmem:[%s3079_s5 + $0x12c] ss:$16 sps:$4 sm:$0xff]  }
  0x63   : > { %863 = vmatpush1.bf16.msra.mxu0 %v2271_v6  ;;  %904 = vmatpush1.bf16.msra.mxu1 %v2274_v8  ;;  %v2361_v6 = vld [vmem:[%s3079_s5 + $0x120] ss:$16 sps:$4 sm:$0xff]   ;;  %v2364_v8 = vld [vmem:[%s3079_s5 + $0x128] ss:$16 sps:$4 sm:$0xff]  }
  0x64   : > { %1214 = vmatprep.subr.bf16.mxu0 %v2279_v12  ;;  %1255 = vmatprep.subr.bf16.mxu1 %v2285_v15  ;;  %v2370_v12 = vld [vmem:[%s3079_s5 + $0x108] ss:$16 sps:$4 sm:$0xff]  }
  0x66   : > { %881 = vmatmul.mubr.bf16.vlgmr.msra.gmra.mxu0 %v380_v10  ;;  %922 = vmatmul.mubr.bf16.vlgmr.msra.gmra.mxu1 %v380_v10  ;;  %v2372_v10 = vld [vmem:[%s3079_s5 + $0x10c] ss:$16 sps:$4 sm:$0xff]  }
  0x67   : > { %1246 = vmatprep.mubr.bf16.mxu0 %v2436_v7  ;;  %1287 = vmatprep.mubr.bf16.mxu1 %v2436_v7 }
  0x68   : > { %1215 = vmatpush1.bf16.msra.mxu0 %v2277_v11  ;;  %1256 = vmatpush1.bf16.msra.mxu1 %v2283_v14  ;;  %v2367_v11 = vld [vmem:[%s3079_s5 + $0x100] ss:$16 sps:$4 sm:$0xff]  }
  0x69   : > { %1216 = vmatprep.subr.bf16.mxu0 %v2282_v13  ;;  %1257 = vmatprep.subr.bf16.mxu1 %v2291_v19 }
  0x6c   : > { %1217 = vmatpush1.bf16.msra.mxu0 %v2280_v16  ;;  %1258 = vmatpush1.bf16.msra.mxu1 %v2289_v20 }
  0x6d   : > { %1218 = vmatprep.subr.bf16.mxu0 %v2288_v17  ;;  %1259 = vmatprep.subr.bf16.mxu1 %v2297_v23 }
  0x70   : > { %1219 = vmatpush1.bf16.msra.mxu0 %v2286_v18  ;;  %1260 = vmatpush1.bf16.msra.mxu1 %v2295_v24  ;;  %v930_v24 = vld [vmem:[%s3081_s7] sm:$0xf] }
  0x71   : > { %1220 = vmatprep.subr.bf16.mxu0 %v2294_v21  ;;  %1261 = vmatprep.subr.bf16.mxu1 %v2303_v27  ;;  %v932_v21 = vlaneseq }
  0x74   : > { %1221 = vmatpush1.bf16.msra.mxu0 %v2292_v22  ;;  %1262 = vmatpush1.bf16.msra.mxu1 %v2301_v28  ;;  %v2934_v22 = vshrl.u32 %v932_v21, 7 }
  0x75   : > { %1222 = vmatprep.subr.bf16.mxu0 %v2300_v25  ;;  %1263 = vmatprep.subr.bf16.mxu1 %v2309_v31 }
  0x76   : > { %v934_v23 = vsub.s32 0, %v2934_v22  ;;  %v938_v25 = vsub.s32 1, %v2934_v22 }
  0x78   : > { %1223 = vmatpush1.bf16.msra.mxu0 %v2298_v26  ;;  %1264 = vmatpush1.bf16.msra.mxu1 %v2307_v32  ;;  %v935_v26 = vrot.slane %v930_v24, %v934_v23 }
  0x79   : > { %1224 = vmatprep.subr.bf16.mxu0 %v2306_v29  ;;  %1265 = vmatprep.subr.bf16.mxu1 %v2315_v35 }
  0x7c   : > { %1225 = vmatpush1.bf16.msra.mxu0 %v2304_v30  ;;  %1266 = vmatpush1.bf16.msra.mxu1 %v2313_v36  ;;  %v939_v30 = vrot.slane %v930_v24, %v938_v25 }
  0x7d   : > { %1226 = vmatprep.subr.bf16.mxu0 %v2312_v33  ;;  %1267 = vmatprep.subr.bf16.mxu1 %v2321_v39  ;;  %v946_v39 = vsub.s32 3, %v2934_v22 }
  0x80   : > { %1227 = vmatpush1.bf16.msra.mxu0 %v2310_v34  ;;  %1268 = vmatpush1.bf16.msra.mxu1 %v2319_v40 }
  0x81   : > { %1228 = vmatprep.subr.bf16.mxu0 %v2318_v37  ;;  %1269 = vmatprep.subr.bf16.mxu1 %v2324_v43 }
  0x84   : > { %1229 = vmatpush1.bf16.msra.mxu0 %v2316_v38  ;;  %1270 = vmatpush1.bf16.msra.mxu1 %v2322_v44  ;;  %v947_v44 = vrot.slane %v930_v24, %v946_v39 }
  0x85   : > { %1456 = vmatprep.subr.bf16.mxu0 %v2327_v45  ;;  %1497 = vmatprep.subr.bf16.mxu1 %v2330_v46  ;;  %v942_v45 = vsub.s32 2, %v2934_v22 }
  0x87   : > { %1247 = vmatmul.mubr.bf16.vlgmr.msra.gmra.mxu0 %v1020_v42  ;;  %1288 = vmatmul.mubr.bf16.vlgmr.msra.gmra.mxu1 %v1020_v42 }
  0x88   : > { %1488 = vmatprep.mubr.bf16.mxu0 %v2436_v7  ;;  %1457 = vmatpush1.bf16.msra.mxu0 %v2325_v47 }
  0x89   : > { %1498 = vmatpush1.bf16.msra.mxu1 %v2328_v48  ;;  %1529 = vmatprep.mubr.bf16.mxu1 %v2436_v7  ;;  %v2342_v7 = vld [vmem:[%s3079_s5 + $0x1ac] ss:$16 sps:$4 sm:$0xff]   ;;  %v943_v48 = vrot.slane %v930_v24, %v942_v45  ;;  %v2070_v24 = vld [vmem:[%s3081_s7 + $0x4] sm:$0xf] }
  0x8a   : > { %1458 = vmatprep.subr.bf16.mxu0 %v2333_v49  ;;  %1499 = vmatprep.subr.bf16.mxu1 %v2336_v50 }
  0x8c   : > { %1459 = vmatpush1.bf16.msra.mxu0 %v2331_v51 }
  0x8d   : > { %1500 = vmatpush1.bf16.msra.mxu1 %v2334_v52  ;;  %1460 = vmatprep.subr.bf16.mxu0 %v2339_v53 }
  0x8e   : > { %1501 = vmatprep.subr.bf16.mxu1 %v2342_v7 }
  0x90   : > { %1461 = vmatpush1.bf16.msra.mxu0 %v2337_v54 }
  0x91   : > { %1502 = vmatpush1.bf16.msra.mxu1 %v2340_v55  ;;  %1462 = vmatprep.subr.bf16.mxu0 %v2345_v56  ;;  %v379_v56 = vld [vmem:[#allocation3 + $0x8] sm:$0xff] }
  0x92   : > { %1503 = vmatprep.subr.bf16.mxu1 %v2348_v57 }
  0x94   : > { %1463 = vmatpush1.bf16.msra.mxu0 %v2343_v58 }
  0x95   : > { %1504 = vmatpush1.bf16.msra.mxu1 %v2346_v59  ;;  %1464 = vmatprep.subr.bf16.mxu0 %v2351_v61 }
  0x96   : > { %1505 = vmatprep.subr.bf16.mxu1 %v2354_v63 }
  0x98   : > { %1465 = vmatpush1.bf16.msra.mxu0 %v2349_v60 }
  0x99   : > { %1506 = vmatpush1.bf16.msra.mxu1 %v2352_v62  ;;  %1466 = vmatprep.subr.bf16.mxu0 %v2357_v0 }
  0x9a   : > { %1507 = vmatprep.subr.bf16.mxu1 %v2360_v1 }
  0x9c   : > { %1467 = vmatpush1.bf16.msra.mxu0 %v2355_v2 }
  0x9d   : > { %1508 = vmatpush1.bf16.msra.mxu1 %v2358_v3  ;;  %1468 = vmatprep.subr.bf16.mxu0 %v2363_v4 }
  0x9e   : > { %1509 = vmatprep.subr.bf16.mxu1 %v2366_v5 }
  0xa0   : > { %1469 = vmatpush1.bf16.msra.mxu0 %v2361_v6 }
  0xa1   : > { %1510 = vmatpush1.bf16.msra.mxu1 %v2364_v8  ;;  %1470 = vmatprep.subr.bf16.mxu0 %v2369_v9 }
  0xa2   : > { %1511 = vmatprep.subr.bf16.mxu1 %v2372_v10 }
  0xa4   : > { %1471 = vmatpush1.bf16.msra.mxu0 %v2367_v11 }
  0xa5   : > { %1512 = vmatpush1.bf16.msra.mxu1 %v2370_v12  ;;  %v2373_v12 = vld [vmem:[%s3082_s8 + $0x38] sm:$0xff]  }
 0x106   : > { %v640_v13 = vpop.f32.mrf.mxu0  ;;  %v681_v14 = vpop.f32.mrf.mxu1 }
 0x108   : > { %v642_v15 = vpop.f32.mrf.mxu0  ;;  %v683_v16 = vpop.f32.mrf.mxu1 }
 0x10a   : > { %v644_v17 = vpop.f32.mrf.mxu0  ;;  %v685_v18 = vpop.f32.mrf.mxu1 }
 0x10b   : > { %v2377_v17 = vld [vmem:[%s3082_s8 + $0x18] sm:$0xff]   ;;  %v2378_v18 = vld [vmem:[%s3082_s8 + $0x10] sm:$0xff]  }
 0x10c   : > { %v645_v19 = vpop.f32.mrf.mxu0  ;;  %v686_v20 = vpop.f32.mrf.mxu1 }
 0x10d   : > { %v2379_v19 = vld [vmem:[%s3082_s8 + $0x8] sm:$0xff]   ;;  %v2380_v20 = vld [vmem:[%s3082_s8] sm:$0xff]  }
 0x126   : > { %v882_v27 = vpop.f32.mrf.mxu0  ;;  %v923_v28 = vpop.f32.mrf.mxu1 }
 0x127   : > { %v883_v29 = vadd.f32 %v882_v27, %v640_v13  ;;  %v924_v47 = vadd.f32 %v923_v28, %v681_v14  ;;  %v2437_v13 = vmov 0.0   ;;  %v2374_v14 = vld [vmem:[%s3082_s8 + $0x30] sm:$0xff]  }
 0x128   : > { %v884_v31 = vpop.f32.mrf.mxu0  ;;  %v925_v32 = vpop.f32.mrf.mxu1  ;;  %2113 = vmatprep.subr.bf16.mxu0 %v2437_v13  ;;  %2133 = vmatprep.subr.mxu1 %v2437_v13 }
 0x129   : > { %v952_v33 = vadd.f32 %v935_v26, %v883_v29  ;;  %v885_v34 = vadd.f32 %v884_v31, %v642_v15  ;;  %v926_v43 = vadd.f32 %v925_v32, %v683_v16  ;;  %v954_v51 = vadd.f32 %v943_v48, %v924_v47  ;;  %v2375_v15 = vld [vmem:[%s3082_s8 + $0x28] sm:$0xff]   ;;  %v2376_v16 = vld [vmem:[%s3082_s8 + $0x20] sm:$0xff]  }
 0x12a   : > { %v886_v35 = vpop.f32.mrf.mxu0  ;;  %v927_v36 = vpop.f32.mrf.mxu1  ;;  %v1544_v26 = vrot.slane %v2070_v24, %v934_v23 }
 0x12b   : > { %v1939_v37 = vmul.f32 -1.442695, %v952_v33  ;;  %v953_v38 = vadd.f32 %v939_v30, %v885_v34  ;;  %v955_v46 = vadd.f32 %v947_v44, %v926_v43  ;;  %v1548_v30 = vrot.slane %v2070_v24, %v938_v25 }
 0x12c   : > { %v887_v40 = vpop.f32.mrf.mxu0  ;;  %v928_v41 = vpop.f32.mrf.mxu1  ;;  %v1556_v43 = vrot.slane %v2070_v24, %v946_v39  ;;  %v1552_v25 = vrot.slane %v2070_v24, %v942_v45  ;;  %v1719_v24 = vld [vmem:[%s3084_s10 + $0x8] sm:$0xff] }
 0x12d   : > { %2381 = vpow2.f32 %v1939_v37  ;;  %v1940_v42 = vmul.f32 -1.442695, %v953_v38  ;;  %v1941_v49 = vmul.f32 -1.442695, %v955_v46 }
 0x12f   : > { %2383 = vpow2.f32 %v1940_v42 }
 0x130   : > { %2385 = vpow2.f32 %v1941_v49 }
 0x13a   : > { %v2382_v50 = vpop.eup %2381 }
 0x13b   : > { %v959_v52 = vadd.f32 1.0, %v2382_v50 }
 0x13c   : > { %v2384_v53 = vpop.eup %2383 }
 0x13d   : > { %2387 = vrcp.f32 %v959_v52  ;;  %v965_v7 = vadd.f32 1.0, %v2384_v53  ;;  %v2386_v54 = vpop.eup %2385 }
 0x13e   : > { %2389 = vtanh.f32 %v954_v51  ;;  %v972_v59 = vadd.f32 1.0, %v2386_v54  ;;  %v985_v54 = vld [vmem:[#allocation3] sm:$0xff] }
 0x13f   : > { %2391 = vrcp.f32 %v965_v7 }
 0x140   : > { %2393 = vrcp.f32 %v972_v59 }
 0x147   : > { %v1248_v3 = vpop.f32.mrf.mxu0  ;;  %v1289_v8 = vpop.f32.mrf.mxu1 }
 0x149   : > { %v1250_v4 = vpop.f32.mrf.mxu0  ;;  %v1291_v9 = vpop.f32.mrf.mxu1 }
 0x14a   : > { %v2388_v55 = vpop.eup %2387 }
 0x14b   : > { %v2390_v57 = vpop.eup %2389  ;;  %v1252_v5 = vpop.f32.mrf.mxu0 }
 0x14c   : > { %v2392_v58 = vpop.eup %2391  ;;  %v976_v60 = vmul.f32 %v2390_v57, %v2388_v55  ;;  %v1293_v10 = vpop.f32.mrf.mxu1 }
 0x14d   : > { %v975_v61 = vmul.f32 %v2392_v58, %v379_v56  ;;  %v2394_v63 = vpop.eup %2393  ;;  %v1253_v6 = vpop.f32.mrf.mxu0  ;;  %v1729_v10 = vld [vmem:[%s3084_s10 + $0x58] sm:$0xff] }
 0x14e   : > { %v1294_v11 = vpop.f32.mrf.mxu1  ;;  %v1733_v6 = vld [vmem:[%s3084_s10 + $0x78] sm:$0xff] }
 0x14f   : > { %v977_v62 = vadd.f32 %v976_v60, %v975_v61  ;;  %v1728_v11 = vld [vmem:[%s3084_s10 + $0x50] sm:$0xff] }
 0x151   : > { %981 = vst [vmem:[#allocation3 + $0x8] sm:$0xff] %v977_v62  ;;  %2395 = vtanh.f32 %v977_v62  ;;  %v2998_v62 = vand.u32 127, %v932_v21  ;;  %v1732_v21 = vld [vmem:[%s3084_s10 + $0x70] sm:$0xff] }
 0x153   : > { %vm1706_vm1 = vcmp.lt.s32.totalorder %v2998_v62, 11 }
 0x15e   : > { %v2396_v0 = vpop.eup %2395 }
 0x15f   : > { %v979_v1 = vmul.f32 %v2396_v0, %v2394_v63  ;;  %v2074_v63 = vld [vmem:[%s3083_s9] ss:$0 sm:$0xff] }
 0x161   : > { %980 = vst [vmem:[#allocation2] sm:$0xff] %v979_v1  ;;  %v986_v2 = vpack.c.bf16 %v979_v1, %v979_v1 }
 0x163   : > { %1489 = vmatmul.mubr.bf16.vlgmr.msra.gmra.mxu0 %v986_v2  ;;  %1530 = vmatmul.mubr.bf16.vlgmr.msra.gmra.mxu1 %v986_v2 }
 0x164   : > { %2114 = vmatpush3.bf16.msra.mxu0 %v2373_v12  ;;  %2129 = vmatprep.mubr.msk.bf16.mxu0 %vm2438_vm0, %v2437_v13  ;;  %v1727_v12 = vld [vmem:[%s3084_s10 + $0x48] sm:$0xff] }
 0x165   : > { %2115 = vmatprep.subr.bf16.mxu0 %v2437_v13  ;;  %2165 = vmatprep.mubr.msk.f32.mxu1 %vm2438_vm0, %v2437_v13 }
 0x166   : > { %2134 = vmatpush3.msra.mxu1 %v1733_v6 }
 0x167   : > { %2135 = vmatprep.subr.mxu1 %v2437_v13 }
 0x168   : > { %2116 = vmatpush3.bf16.msra.mxu0 %v2374_v14  ;;  %2136 = vmatpush3.msra.mxu1 %v1732_v21  ;;  %v1726_v14 = vld [vmem:[%s3084_s10 + $0x40] sm:$0xff] }
 0x169   : > { %2117 = vmatprep.subr.bf16.mxu0 %v2437_v13  ;;  %2137 = vmatprep.subr.mxu1 %v2437_v13 }
 0x16c   : > { %2118 = vmatpush3.bf16.msra.mxu0 %v2375_v15  ;;  %v1725_v15 = vld [vmem:[%s3084_s10 + $0x38] sm:$0xff] }
 0x16d   : > { %2119 = vmatprep.subr.bf16.mxu0 %v2437_v13 }
 0x170   : > { %2120 = vmatpush3.bf16.msra.mxu0 %v2376_v16  ;;  %v1724_v16 = vld [vmem:[%s3084_s10 + $0x30] sm:$0xff] }
 0x171   : > { %2121 = vmatprep.subr.bf16.mxu0 %v2437_v13 }
 0x174   : > { %2122 = vmatpush3.bf16.msra.mxu0 %v2377_v17  ;;  %v1723_v17 = vld [vmem:[%s3084_s10 + $0x28] sm:$0xff] }
 0x175   : > { %2123 = vmatprep.subr.bf16.mxu0 %v2437_v13 }
 0x178   : > { %2124 = vmatpush3.bf16.msra.mxu0 %v2378_v18  ;;  %v1722_v18 = vld [vmem:[%s3084_s10 + $0x20] sm:$0xff] }
 0x179   : > { %2125 = vmatprep.subr.bf16.mxu0 %v2437_v13 }
 0x17c   : > { %2126 = vmatpush3.bf16.msra.mxu0 %v2379_v19  ;;  %v1721_v19 = vld [vmem:[%s3084_s10 + $0x18] sm:$0xff] }
 0x17d   : > { %2127 = vmatprep.subr.bf16.mxu0 %v2437_v13 }
 0x180   : > { %2128 = vmatpush3.bf16.msra.mxu0 %v2380_v20  ;;  %v1720_v20 = vld [vmem:[%s3084_s10 + $0x10] sm:$0xff] }
 0x223   : > { %v1490_v27 = vpop.f32.mrf.mxu0  ;;  %v1531_v28 = vpop.f32.mrf.mxu1 }
 0x224   : > { %v1491_v29 = vadd.f32 %v1490_v27, %v1248_v3  ;;  %v1532_v46 = vadd.f32 %v1531_v28, %v1289_v8  ;;  %v1731_v8 = vld [vmem:[%s3084_s10 + $0x68] sm:$0xff] }
 0x225   : > { %v1492_v31 = vpop.f32.mrf.mxu0  ;;  %v1533_v32 = vpop.f32.mrf.mxu1  ;;  %2138 = vmatpush3.msra.mxu1 %v1731_v8 }
 0x226   : > { %v1561_v33 = vadd.f32 %v1544_v26, %v1491_v29  ;;  %v1493_v34 = vadd.f32 %v1492_v31, %v1250_v4  ;;  %v1534_v23 = vadd.f32 %v1533_v32, %v1291_v9  ;;  %v1563_v49 = vadd.f32 %v1552_v25, %v1532_v46  ;;  %v1730_v9 = vld [vmem:[%s3084_s10 + $0x60] sm:$0xff]  ;;  %2139 = vmatprep.subr.mxu1 %v2437_v13 }
 0x227   : > { %v1494_v35 = vpop.f32.mrf.mxu0  ;;  %v1535_v36 = vpop.f32.mrf.mxu1  ;;  %2140 = vmatpush3.msra.mxu1 %v1730_v9  ;;  %v1710_v26 = vcvt.s32.f32 %v2998_v62  ;;  %v1718_v29 = vld [vmem:[%s3084_s10] sm:$0xff]  ;;  %v2439_v31 = vmov 1.0  }
 0x228   : > { %v2071_v37 = vmul.f32 -1.442695, %v1561_v33  ;;  %v1562_v38 = vadd.f32 %v1548_v30, %v1493_v34  ;;  %v1564_v44 = vadd.f32 %v1556_v43, %v1534_v23  ;;  %2141 = vmatprep.subr.mxu1 %v2437_v13  ;;  %v1806_v32 = vld [vmem:[%s2518_s27] sm:$0xff]  ;;  %v1810_v33 = vstv %s1809_s12 }
 0x229   : > { %v1495_v40 = vpop.f32.mrf.mxu0  ;;  %v1536_v41 = vpop.f32.mrf.mxu1  ;;  %2142 = vmatpush3.msra.mxu1 %v1729_v10 }
 0x22a   : > { %2397 = vpow2.f32 %v2071_v37  ;;  %v2072_v42 = vmul.f32 -1.442695, %v1562_v38  ;;  %v2073_v47 = vmul.f32 -1.442695, %v1564_v44  ;;  %2143 = vmatprep.subr.mxu1 %v2437_v13 }
 0x22b   : > { %2144 = vmatpush3.msra.mxu1 %v1728_v11 }
 0x22c   : > { %2399 = vpow2.f32 %v2072_v42  ;;  %2145 = vmatprep.subr.mxu1 %v2437_v13 }
 0x22d   : > { %2401 = vpow2.f32 %v2073_v47  ;;  %2146 = vmatpush3.msra.mxu1 %v1727_v12 }
 0x22e   : > { %2147 = vmatprep.subr.mxu1 %v2437_v13 }
 0x22f   : > { %2148 = vmatpush3.msra.mxu1 %v1726_v14 }
 0x230   : > { %2149 = vmatprep.subr.mxu1 %v2437_v13 }
 0x231   : > { %2150 = vmatpush3.msra.mxu1 %v1725_v15 }
 0x232   : > { %2151 = vmatprep.subr.mxu1 %v2437_v13 }
 0x233   : > { %2152 = vmatpush3.msra.mxu1 %v1724_v16 }
 0x234   : > { %2153 = vmatprep.subr.mxu1 %v2437_v13 }
 0x235   : > { %2154 = vmatpush3.msra.mxu1 %v1723_v17 }
 0x236   : > { %2155 = vmatprep.subr.mxu1 %v2437_v13 }
 0x237   : > { %v2398_v48 = vpop.eup %2397  ;;  %2156 = vmatpush3.msra.mxu1 %v1722_v18 }
 0x238   : > { %v1568_v50 = vadd.f32 1.0, %v2398_v48  ;;  %2157 = vmatprep.subr.mxu1 %v2437_v13 }
 0x239   : > { %v2400_v51 = vpop.eup %2399  ;;  %2158 = vmatpush3.msra.mxu1 %v1721_v19 }
 0x23a   : > { %2403 = vrcp.f32 %v1568_v50  ;;  %v1574_v52 = vadd.f32 1.0, %v2400_v51  ;;  %v2402_v53 = vpop.eup %2401  ;;  %2159 = vmatprep.subr.mxu1 %v2437_v13 }
 0x23b   : > { %2405 = vtanh.f32 %v1563_v49  ;;  %v1581_v56 = vadd.f32 1.0, %v2402_v53  ;;  %2160 = vmatpush3.msra.mxu1 %v1720_v20 }
 0x23c   : > { %2407 = vrcp.f32 %v1574_v52  ;;  %2161 = vmatprep.subr.mxu1 %v2437_v13 }
 0x23d   : > { %2409 = vrcp.f32 %v1581_v56  ;;  %2162 = vmatpush3.msra.mxu1 %v1719_v24 }
 0x23e   : > { %2163 = vmatprep.subr.mxu1 %v2437_v13  ;;  %v1807_v13 = vstv %s1805_s29 }
 0x23f   : > { %2164 = vmatpush3.msra.mxu1 %v1718_v29  ;;  %v1808_v34 = vmul.f32 %v1807_v13, %v1806_v32 }
 0x247   : > { %v2404_v7 = vpop.eup %2403 }
 0x248   : > { %v2406_v55 = vpop.eup %2405 }
 0x249   : > { %v2408_v39 = vpop.eup %2407  ;;  %v1585_v57 = vmul.f32 %v2406_v55, %v2404_v7 }
 0x24a   : > { %v1584_v58 = vmul.f32 %v2408_v39, %v985_v54  ;;  %v2410_v45 = vpop.eup %2409 }
 0x24c   : > { %v1586_v22 = vadd.f32 %v1585_v57, %v1584_v58 }
 0x24e   : > { %1590 = vst [vmem:[#allocation3] sm:$0xff] %v1586_v22  ;;  %2411 = vtanh.f32 %v1586_v22 }
 0x25b   : > { %v2412_v59 = vpop.eup %2411 }
 0x25c   : > { %v1588_v60 = vmul.f32 %v2412_v59, %v2410_v45 }
 0x25e   : > { %1589 = vst [vmem:[#allocation2 + $0x8] sm:$0xff] %v1588_v60  ;;  %v1591_v61 = vpack.c.bf16 %v1588_v60, %v1588_v60 }
 0x260   : > { %2130 = vmatmul.mubr.bf16.vlgmr.msra.gmra.mxu0 %v1591_v61 }
 0x320   : > { %v1697_v0 = vpop.f32.mrf.mxu0 }
 0x321   : > { %v1698_v1 = vadd.f32 %v2074_v63, %v1697_v0 }
 0x322   : > { %v2131_v2 = vpop.f32.mrf.mxu0 }
 0x323   : > { %1703 = vst [vmem:[%s2523_s30] sm:$0xff] %v1698_v1  ;;  %v1707_v3 = vsel %vm1706_vm1, %v1698_v1, -1e+30 }
 0x324   : > { %1708 = vmax.xlane.f32.xlu0 %v1707_v3  ;;  %v1700_v4 = vpop.f32.mrf.mxu0 }
 0x326   : > { %v2132_v5 = vpop.f32.mrf.mxu0 }
 0x3ad   : > { %v1709_v27 = vpop.xlane.xlu0 %1708 }
 0x3ae   : > { %vm1711_vm2 = vcmp.eq.f32.partialorder %v1707_v3, %v1709_v27 }
 0x3af   : > { %v1712_v28 = vsel %vm1711_vm2, %v1710_v26, 1e+09 }
 0x3b0   : > { %1713 = vmin.xlane.f32.xlu0 %v1712_v28 }
 0x439   : > { %v1714_v30 = vpop.xlane.xlu0 %1713 }
 0x43a   : > { %vm1715_vm3 = vcmp.eq.f32.partialorder %v1710_v26, %v1714_v30 }
 0x43b   : > { %2166 = vmatmul.mubr.msk.f32.vlgmr.msra.gmra.mxu1 %vm1715_vm3, %v2439_v31 }
 0x4fb   : > { %v1800_v35 = vpop.f32.mrf.mxu1 }
 0x4fc   : > { %v1811_v36 = vmul.f32 %v1810_v33, %v1800_v35 }
 0x4fd   : > { %v2167_v37 = vpop.f32.mrf.mxu1 }
 0x4fe   : > { %v1812_v38 = vadd.f32 %v1811_v36, %v1808_v34 }
 0x500   : > { %1813 = vst [vmem:[#allocation4] sm:$0xff] %v1812_v38 }
 0x501 PF: > { %s27_s22 = sadd.s32 1, %s2433_s22  }
 0x502   : > { %p24_p10 = scmp.ge.s32.totalorder %s27_s22, 7  }
 0x504   :  { %26 = sbr.rel (!%p24_p10) target bundleno = 16 (0x10), region = 99 }

</bundles_post_ra>
